<compile_context>
chip_gen: v5e
topology: v5e:2x2
jax: 0.10.0
libtpu: 0.0.40
codegen_flags: <defaults>
</compile_context>

<pallas_src>
import math

import jax
import jax.numpy as jnp
from jax.experimental import pallas as pl
from jax.experimental.pallas import tpu as pltpu

C_IN = 1024   # encoder in-channels  (== decoder out-channels)
C_MID = 128   # encoder out-channels (== decoder in-channels)


def _autoencoder_kernel(x_ref, w1_ref, b1_ref, w2_ref, b2_ref,
                        enc_ref, dec_ref):
    """Fused: enc = W1 @ x + b1 ; dec = relu(W2 @ enc + b2).

    Shapes seen by the kernel (batch dim squeezed away by the BlockSpec):
      x_ref  : (C_IN,  tn)
      w1_ref : (C_MID, C_IN)     b1_ref : (C_MID, 1)
      w2_ref : (C_IN,  C_MID)    b2_ref : (C_IN,  1)
      enc_ref: (C_MID, tn)       dec_ref: (C_IN,  tn)
    """
    x = x_ref[...]
    enc = jnp.dot(w1_ref[...], x,
                  preferred_element_type=jnp.float32) + b1_ref[...]
    enc_ref[...] = enc.astype(enc_ref.dtype)
    dec = jnp.dot(w2_ref[...], enc.astype(w2_ref.dtype),
                  preferred_element_type=jnp.float32) + b2_ref[...]
    dec_ref[...] = jnp.maximum(dec, 0.0).astype(dec_ref.dtype)


def autoencoder_pallas(x_nchw, w1, b1, w2, b2, *, tn=512):
    """x_nchw: (B, 1024, H, W) float32.
    w1: (128, 1024)  encoder weight (PyTorch (out, in) layout, k=1 squeezed)
    b1: (128,)       encoder bias
    w2: (1024, 128)  decoder weight
    b2: (1024,)      decoder bias
    Returns (encoded (B,128,H,W), decoded (B,1024,H,W)) matching PyTorch.
    """
    B, C, H, W = x_nchw.shape
    assert C == C_IN
    HW = H * W

    # Keep NCHW: just flatten the spatial dims (free, contiguous reshape).
    x_flat = x_nchw.reshape(B, C_IN, HW)

    # Lane-tile over the spatial axis. A full-extent block is always legal,
    # otherwise require a multiple of 128 and let pl.cdiv handle the ragged
    # final tile (boundary writes are masked; boundary compute is per-lane
    # independent so padded lanes never contaminate valid ones).
    if HW <= tn:
        tn_eff = HW
    else:
        tn_eff = tn
        assert tn_eff % 128 == 0, "tn must be a multiple of 128 (lane width)"
    n_tiles = pl.cdiv(HW, tn_eff)

    enc_flat, dec_flat = pl.pallas_call(
        _autoencoder_kernel,
        out_shape=(
            jax.ShapeDtypeStruct((B, C_MID, HW), x_flat.dtype),
            jax.ShapeDtypeStruct((B, C_IN, HW), x_flat.dtype),
        ),
        grid_spec=pltpu.PrefetchScalarGridSpec(
            num_scalar_prefetch=0,
            grid=(B, n_tiles),
            in_specs=[
                # activation tile: (C_IN, tn) per (batch, spatial-tile)
                pl.BlockSpec((pl.Squeezed(), C_IN, tn_eff),
                             lambda b, j: (b, 0, j)),
                pl.BlockSpec((C_MID, C_IN), lambda b, j: (0, 0)),   # W1 resident
                pl.BlockSpec((C_MID, 1),    lambda b, j: (0, 0)),   # b1
                pl.BlockSpec((C_IN, C_MID), lambda b, j: (0, 0)),   # W2 resident
                pl.BlockSpec((C_IN, 1),     lambda b, j: (0, 0)),   # b2
            ],
            out_specs=[
                pl.BlockSpec((pl.Squeezed(), C_MID, tn_eff),
                             lambda b, j: (b, 0, j)),               # encoded
                pl.BlockSpec((pl.Squeezed(), C_IN, tn_eff),
                             lambda b, j: (b, 0, j)),               # decoded
            ],
        ),
        compiler_params=pltpu.CompilerParams(
            dimension_semantics=("parallel", "parallel"),
            # Raise past the 16/32 MiB scoped defaults, stay under v7x's
            # 64 MiB physical VMEM.
            vmem_limit_bytes=48 * 1024 * 1024,
        ),
    )(x_flat, w1, b1.reshape(C_MID, 1), w2, b2.reshape(C_IN, 1))

    # Outputs are already channel-major; only a free reshape back to 4-D.
    encoded = enc_flat.reshape(B, C_MID, H, W)
    decoded = dec_flat.reshape(B, C_IN, H, W)
    return encoded, decoded


def _init_conv1x1_params(key, in_ch, out_ch):
    """Deterministic init matching PyTorch Conv2d defaults:
    U(-1/sqrt(fan_in), 1/sqrt(fan_in)) for both weight and bias.
    Weight is kept in PyTorch (out_ch, in_ch) layout (kernel_size=1 squeezed),
    which is exactly the LHS the kernel wants."""
    kw, kb = jax.random.split(key)
    bound = 1.0 / math.sqrt(in_ch)
    w = jax.random.uniform(kw, (out_ch, in_ch), jnp.float32, -bound, bound)
    b = jax.random.uniform(kb, (out_ch,), jnp.float32, -bound, bound)
    return w, b


def _reference(x_nchw, w1, b1, w2, b2):
    B, C, H, W = x_nchw.shape
    xf = x_nchw.reshape(B, C, H * W)
    enc = jnp.einsum('oc,bcn->bon', w1, xf) + b1[None, :, None]
    dec = jnp.einsum('oc,bcn->bon', w2, enc) + b2[None, :, None]
    dec = jnp.maximum(dec, 0.0)
    return enc.reshape(B, C_MID, H, W), dec.reshape(B, C_IN, H, W)


if __name__ == "__main__":
    key = jax.random.PRNGKey(0)
    k_x, k_enc, k_dec = jax.random.split(key, 3)

    # Channels are fixed by the module (1024 -> 128 -> 1024); small batch/spatial.
    B, H, W = 2, 16, 16
    x = jax.random.normal(k_x, (B, C_IN, H, W), jnp.float32)

    w1, b1 = _init_conv1x1_params(k_enc, C_IN, C_MID)   # encoder (128, 1024)
    w2, b2 = _init_conv1x1_params(k_dec, C_MID, C_IN)   # decoder (1024, 128)

    encoded, decoded = autoencoder_pallas(x, w1, b1, w2, b2)
    jax.block_until_ready((encoded, decoded))

    # Sanity-check against a pure-JAX reference.
    enc_ref, dec_ref = _reference(x, w1, b1, w2, b2)
    assert encoded.shape == (B, C_MID, H, W)
    assert decoded.shape == (B, C_IN, H, W)
    assert jnp.allclose(encoded, enc_ref, atol=1e-4, rtol=1e-4)
    assert jnp.allclose(decoded, dec_ref, atol=1e-4, rtol=1e-4)

    print("KERNEL_OK")
</pallas_src>

<mosaic_0001>
module attributes {stable_mosaic.version = 11 : i64} {
  func.func @_autoencoder_kernel(%arg0: i32, %arg1: i32, %arg2: memref<1x1024x256xf32, #tpu.memory_space<vmem>>, %arg3: memref<128x1024xf32, #tpu.memory_space<vmem>>, %arg4: memref<128x1xf32, #tpu.memory_space<vmem>>, %arg5: memref<1024x128xf32, #tpu.memory_space<vmem>>, %arg6: memref<1024x1xf32, #tpu.memory_space<vmem>>, %arg7: memref<1x128x256xf32, #tpu.memory_space<vmem>>, %arg8: memref<1x1024x256xf32, #tpu.memory_space<vmem>>) attributes {dimension_semantics = [#tpu.dimension_semantics<parallel>, #tpu.dimension_semantics<parallel>], iteration_bounds = array<i64: 2, 1>, scalar_prefetch = 0 : i64, scratch_operands = 0 : i64, tpu.core_type = #tpu.core_type<tc>, window_params = [{transform_indices = @transform_0, window_bounds = array<i64: 1, 1024, 256>}, {pipeline_mode = #tpu.pipeline_mode<synchronous>, transform_indices = @transform_1, window_bounds = array<i64: 128, 1024>}, {pipeline_mode = #tpu.pipeline_mode<synchronous>, transform_indices = @transform_2, window_bounds = array<i64: 128, 1>}, {pipeline_mode = #tpu.pipeline_mode<synchronous>, transform_indices = @transform_3, window_bounds = array<i64: 1024, 128>}, {pipeline_mode = #tpu.pipeline_mode<synchronous>, transform_indices = @transform_4, window_bounds = array<i64: 1024, 1>}, {transform_indices = @transform_5, window_bounds = array<i64: 1, 128, 256>}, {transform_indices = @transform_6, window_bounds = array<i64: 1, 1024, 256>}]} {
    %c0 = arith.constant 0 : index
    %c0_0 = arith.constant 0 : index
    %c0_1 = arith.constant 0 : index
    %0 = vector.load %arg2[%c0, %c0_0, %c0_1] : memref<1x1024x256xf32, #tpu.memory_space<vmem>>, vector<1x1024x256xf32>
    %1 = vector.shape_cast %0 : vector<1x1024x256xf32> to vector<1024x256xf32>
    %c0_2 = arith.constant 0 : index
    %c0_3 = arith.constant 0 : index
    %2 = vector.load %arg3[%c0_2, %c0_3] : memref<128x1024xf32, #tpu.memory_space<vmem>>, vector<128x1024xf32>
    %cst = arith.constant dense<0.000000e+00> : vector<128x256xf32>
    %3 = tpu.matmul %2, %1, %cst {dimension_numbers = #tpu.dot_dimension_numbers<[1], [0], [0], [1], [0, 0, 1, 1], [], []>} : vector<128x1024xf32>, vector<1024x256xf32>, vector<128x256xf32> -> vector<128x256xf32>
    %c0_4 = arith.constant 0 : index
    %c0_5 = arith.constant 0 : index
    %4 = vector.load %arg4[%c0_4, %c0_5] : memref<128x1xf32, #tpu.memory_space<vmem>>, vector<128x1xf32>
    %5 = vector.broadcast %4 : vector<128x1xf32> to vector<128x256xf32>
    %6 = arith.addf %3, %5 : vector<128x256xf32>
    %c0_6 = arith.constant 0 : index
    %c0_7 = arith.constant 0 : index
    %c0_8 = arith.constant 0 : index
    %7 = vector.load %arg7[%c0_6, %c0_7, %c0_8] : memref<1x128x256xf32, #tpu.memory_space<vmem>>, vector<1x128x256xf32>
    %8 = vector.shape_cast %7 : vector<1x128x256xf32> to vector<128x256xf32>
    %9 = vector.shape_cast %6 : vector<128x256xf32> to vector<1x128x256xf32>
    tpu.vector_store %arg7[%c0_6, %c0_7, %c0_8], %9 {strides = array<i32>} : memref<1x128x256xf32, #tpu.memory_space<vmem>>, vector<1x128x256xf32>,
    %c0_9 = arith.constant 0 : index
    %c0_10 = arith.constant 0 : index
    %10 = vector.load %arg5[%c0_9, %c0_10] : memref<1024x128xf32, #tpu.memory_space<vmem>>, vector<1024x128xf32>
    %cst_11 = arith.constant dense<0.000000e+00> : vector<1024x256xf32>
    %11 = tpu.matmul %10, %6, %cst_11 {dimension_numbers = #tpu.dot_dimension_numbers<[1], [0], [0], [1], [0, 0, 1, 1], [], []>} : vector<1024x128xf32>, vector<128x256xf32>, vector<1024x256xf32> -> vector<1024x256xf32>
    %c0_12 = arith.constant 0 : index
    %c0_13 = arith.constant 0 : index
    %12 = vector.load %arg6[%c0_12, %c0_13] : memref<1024x1xf32, #tpu.memory_space<vmem>>, vector<1024x1xf32>
    %13 = vector.broadcast %12 : vector<1024x1xf32> to vector<1024x256xf32>
    %14 = arith.addf %11, %13 : vector<1024x256xf32>
    %cst_14 = arith.constant 0.000000e+00 : f32
    %15 = vector.broadcast %cst_14 : f32 to vector<1024x256xf32>
    %16 = arith.maximumf %14, %15 : vector<1024x256xf32>
    %c0_15 = arith.constant 0 : index
    %c0_16 = arith.constant 0 : index
    %c0_17 = arith.constant 0 : index
    %17 = vector.load %arg8[%c0_15, %c0_16, %c0_17] : memref<1x1024x256xf32, #tpu.memory_space<vmem>>, vector<1x1024x256xf32>
    %18 = vector.shape_cast %17 : vector<1x1024x256xf32> to vector<1024x256xf32>
    %19 = vector.shape_cast %16 : vector<1024x256xf32> to vector<1x1024x256xf32>
    tpu.vector_store %arg8[%c0_15, %c0_16, %c0_17], %19 {strides = array<i32>} : memref<1x1024x256xf32, #tpu.memory_space<vmem>>, vector<1x1024x256xf32>,
    return
  }
  func.func @transform_0(%arg0: i32, %arg1: i32) -> (i32, i32, i32) {
    %c0_i32 = arith.constant 0 : i32
    %c0_i32_0 = arith.constant 0 : i32
    return %arg0, %c0_i32, %arg1 : i32, i32, i32
  }
  func.func @transform_1(%arg0: i32, %arg1: i32) -> (i32, i32) {
    %c0_i32 = arith.constant 0 : i32
    %c0_i32_0 = arith.constant 0 : i32
    %c0_i32_1 = arith.constant 0 : i32
    return %c0_i32, %c0_i32_0 : i32, i32
  }
  func.func @transform_2(%arg0: i32, %arg1: i32) -> (i32, i32) {
    %c0_i32 = arith.constant 0 : i32
    %c0_i32_0 = arith.constant 0 : i32
    %c0_i32_1 = arith.constant 0 : i32
    return %c0_i32, %c0_i32_0 : i32, i32
  }
  func.func @transform_3(%arg0: i32, %arg1: i32) -> (i32, i32) {
    %c0_i32 = arith.constant 0 : i32
    %c0_i32_0 = arith.constant 0 : i32
    %c0_i32_1 = arith.constant 0 : i32
    return %c0_i32, %c0_i32_0 : i32, i32
  }
  func.func @transform_4(%arg0: i32, %arg1: i32) -> (i32, i32) {
    %c0_i32 = arith.constant 0 : i32
    %c0_i32_0 = arith.constant 0 : i32
    %c0_i32_1 = arith.constant 0 : i32
    return %c0_i32, %c0_i32_0 : i32, i32
  }
  func.func @transform_5(%arg0: i32, %arg1: i32) -> (i32, i32, i32) {
    %c0_i32 = arith.constant 0 : i32
    %c0_i32_0 = arith.constant 0 : i32
    return %arg0, %c0_i32, %arg1 : i32, i32, i32
  }
  func.func @transform_6(%arg0: i32, %arg1: i32) -> (i32, i32, i32) {
    %c0_i32 = arith.constant 0 : i32
    %c0_i32_0 = arith.constant 0 : i32
    return %arg0, %c0_i32, %arg1 : i32, i32, i32
  }
}

</mosaic_0001>

<bundles_post_ra>
// kernel: tpu_custom_call.1
= control target key start
LH: loop header
LB: loop body
LE: loop exit
PB: predicated region body
PF: predicated region fallthrough
CT: control target
= control target key end

     0   :  { %s7383_s0 = inlined_call_operand.hbm [shape: f32[2,1024,256], index: 0, kind: input, shape index: {}]   ;;  %s7384_s1 = inlined_call_operand.hbm [shape: f32[128,1024], index: 1, kind: input, shape index: {}]   ;;  %s7385_s2 = inlined_call_operand.vmem [shape: f32[128,1], index: 2, kind: input, shape index: {}]   ;;  %s7386_s3 = inlined_call_operand.hbm [shape: f32[1024,128], index: 3, kind: input, shape index: {}]   ;;  %s7387_s4 = inlined_call_operand.vmem [shape: f32[1024,1], index: 4, kind: input, shape index: {}]   ;;  %s7388_s5 = inlined_call_operand.hbm [shape: f32[2,128,256], index: 5, kind: output, shape index: {0}]   ;;  %s7389_s6 = inlined_call_operand.hbm [shape: f32[2,1024,256], index: 6, kind: output, shape index: {1}]  }
   0x1   :  { %7517 = sst [smem:[#allocation91_spill]] %s7384_s1 }
   0x2   :  { %7518 = sst [smem:[#allocation92_spill]] %s7386_s3 }
   0x3   :  { %12 = vsyncpa [#allocation3], 0 }
   0x4   :  { %14 = vsyncpa [#allocation3 + $0x1], 0 }
   0x5   :  { %15 = vsyncpa [#allocation6], 0 }
   0x6   :  { %16 = vsyncpa [#allocation4], 0 }
   0x7   :  { %18 = vsyncpa [#allocation4 + $0x1], 0 }
   0x8   :  { %19 = vsyncpa [#allocation10], 0 }
   0x9   :  { %21 = vsyncpa [#allocation10 + $0x1], 0  ;;  %s4828_s21 = smov 0   ;;  %s4830_s22 = smov 0  }
   0xa   :  { %s4832_s23 = smov 0   ;;  %s4834_s24 = smov 0  }
   0xb   :  { %s4836_s25 = smov 0   ;;  %s4838_s26 = smov 0  }
   0xc LB: > { %s4285_s27 = sadd.s32 4294967295, %s4780_s26   ;;  %s4286_s28 = sadd.s32 4294967294, %s4780_s26   ;;  %s4780_s26 = sphi %s4838_s26, %s27_s26   ;;  %s4776_s25 = sphi %s4836_s25, %s7803_s25   ;;  %s4772_s24 = sphi %s4834_s24, %s7802_s24   ;;  %s4768_s23 = sphi %s4832_s23, %s7801_s23   ;;  %s4764_s22 = sphi %s4830_s22, %s7800_s22   ;;  %s4760_s21 = sphi %s4828_s21, %s7799_s21  }
   0xd   : > { %p61_p0 = scmp.ne.s32.totalorder %s4764_s22, %s4760_s21  ;;  %p4862_p1 = scmp.eq.s32.totalorder %s4285_s27, 0 }
   0xe   : > { %p4866_p2 = scmp.eq.s32.totalorder %s4285_s27, 1  ;;  %p177_p3 = scmp.eq.s32.totalorder %s4286_s28, 1 }
   0xf   : > { %p4872_p4 = por %p4862_p1, %p61_p0  ;;  %p4287_p5 = scmp.ge.s32.totalorder %s4780_s26, 1 }
  0x10   : > { %p4877_p6 = por %p177_p3, %p61_p0  ;;  %p212_p7 = scmp.lt.s32.totalorder %s4780_s26, 3 }
  0x11   : > { %s7524_s1 = sld [smem:[#allocation91_spill]]  ;;  %s4782_s13 = smov [#allocation5]  }
  0x12   : > { %s7522_s8 = scalar_select %p4877_p6, 1, 0 }
  0x13   : > { %p4885_p8 = pnand %p4287_p5, %p212_p7  ;;  %s225_s14 = sshll.u32 %s4782_s13, 4  ;;  %s226_s14 = int_to_ptr.vmem [resolvable:$true] %s225_s14 }
  0x14   : > { %7523 = sst [smem:[#allocation15_spill]] %s7522_s8  ;;  %p4290_p11 = scmp.ge.s32.totalorder %s4780_s26, 2 }
  0x15   : > { %p4357_p9 = pneg %p4885_p8  ;;  %s7526_s3 = sld [smem:[#allocation92_spill]] }
  0x16   : > { %s4783_s18 = smov 1024   ;;  %s4784_s19 = smov 64  }
  0x17   : > { %s223_s11 = sshll.u32 %s7524_s1, 4  ;;  %p4358_p10 = pnand %p4357_p9, %p4862_p1  ;;  %s224_s11 = int_to_ptr.hbm [resolvable:$true] %s223_s11 }
  0x18   : > { %s4785_s20 = smov [#allocation7]   ;;  %s4786_s28 = smov 128  }
  0x19   : > { %4360 = dma.hbm_to_vmem [thread:$0]  (!%p4358_p10), %s224_s11, 16384, %s226_s14, [#allocation6], %s4783_s18, %s4783_s18, %s4784_s19  }
  0x1a   : > { %s242_s27 = sshll.u32 %s4785_s20, 4  ;;  %s4787_s9 = smov 8   ;;  %s243_s27 = int_to_ptr.vmem [resolvable:$true] %s242_s27 }
  0x1b   : > { %s240_s17 = sshll.u32 %s7526_s3, 4  ;;  %s39_s10 = sadd.s32 1, %s4776_s25  ;;  %s241_s17 = int_to_ptr.hbm [resolvable:$true] %s240_s17 }
  0x1c   : > { %4363 = dma.hbm_to_vmem [thread:$0]  (!%p4358_p10), %s241_s17, 16384, %s243_s27, [#allocation6], %s4786_s28, %s4786_s28, %s4787_s9  }
  0x1d   : > { %s48_s13 = sadd.s32 1, %s4768_s23  ;;  %p41_p12 = scmp.ge.s32.totalorder %s39_s10, 2 }
  0x1e   : > { %p55_p13 = scmp.ne.s32.totalorder %s4768_s23, %s4764_s22  ;;  %p56_p0 = scmp.eq.s32.totalorder %s4780_s26, 0 }
  0x1f   : > { %p4377_p3 = scmp.lt.s32.totalorder %s4780_s26, 2  ;;  %s7805_s10 = smov (%p41_p12, %s39_s10), 0 }
  0x20   : > { %7527 = sst [smem:[#allocation16_spill]] %s7805_s10  ;;  %p4905_p5 = por %p56_p0, %p55_p13 }
  0x21   : > { %p4911_p7 = por %p4866_p2, %p55_p13  ;;  %s43_s15 = ssub.s32 %s4776_s25, %s7805_s10 }
  0x22   : > { %s259_s16 = sand.u32 1, %s4768_s23   ;;  %p46_p9 = scmp.eq.s32.totalorder %s43_s15, 0 }
  0x23   : > { %s4291_s17 = sshll.u32 %s259_s16, 11  ;;  %s4308_s18 = sshll.u32 %s4776_s25, 11 }
  0x24   : > { %s4920_s19 = scalar_select %p46_p9, %s4768_s23, %s48_s13  }
  0x25   : > { %s270_s28 = scalar_lea.hbm %s7383_s0, %s4308_s18  ;;  %s263_s1 = scalar_lea.vmem [#allocation2], %s4291_s17 }
  0x26   : > { %s271_s9 = sshll.u32 %s270_s28, 4  ;;  %s273_s3 = sshll.u32 %s263_s1, 4  ;;  %s272_s9 = int_to_ptr.hbm [resolvable:$true] %s271_s9  ;;  %s274_s3 = int_to_ptr.vmem [resolvable:$true] %s273_s3 }
  0x27   : > { %p4365_p2 = pnand %p4377_p3, %p4905_p5  ;;  %s260_s30 = scalar_lea.sflag [#allocation3], %s259_s16 }
  0x28   : > { %s4788_s10 = smov 256   ;;  %s4789_s8 = smov 16  }
  0x29   : > { %4367 = dma.hbm_to_vmem [thread:$0]  (!%p4365_p2), %s272_s9, 32768, %s274_s3, %s260_s30, %s4788_s10, %s4788_s10, %s4789_s8  }
  0x2a   : > { %285 = sbr.rel (%p4885_p8) target bundleno = 1401 (0x579), region = 40 }
  0x2f   : > { %s4932_s13 = sand.u32 1, %s4764_s22  }
  0x30   : > { %s4295_s1 = sshll.u32 %s4932_s13, 11  ;;  %s288_s15 = scalar_lea.sflag [#allocation3], %s4932_s13 }
  0x31   : > { %s4938_s11 = scalar_lea.vmem [#allocation2], %s4295_s1 }
  0x32   : > { %4743 = dma.done.wait (%p4872_p4), %s288_s15, 32768  }
  0x33   : > { %4745 = vsyncadd (%p4872_p4), %s288_s15, 4294934528 }
  0x34   : > { %4747 = dma.done.wait (%p4862_p1), [#allocation6], 32768  }
  0x35   : > { %4749 = vsyncadd (%p4862_p1), [#allocation6], 4294934528  ;;  %v369_v0 = vld [vmem:[%s4938_s11 + $0xf0] sm:$0xff]  ;;  %v367_v2 = vld [vmem:[%s4938_s11 + $0xe0] sm:$0xff]  ;;  %s4298_s18 = sshll.u32 %s4932_s13, 8  ;;  %s6243_s27 = scalar_lea.vmem [#allocation9], %s4295_s1 }
  0x36   : > { %v433_v1 = vld [vmem:[%s4938_s11 + $0x2f0] sm:$0xff]  ;;  %819 = vmatpush.msra.mxu0 %v369_v0  ;;  %v431_v4 = vld [vmem:[%s4938_s11 + $0x2e0] sm:$0xff]  ;;  %s5417_s20 = scalar_lea.vmem [#allocation8], %s4298_s18  ;;  %s4309_s1 = sshll.u32 %s4772_s24, 8 }
  0x37   : > { %949 = vmatpush.msra.mxu2 %v433_v1  ;;  %v401_v3 = vld [vmem:[%s4938_s11 + $0x1f0] sm:$0xff]  ;;  %v399_v7 = vld [vmem:[%s4938_s11 + $0x1e0] sm:$0xff]  ;;  %s4120_s30 = scalar_lea.hbm %s7388_s5, %s4309_s1  ;;  %s4121_s15 = sshll.u32 %s5417_s20, 4  ;;  %s4122_s15 = int_to_ptr.vmem [resolvable:$true] %s4121_s15 }
  0x38   : > { %v465_v5 = vld [vmem:[%s4938_s11 + $0x3f0] sm:$0xff]  ;;  %884 = vmatpush.msra.mxu1 %v401_v3  ;;  %820 = vmatpush.msra.mxu0 %v367_v2  ;;  %v463_v9 = vld [vmem:[%s4938_s11 + $0x3e0] sm:$0xff]  ;;  %v596_v2 = vld [vmem:[#allocation5 + $0x8] sm:$0xff]  ;;  %s4123_s3 = sshll.u32 %s4120_s30, 4  ;;  %s4102_s29 = scalar_lea.sflag [#allocation4], %s4932_s13  ;;  %s4124_s3 = int_to_ptr.hbm [resolvable:$true] %s4123_s3 }
  0x39   : > { %1014 = vmatpush.msra.mxu3 %v465_v5  ;;  %v365_v6 = vld [vmem:[%s4938_s11 + $0xd0] sm:$0xff]  ;;  %950 = vmatpush.msra.mxu2 %v431_v4  ;;  %v363_v11 = vld [vmem:[%s4938_s11 + $0xc0] sm:$0xff]  ;;  %v598_v3 = vld [vmem:[#allocation5 + $0x18] sm:$0xff]  ;;  %s4676_s7 = sshra.s32 %s4124_s3, 4  ;;  %s4682_s16 = scalar_lea.hbm %s7388_s5, 512  ;;  %s4677_s7 = int_to_ptr.hbm [resolvable:$true] %s4676_s7 }
  0x3a   : > { %v429_v8 = vld [vmem:[%s4938_s11 + $0x2d0] sm:$0xff]  ;;  %885 = vmatpush.msra.mxu1 %v399_v7  ;;  %v427_v12 = vld [vmem:[%s4938_s11 + $0x2c0] sm:$0xff]  ;;  %821 = vmatpush.msra.mxu0 %v365_v6  ;;  %v4790_v6 = vmov 0   ;;  %s4678_s8 = scalar_lea.hbm %s4677_s7, 256  ;;  %p4683_p10 = scmp.lt.s32.totalorder %s4677_s7, %s7388_s5 }
  0x3b   : > { %v397_v10 = vld [vmem:[%s4938_s11 + $0x1d0] sm:$0xff]  ;;  %1015 = vmatpush.msra.mxu3 %v463_v9  ;;  %951 = vmatpush.msra.mxu2 %v429_v8  ;;  %v395_v14 = vld [vmem:[%s4938_s11 + $0x1c0] sm:$0xff]  ;;  %v604_v9 = vld [vmem:[#allocation5 + $0x48] sm:$0xff]  ;;  %p4679_p1 = scmp.ne.s32.totalorder %s4677_s7, %s4678_s8  ;;  %p4684_p12 = scmp.lt.s32.totalorder %s4682_s16, %s4678_s8 }
  0x3c   : > { %v461_v13 = vld [vmem:[%s4938_s11 + $0x3d0] sm:$0xff]  ;;  %v459_v15 = vld [vmem:[%s4938_s11 + $0x3c0] sm:$0xff]  ;;  %886 = vmatpush.msra.mxu1 %v397_v10  ;;  %822 = vmatpush.msra.mxu0 %v363_v11  ;;  %v606_v10 = vld [vmem:[#allocation5 + $0x58] sm:$0xff] }
  0x3d   : > { %1016 = vmatpush.msra.mxu3 %v461_v13  ;;  %v361_v16 = vld [vmem:[%s4938_s11 + $0xb0] sm:$0xff]  ;;  %952 = vmatpush.msra.mxu2 %v427_v12  ;;  %v359_v20 = vld [vmem:[%s4938_s11 + $0xa0] sm:$0xff]  ;;  %v724_v11 = vld [vmem:[%s7385_s2 + $0x8] sm:$0xff]  ;;  %p4680_p4 = pnand %p4679_p1, %p4911_p7  ;;  %p4685_p13 = por %p4684_p12, %p4683_p10 }
  0x3e   : > { %v425_v17 = vld [vmem:[%s4938_s11 + $0x2b0] sm:$0xff]  ;;  %887 = vmatpush.msra.mxu1 %v395_v14  ;;  %v423_v21 = vld [vmem:[%s4938_s11 + $0x2a0] sm:$0xff]  ;;  %823 = vmatpush.msra.mxu0 %v361_v16  ;;  %v726_v12 = vld [vmem:[%s7385_s2 + $0x18] sm:$0xff] }
  0x3f   : > { %v393_v18 = vld [vmem:[%s4938_s11 + $0x1b0] sm:$0xff]  ;;  %1017 = vmatpush.msra.mxu3 %v459_v15  ;;  %953 = vmatpush.msra.mxu2 %v425_v17  ;;  %v391_v22 = vld [vmem:[%s4938_s11 + $0x1a0] sm:$0xff]  ;;  %v612_v15 = vld [vmem:[#allocation5 + $0x88] sm:$0xff]  ;;  %p4681_p8 = pneg %p4680_p4 }
  0x40   : > { %v457_v19 = vld [vmem:[%s4938_s11 + $0x3b0] sm:$0xff]  ;;  %v455_v23 = vld [vmem:[%s4938_s11 + $0x3a0] sm:$0xff]  ;;  %888 = vmatpush.msra.mxu1 %v393_v18  ;;  %824 = vmatpush.msra.mxu0 %v359_v20  ;;  %v614_v16 = vld [vmem:[#allocation5 + $0x98] sm:$0xff] }
  0x41   : > { %1018 = vmatpush.msra.mxu3 %v457_v19  ;;  %v357_v24 = vld [vmem:[%s4938_s11 + $0x90] sm:$0xff]  ;;  %954 = vmatpush.msra.mxu2 %v423_v21  ;;  %v355_v28 = vld [vmem:[%s4938_s11 + $0x80] sm:$0xff]  ;;  %v620_v19 = vld [vmem:[#allocation5 + $0xc8] sm:$0xff]  ;;  %p4686_p0 = pnand %p4685_p13, %p4681_p8 }
  0x42   : > { %v421_v25 = vld [vmem:[%s4938_s11 + $0x290] sm:$0xff]  ;;  %889 = vmatpush.msra.mxu1 %v391_v22  ;;  %v419_v29 = vld [vmem:[%s4938_s11 + $0x280] sm:$0xff]  ;;  %825 = vmatpush.msra.mxu0 %v357_v24  ;;  %v622_v20 = vld [vmem:[#allocation5 + $0xd8] sm:$0xff] }
  0x43   : > { %v389_v26 = vld [vmem:[%s4938_s11 + $0x190] sm:$0xff]  ;;  %1019 = vmatpush.msra.mxu3 %v455_v23  ;;  %955 = vmatpush.msra.mxu2 %v421_v25  ;;  %v387_v30 = vld [vmem:[%s4938_s11 + $0x180] sm:$0xff]  ;;  %v628_v24 = vld [vmem:[#allocation5 + $0x108] sm:$0xff] }
  0x44   : > { %v453_v27 = vld [vmem:[%s4938_s11 + $0x390] sm:$0xff]  ;;  %v451_v31 = vld [vmem:[%s4938_s11 + $0x380] sm:$0xff]  ;;  %890 = vmatpush.msra.mxu1 %v389_v26  ;;  %826 = vmatpush.msra.mxu0 %v355_v28  ;;  %v630_v25 = vld [vmem:[#allocation5 + $0x118] sm:$0xff] }
  0x45   : > { %1020 = vmatpush.msra.mxu3 %v453_v27  ;;  %v353_v32 = vld [vmem:[%s4938_s11 + $0x70] sm:$0xff]  ;;  %956 = vmatpush.msra.mxu2 %v419_v29  ;;  %v351_v36 = vld [vmem:[%s4938_s11 + $0x60] sm:$0xff]  ;;  %v730_v27 = vld [vmem:[%s7385_s2 + $0x38] sm:$0xff] }
  0x46   : > { %v417_v33 = vld [vmem:[%s4938_s11 + $0x270] sm:$0xff]  ;;  %891 = vmatpush.msra.mxu1 %v387_v30  ;;  %v415_v37 = vld [vmem:[%s4938_s11 + $0x260] sm:$0xff]  ;;  %827 = vmatpush.msra.mxu0 %v353_v32  ;;  %v636_v30 = vld [vmem:[#allocation5 + $0x148] sm:$0xff] }
  0x47   : > { %v385_v34 = vld [vmem:[%s4938_s11 + $0x170] sm:$0xff]  ;;  %1021 = vmatpush.msra.mxu3 %v451_v31  ;;  %957 = vmatpush.msra.mxu2 %v417_v33  ;;  %v383_v38 = vld [vmem:[%s4938_s11 + $0x160] sm:$0xff]  ;;  %v638_v31 = vld [vmem:[#allocation5 + $0x158] sm:$0xff] }
  0x48   : > { %v449_v35 = vld [vmem:[%s4938_s11 + $0x370] sm:$0xff]  ;;  %v447_v39 = vld [vmem:[%s4938_s11 + $0x360] sm:$0xff]  ;;  %892 = vmatpush.msra.mxu1 %v385_v34  ;;  %828 = vmatpush.msra.mxu0 %v351_v36  ;;  %v728_v32 = vld [vmem:[%s7385_s2 + $0x28] sm:$0xff] }
  0x49   : > { %1022 = vmatpush.msra.mxu3 %v449_v35  ;;  %v349_v40 = vld [vmem:[%s4938_s11 + $0x50] sm:$0xff]  ;;  %958 = vmatpush.msra.mxu2 %v415_v37  ;;  %v347_v44 = vld [vmem:[%s4938_s11 + $0x40] sm:$0xff]  ;;  %v644_v35 = vld [vmem:[#allocation5 + $0x188] sm:$0xff] }
  0x4a   : > { %v413_v41 = vld [vmem:[%s4938_s11 + $0x250] sm:$0xff]  ;;  %893 = vmatpush.msra.mxu1 %v383_v38  ;;  %v411_v45 = vld [vmem:[%s4938_s11 + $0x240] sm:$0xff]  ;;  %829 = vmatpush.msra.mxu0 %v349_v40  ;;  %v646_v36 = vld [vmem:[#allocation5 + $0x198] sm:$0xff] }
  0x4b   : > { %v381_v42 = vld [vmem:[%s4938_s11 + $0x150] sm:$0xff]  ;;  %1023 = vmatpush.msra.mxu3 %v447_v39  ;;  %959 = vmatpush.msra.mxu2 %v413_v41  ;;  %v379_v46 = vld [vmem:[%s4938_s11 + $0x140] sm:$0xff]  ;;  %v732_v37 = vld [vmem:[%s7385_s2 + $0x48] sm:$0xff] }
  0x4c   : > { %v445_v43 = vld [vmem:[%s4938_s11 + $0x350] sm:$0xff]  ;;  %v443_v47 = vld [vmem:[%s4938_s11 + $0x340] sm:$0xff]  ;;  %894 = vmatpush.msra.mxu1 %v381_v42  ;;  %830 = vmatpush.msra.mxu0 %v347_v44  ;;  %v652_v40 = vld [vmem:[#allocation5 + $0x1c8] sm:$0xff] }
  0x4d   : > { %1024 = vmatpush.msra.mxu3 %v445_v43  ;;  %v345_v48 = vld [vmem:[%s4938_s11 + $0x30] sm:$0xff]  ;;  %960 = vmatpush.msra.mxu2 %v411_v45  ;;  %v343_v52 = vld [vmem:[%s4938_s11 + $0x20] sm:$0xff]  ;;  %v654_v41 = vld [vmem:[#allocation5 + $0x1d8] sm:$0xff] }
  0x4e   : > { %v409_v49 = vld [vmem:[%s4938_s11 + $0x230] sm:$0xff]  ;;  %895 = vmatpush.msra.mxu1 %v379_v46  ;;  %v407_v53 = vld [vmem:[%s4938_s11 + $0x220] sm:$0xff]  ;;  %831 = vmatpush.msra.mxu0 %v345_v48  ;;  %v660_v45 = vld [vmem:[#allocation5 + $0x208] sm:$0xff] }
  0x4f   : > { %v377_v50 = vld [vmem:[%s4938_s11 + $0x130] sm:$0xff]  ;;  %1025 = vmatpush.msra.mxu3 %v443_v47  ;;  %961 = vmatpush.msra.mxu2 %v409_v49  ;;  %v375_v54 = vld [vmem:[%s4938_s11 + $0x120] sm:$0xff]  ;;  %v662_v46 = vld [vmem:[#allocation5 + $0x218] sm:$0xff] }
  0x50   : > { %v441_v51 = vld [vmem:[%s4938_s11 + $0x330] sm:$0xff]  ;;  %v439_v55 = vld [vmem:[%s4938_s11 + $0x320] sm:$0xff]  ;;  %896 = vmatpush.msra.mxu1 %v377_v50  ;;  %832 = vmatpush.msra.mxu0 %v343_v52 }
  0x51   : > { %1026 = vmatpush.msra.mxu3 %v441_v51  ;;  %v341_v56 = vld [vmem:[%s4938_s11 + $0x10] sm:$0xff]  ;;  %962 = vmatpush.msra.mxu2 %v407_v53  ;;  %v339_v60 = vld [vmem:[%s4938_s11] sm:$0xff] }
  0x52   : > { %v405_v57 = vld [vmem:[%s4938_s11 + $0x210] sm:$0xff]  ;;  %897 = vmatpush.msra.mxu1 %v375_v54  ;;  %v403_v61 = vld [vmem:[%s4938_s11 + $0x200] sm:$0xff]  ;;  %833 = vmatpush.msra.mxu0 %v341_v56 }
  0x53   : > { %v373_v58 = vld [vmem:[%s4938_s11 + $0x110] sm:$0xff]  ;;  %1027 = vmatpush.msra.mxu3 %v439_v55  ;;  %963 = vmatpush.msra.mxu2 %v405_v57  ;;  %v595_v62 = vld [vmem:[#allocation5] sm:$0xff] }
  0x54   : > { %v437_v59 = vld [vmem:[%s4938_s11 + $0x310] sm:$0xff]  ;;  %898 = vmatpush.msra.mxu1 %v373_v58  ;;  %v371_v0 = vld [vmem:[%s4938_s11 + $0x100] sm:$0xff]  ;;  %834 = vmatpush.msra.mxu0 %v339_v60 }
  0x55   : > { %v597_v63 = vld [vmem:[#allocation5 + $0x10] sm:$0xff]  ;;  %1028 = vmatpush.msra.mxu3 %v437_v59  ;;  %v435_v1 = vld [vmem:[%s4938_s11 + $0x300] sm:$0xff]  ;;  %964 = vmatpush.msra.mxu2 %v403_v61 }
  0x56   : > { %835 = vmatmul.f32.vlgmr.msra.gmra.mxu0 %v595_v62  ;;  %965 = vmatmul.f32.vlgmr.msra.gmra.mxu2 %v597_v63  ;;  %v723_v4 = vld [vmem:[%s7385_s2] sm:$0xff]  ;;  %v725_v5 = vld [vmem:[%s7385_s2 + $0x10] sm:$0xff]  ;;  %v668_v63 = vld [vmem:[#allocation5 + $0x248] sm:$0xff] }
  0x57   : > { %899 = vmatpush.msra.mxu1 %v371_v0  ;;  %1029 = vmatpush.msra.mxu3 %v435_v1  ;;  %v603_v7 = vld [vmem:[#allocation5 + $0x40] sm:$0xff]  ;;  %v605_v8 = vld [vmem:[#allocation5 + $0x50] sm:$0xff]  ;;  %v670_v0 = vld [vmem:[#allocation5 + $0x258] sm:$0xff] }
  0x58   : > { %900 = vmatmul.f32.vlgmr.msra.gmra.mxu1 %v596_v2  ;;  %1030 = vmatmul.f32.vlgmr.msra.gmra.mxu3 %v598_v3  ;;  %v611_v13 = vld [vmem:[#allocation5 + $0x80] sm:$0xff]  ;;  %v613_v14 = vld [vmem:[#allocation5 + $0x90] sm:$0xff] }
  0x59   : > { %4440 = vset.pattern.permute.xlu0 %v4790_v6  ;;  %4441 = vset.pattern.permute.xlu1 %v4790_v6  ;;  %v619_v17 = vld [vmem:[#allocation5 + $0xc0] sm:$0xff]  ;;  %v621_v18 = vld [vmem:[#allocation5 + $0xd0] sm:$0xff] }
  0x5a   : > { %741 = vperm.xlu0 %4440, %v723_v4   ;;  %751 = vperm.xlu1 %4441, %v725_v5   ;;  %v729_v21 = vld [vmem:[%s7385_s2 + $0x30] sm:$0xff]  ;;  %v627_v22 = vld [vmem:[#allocation5 + $0x100] sm:$0xff] }
  0x5b   : > { %4442 = vset.pattern.permute.xlu2 %v4790_v6  ;;  %v629_v23 = vld [vmem:[#allocation5 + $0x110] sm:$0xff]  ;;  %v727_v26 = vld [vmem:[%s7385_s2 + $0x20] sm:$0xff] }
  0x5c   : > { %761 = vperm.xlu2 %4442, %v727_v26   ;;  %v635_v28 = vld [vmem:[#allocation5 + $0x140] sm:$0xff]  ;;  %v637_v29 = vld [vmem:[#allocation5 + $0x150] sm:$0xff] }
  0x5d   : > { %v643_v33 = vld [vmem:[#allocation5 + $0x180] sm:$0xff]  ;;  %v645_v34 = vld [vmem:[#allocation5 + $0x190] sm:$0xff] }
  0x5e   : > { %838 = vmatmul.f32.gmra.mxu0 %v603_v7  ;;  %968 = vmatmul.f32.gmra.mxu2 %v605_v8  ;;  %v651_v38 = vld [vmem:[#allocation5 + $0x1c0] sm:$0xff]  ;;  %v653_v39 = vld [vmem:[#allocation5 + $0x1d0] sm:$0xff] }
  0x5f   : > { %v733_v42 = vld [vmem:[%s7385_s2 + $0x50] sm:$0xff]  ;;  %v659_v43 = vld [vmem:[#allocation5 + $0x200] sm:$0xff] }
  0x60   : > { %903 = vmatmul.f32.gmra.mxu1 %v604_v9  ;;  %1033 = vmatmul.f32.gmra.mxu3 %v606_v10  ;;  %v661_v44 = vld [vmem:[#allocation5 + $0x210] sm:$0xff]  ;;  %v495_v49 = vld [vmem:[%s4938_s11 + $0x4e0] sm:$0xff] }
  0x61   : > { %v497_v47 = vld [vmem:[%s4938_s11 + $0x4f0] sm:$0xff]  ;;  %v559_v51 = vld [vmem:[%s4938_s11 + $0x6e0] sm:$0xff] }
  0x62   : > { %746 = vperm.xlu0 %4440, %v724_v11   ;;  %756 = vperm.xlu1 %4441, %v726_v12   ;;  %v561_v48 = vld [vmem:[%s4938_s11 + $0x6f0] sm:$0xff]  ;;  %v731_v53 = vld [vmem:[%s7385_s2 + $0x40] sm:$0xff] }
  0x63   : > { %1079 = vmatpush.msrb.mxu0 %v497_v47  ;;  %1209 = vmatpush.msrb.mxu2 %v561_v48  ;;  %v529_v50 = vld [vmem:[%s4938_s11 + $0x5f0] sm:$0xff]  ;;  %v527_v55 = vld [vmem:[%s4938_s11 + $0x5e0] sm:$0xff]  ;;  %v692_v47 = vld [vmem:[#allocation5 + $0x308] sm:$0xff] }
  0x64   : > { %766 = vperm.xlu2 %4442, %v728_v32   ;;  %1144 = vmatpush.msrb.mxu1 %v529_v50  ;;  %v593_v52 = vld [vmem:[%s4938_s11 + $0x7f0] sm:$0xff]  ;;  %v591_v57 = vld [vmem:[%s4938_s11 + $0x7e0] sm:$0xff]  ;;  %v686_v32 = vld [vmem:[#allocation5 + $0x2d8] sm:$0xff] }
  0x65   : > { %1080 = vmatpush.msrb.mxu0 %v495_v49  ;;  %v493_v54 = vld [vmem:[%s4938_s11 + $0x4d0] sm:$0xff]  ;;  %1210 = vmatpush.msrb.mxu2 %v559_v51  ;;  %v667_v58 = vld [vmem:[#allocation5 + $0x240] sm:$0xff]  ;;  %v694_v48 = vld [vmem:[#allocation5 + $0x318] sm:$0xff] }
  0x66   : > { %841 = vmatmul.f32.gmra.mxu0 %v611_v13  ;;  %971 = vmatmul.f32.gmra.mxu2 %v613_v14  ;;  %v557_v56 = vld [vmem:[%s4938_s11 + $0x6d0] sm:$0xff]  ;;  %v491_v60 = vld [vmem:[%s4938_s11 + $0x4c0] sm:$0xff] }
  0x67   : > { %1274 = vmatpush.msrb.mxu3 %v593_v52  ;;  %v669_v59 = vld [vmem:[#allocation5 + $0x250] sm:$0xff]  ;;  %1081 = vmatpush.msrb.mxu0 %v493_v54  ;;  %v555_v62 = vld [vmem:[%s4938_s11 + $0x6c0] sm:$0xff] }
  0x68   : > { %906 = vmatmul.f32.gmra.mxu1 %v612_v15  ;;  %1036 = vmatmul.f32.gmra.mxu3 %v614_v16  ;;  %v525_v61 = vld [vmem:[%s4938_s11 + $0x5d0] sm:$0xff]  ;;  %v523_v3 = vld [vmem:[%s4938_s11 + $0x5c0] sm:$0xff]  ;;  %v676_v15 = vld [vmem:[#allocation5 + $0x288] sm:$0xff] }
  0x69   : > { %1145 = vmatpush.msrb.mxu1 %v527_v55  ;;  %1211 = vmatpush.msrb.mxu2 %v557_v56  ;;  %v589_v1 = vld [vmem:[%s4938_s11 + $0x7d0] sm:$0xff]  ;;  %v587_v5 = vld [vmem:[%s4938_s11 + $0x7c0] sm:$0xff]  ;;  %v678_v16 = vld [vmem:[#allocation5 + $0x298] sm:$0xff] }
  0x6a   : > { %771 = vperm.xlu0 %4440, %v729_v21   ;;  %776 = vperm.xlu1 %4441, %v730_v27   ;;  %v489_v2 = vld [vmem:[%s4938_s11 + $0x4b0] sm:$0xff]  ;;  %v487_v6 = vld [vmem:[%s4938_s11 + $0x4a0] sm:$0xff]  ;;  %v734_v56 = vld [vmem:[%s7385_s2 + $0x58] sm:$0xff] }
  0x6b   : > { %1275 = vmatpush.msrb.mxu3 %v591_v57  ;;  %1082 = vmatpush.msrb.mxu0 %v491_v60  ;;  %v553_v4 = vld [vmem:[%s4938_s11 + $0x6b0] sm:$0xff]  ;;  %v551_v8 = vld [vmem:[%s4938_s11 + $0x6a0] sm:$0xff] }
  0x6c   : > { %781 = vperm.xlu2 %4442, %v731_v53   ;;  %1146 = vmatpush.msrb.mxu1 %v525_v61  ;;  %v521_v7 = vld [vmem:[%s4938_s11 + $0x5b0] sm:$0xff]  ;;  %v735_v10 = vld [vmem:[%s7385_s2 + $0x60] sm:$0xff] }
  0x6d   : > { %1212 = vmatpush.msrb.mxu2 %v555_v62  ;;  %1276 = vmatpush.msrb.mxu3 %v589_v1  ;;  %v585_v9 = vld [vmem:[%s4938_s11 + $0x7b0] sm:$0xff]  ;;  %v675_v11 = vld [vmem:[#allocation5 + $0x280] sm:$0xff] }
  0x6e   : > { %844 = vmatmul.f32.gmra.mxu0 %v619_v17  ;;  %974 = vmatmul.f32.gmra.mxu2 %v621_v18  ;;  %v677_v12 = vld [vmem:[#allocation5 + $0x290] sm:$0xff]  ;;  %v519_v14 = vld [vmem:[%s4938_s11 + $0x5a0] sm:$0xff] }
  0x6f   : > { %1083 = vmatpush.msrb.mxu0 %v489_v2  ;;  %1147 = vmatpush.msrb.mxu1 %v523_v3  ;;  %v485_v13 = vld [vmem:[%s4938_s11 + $0x490] sm:$0xff]  ;;  %v583_v18 = vld [vmem:[%s4938_s11 + $0x7a0] sm:$0xff] }
  0x70   : > { %909 = vmatmul.f32.gmra.mxu1 %v620_v19  ;;  %1039 = vmatmul.f32.gmra.mxu3 %v622_v20  ;;  %v549_v17 = vld [vmem:[%s4938_s11 + $0x690] sm:$0xff]  ;;  %v483_v19 = vld [vmem:[%s4938_s11 + $0x480] sm:$0xff] }
  0x71   : > { %1213 = vmatpush.msrb.mxu2 %v553_v4  ;;  %1277 = vmatpush.msrb.mxu3 %v587_v5  ;;  %v517_v20 = vld [vmem:[%s4938_s11 + $0x590] sm:$0xff]  ;;  %v547_v21 = vld [vmem:[%s4938_s11 + $0x680] sm:$0xff] }
  0x72   : > { %786 = vperm.xlu0 %4440, %v732_v37   ;;  %791 = vperm.xlu1 %4441, %v733_v42   ;;  %v579_v26 = vld [vmem:[%s4938_s11 + $0x780] sm:$0xff]  ;;  %v537_v50 = vld [vmem:[%s4938_s11 + $0x630] sm:$0xff] }
  0x73   : > { %1084 = vmatpush.msrb.mxu0 %v487_v6  ;;  %1148 = vmatpush.msrb.mxu1 %v521_v7  ;;  %v683_v27 = vld [vmem:[#allocation5 + $0x2c0] sm:$0xff]  ;;  %v505_v53 = vld [vmem:[%s4938_s11 + $0x530] sm:$0xff]  ;;  %v738_v6 = vld [vmem:[%s7385_s2 + $0x78] sm:$0xff] }
  0x74   : > { %1214 = vmatpush.msrb.mxu2 %v551_v8  ;;  %1278 = vmatpush.msrb.mxu3 %v585_v9  ;;  %v511_v37 = vld [vmem:[%s4938_s11 + $0x560] sm:$0xff]  ;;  %v569_v55 = vld [vmem:[%s4938_s11 + $0x730] sm:$0xff] }
  0x75   : > { %1085 = vmatpush.msrb.mxu0 %v485_v13  ;;  %1149 = vmatpush.msrb.mxu1 %v519_v14  ;;  %v539_v42 = vld [vmem:[%s4938_s11 + $0x640] sm:$0xff]  ;;  %v469_v57 = vld [vmem:[%s4938_s11 + $0x410] sm:$0xff] }
  0x76   : > { %847 = vmatmul.f32.gmra.mxu0 %v627_v22  ;;  %977 = vmatmul.f32.gmra.mxu2 %v629_v23  ;;  %v581_v22 = vld [vmem:[%s4938_s11 + $0x790] sm:$0xff]  ;;  %v507_v49 = vld [vmem:[%s4938_s11 + $0x540] sm:$0xff] }
  0x77   : > { %1215 = vmatpush.msrb.mxu2 %v549_v17  ;;  %1279 = vmatpush.msrb.mxu3 %v583_v18  ;;  %v481_v23 = vld [vmem:[%s4938_s11 + $0x470] sm:$0xff]  ;;  %v571_v51 = vld [vmem:[%s4938_s11 + $0x740] sm:$0xff]  ;;  %v716_v17 = vld [vmem:[#allocation5 + $0x3c8] sm:$0xff] }
  0x78   : > { %912 = vmatmul.f32.gmra.mxu1 %v628_v24  ;;  %1042 = vmatmul.f32.gmra.mxu3 %v630_v25  ;;  %v515_v24 = vld [vmem:[%s4938_s11 + $0x580] sm:$0xff]  ;;  %v545_v25 = vld [vmem:[%s4938_s11 + $0x670] sm:$0xff]  ;;  %v718_v18 = vld [vmem:[#allocation5 + $0x3d8] sm:$0xff] }
  0x79   : > { %1086 = vmatpush.msrb.mxu0 %v483_v19  ;;  %1150 = vmatpush.msrb.mxu1 %v517_v20  ;;  %v471_v52 = vld [vmem:[%s4938_s11 + $0x420] sm:$0xff]  ;;  %v701_v60 = vld [vmem:[#allocation5 + $0x350] sm:$0xff]  ;;  %v2022_v19 = vld [vmem:[%s7387_s4 + $0x18] sm:$0xff] }
  0x7a   : > { %801 = vperm.xlu0 %4440, %v735_v10   ;;  %1216 = vmatpush.msrb.mxu2 %v547_v21  ;;  %v535_v54 = vld [vmem:[%s4938_s11 + $0x620] sm:$0xff]  ;;  %v533_v61 = vld [vmem:[%s4938_s11 + $0x610] sm:$0xff]  ;;  %v708_v10 = vld [vmem:[#allocation5 + $0x388] sm:$0xff] }
  0x7b   : > { %1280 = vmatpush.msrb.mxu3 %v581_v22  ;;  %1087 = vmatpush.msrb.mxu0 %v481_v23  ;;  %v567_v62 = vld [vmem:[%s4938_s11 + $0x720] sm:$0xff]  ;;  %v501_v2 = vld [vmem:[%s4938_s11 + $0x510] sm:$0xff]  ;;  %v2024_v21 = vld [vmem:[%s7387_s4 + $0x28] sm:$0xff] }
  0x7c   : > { %1151 = vmatpush.msrb.mxu1 %v515_v24  ;;  %1217 = vmatpush.msrb.mxu2 %v545_v25  ;;  %v467_v1 = vld [vmem:[%s4938_s11 + $0x400] sm:$0xff]  ;;  %v565_v4 = vld [vmem:[%s4938_s11 + $0x710] sm:$0xff] }
  0x7d   : > { %1281 = vmatpush.msrb.mxu3 %v579_v26  ;;  %796 = vperm.xlu2 %4442, %v734_v56   ;;  %v531_v3 = vld [vmem:[%s4938_s11 + $0x600] sm:$0xff]  ;;  %v709_v9 = vld [vmem:[#allocation5 + $0x390] sm:$0xff] }
  0x7e   : > { %850 = vmatmul.f32.gmra.mxu0 %v635_v28  ;;  %980 = vmatmul.f32.gmra.mxu2 %v637_v29  ;;  %v685_v28 = vld [vmem:[#allocation5 + $0x2d0] sm:$0xff]  ;;  %v479_v29 = vld [vmem:[%s4938_s11 + $0x460] sm:$0xff] }
  0x7f   : > { %1088 = vmatpush.msrb.mxu0 %v479_v29  ;;  %v499_v5 = vld [vmem:[%s4938_s11 + $0x500] sm:$0xff]  ;;  %v2021_v13 = vld [vmem:[%s7387_s4 + $0x10] sm:$0xff] }
  0x80   : > { %915 = vmatmul.f32.gmra.mxu1 %v636_v30  ;;  %1045 = vmatmul.f32.gmra.mxu3 %v638_v31  ;;  %v513_v30 = vld [vmem:[%s4938_s11 + $0x570] sm:$0xff]  ;;  %v684_v31 = vld [vmem:[#allocation5 + $0x2c8] sm:$0xff]  ;;  %v563_v7 = vld [vmem:[%s4938_s11 + $0x700] sm:$0xff] }
  0x81   : > { %1152 = vmatpush.msrb.mxu1 %v513_v30  ;;  %v707_v8 = vld [vmem:[#allocation5 + $0x380] sm:$0xff]  ;;  %v737_v14 = vld [vmem:[%s7385_s2 + $0x70] sm:$0xff] }
  0x82   : > { %816 = vperm.xlu0 %4440, %v738_v6   ;;  %v599_v23 = vld [vmem:[#allocation5 + $0x20] sm:$0xff]  ;;  %v601_v24 = vld [vmem:[#allocation5 + $0x30] sm:$0xff] }
  0x83   : > { %1153 = vmatpush.msrb.mxu1 %v511_v37  ;;  %v2025_v30 = vld [vmem:[%s7387_s4 + $0x30] sm:$0xff]  ;;  %v607_v37 = vld [vmem:[#allocation5 + $0x60] sm:$0xff] }
  0x84   : > { %v625_v6 = vld [vmem:[#allocation5 + $0xf0] sm:$0xff] }
  0x85   : > { %811 = vperm.xlu2 %4442, %v737_v14   ;;  %v2034_v14 = vld [vmem:[%s7387_s4 + $0x78] sm:$0xff] }
  0x86   : > { %853 = vmatmul.f32.gmra.mxu0 %v643_v33  ;;  %983 = vmatmul.f32.gmra.mxu2 %v645_v34  ;;  %v543_v33 = vld [vmem:[%s4938_s11 + $0x660] sm:$0xff]  ;;  %v577_v34 = vld [vmem:[%s4938_s11 + $0x770] sm:$0xff] }
  0x87   : > { %1218 = vmatpush.msrb.mxu2 %v543_v33  ;;  %1282 = vmatpush.msrb.mxu3 %v577_v34 }
  0x88   : > { %918 = vmatmul.f32.gmra.mxu1 %v644_v35  ;;  %1048 = vmatmul.f32.gmra.mxu3 %v646_v36  ;;  %v736_v35 = vld [vmem:[%s7385_s2 + $0x68] sm:$0xff]  ;;  %v477_v36 = vld [vmem:[%s4938_s11 + $0x450] sm:$0xff] }
  0x89   : > { %806 = vperm.xlu1 %4441, %v736_v35   ;;  %1089 = vmatpush.msrb.mxu0 %v477_v36 }
  0x8a   : > { %2159 = vperm.xlu0 %4440, %v2021_v13  }
  0x8e   : > { %856 = vmatmul.f32.gmra.mxu0 %v651_v38  ;;  %986 = vmatmul.f32.gmra.mxu2 %v653_v39  ;;  %v541_v38 = vld [vmem:[%s4938_s11 + $0x650] sm:$0xff]  ;;  %v575_v39 = vld [vmem:[%s4938_s11 + $0x760] sm:$0xff] }
  0x8f   : > { %1219 = vmatpush.msrb.mxu2 %v541_v38  ;;  %1283 = vmatpush.msrb.mxu3 %v575_v39  ;;  %v609_v38 = vld [vmem:[#allocation5 + $0x70] sm:$0xff] }
  0x90   : > { %921 = vmatmul.f32.gmra.mxu1 %v652_v40  ;;  %1051 = vmatmul.f32.gmra.mxu3 %v654_v41  ;;  %v475_v40 = vld [vmem:[%s4938_s11 + $0x440] sm:$0xff]  ;;  %v509_v41 = vld [vmem:[%s4938_s11 + $0x550] sm:$0xff] }
  0x91   : > { %1090 = vmatpush.msrb.mxu0 %v475_v40  ;;  %1154 = vmatpush.msrb.mxu1 %v509_v41  ;;  %v2020_v41 = vld [vmem:[%s7387_s4 + $0x8] sm:$0xff] }
  0x92   : > { %1220 = vmatpush.msrb.mxu2 %v539_v42  ;;  %2174 = vperm.xlu0 %4440, %v2024_v21  }
  0x93   : > { %1155 = vmatpush.msrb.mxu1 %v507_v49  ;;  %2154 = vperm.xlu2 %4442, %v2020_v41   ;;  %v641_v41 = vld [vmem:[#allocation5 + $0x170] sm:$0xff] }
  0x94   : > { %1221 = vmatpush.msrb.mxu2 %v537_v50 }
  0x95   : > { %1156 = vmatpush.msrb.mxu1 %v505_v53  ;;  %v615_v53 = vld [vmem:[#allocation5 + $0xa0] sm:$0xff] }
  0x96   : > { %859 = vmatmul.f32.gmra.mxu0 %v659_v43  ;;  %989 = vmatmul.f32.gmra.mxu2 %v661_v44  ;;  %v691_v43 = vld [vmem:[#allocation5 + $0x300] sm:$0xff]  ;;  %v693_v44 = vld [vmem:[#allocation5 + $0x310] sm:$0xff] }
  0x97   : > { %1222 = vmatpush.msrb.mxu2 %v535_v54  ;;  %v617_v54 = vld [vmem:[#allocation5 + $0xb0] sm:$0xff] }
  0x98   : > { %924 = vmatmul.f32.gmra.mxu1 %v660_v45  ;;  %1054 = vmatmul.f32.gmra.mxu3 %v662_v46  ;;  %v573_v45 = vld [vmem:[%s4938_s11 + $0x750] sm:$0xff] }
  0x99   : > { %v473_v46 = vld [vmem:[%s4938_s11 + $0x430] sm:$0xff]  ;;  %1284 = vmatpush.msrb.mxu3 %v573_v45  ;;  %1223 = vmatpush.msrb.mxu2 %v533_v61 }
  0x9a   : > { %1091 = vmatpush.msrb.mxu0 %v473_v46  ;;  %v2028_v46 = vld [vmem:[%s7387_s4 + $0x48] sm:$0xff] }
  0x9b   : > { %1285 = vmatpush.msrb.mxu3 %v571_v51  ;;  %1224 = vmatpush.msrb.mxu2 %v531_v3 }
  0x9c   : > { %1092 = vmatpush.msrb.mxu0 %v471_v52 }
  0x9d   : > { %1286 = vmatpush.msrb.mxu3 %v569_v55 }
  0x9e   : > { %862 = vmatmul.f32.gmra.mxu0 %v667_v58  ;;  %992 = vmatmul.f32.gmra.mxu2 %v669_v59  ;;  %v503_v58 = vld [vmem:[%s4938_s11 + $0x520] sm:$0xff] }
  0x9f   : > { %v699_v59 = vld [vmem:[#allocation5 + $0x340] sm:$0xff]  ;;  %1093 = vmatpush.msrb.mxu0 %v469_v57  ;;  %1157 = vmatpush.msrb.mxu1 %v503_v58 }
  0xa0   : > { %927 = vmatmul.f32.gmra.mxu1 %v668_v63  ;;  %1057 = vmatmul.f32.gmra.mxu3 %v670_v0  ;;  %v700_v63 = vld [vmem:[#allocation5 + $0x348] sm:$0xff]  ;;  %v702_v0 = vld [vmem:[#allocation5 + $0x358] sm:$0xff]  ;;  %v2023_v57 = vld [vmem:[%s7387_s4 + $0x20] sm:$0xff] }
  0xa1   : > { %1287 = vmatpush.msrb.mxu3 %v567_v62  ;;  %1094 = vmatpush.msrb.mxu0 %v467_v1  ;;  %v2031_v62 = vld [vmem:[%s7387_s4 + $0x60] sm:$0xff] }
  0xa2   : > { %1158 = vmatpush.msrb.mxu1 %v501_v2  ;;  %2169 = vperm.xlu2 %4442, %v2023_v57  }
  0xa3   : > { %1288 = vmatpush.msrb.mxu3 %v565_v4 }
  0xa4   : > { %1159 = vmatpush.msrb.mxu1 %v499_v5  ;;  %v623_v5 = vld [vmem:[#allocation5 + $0xe0] sm:$0xff] }
  0xa5   : > { %1289 = vmatpush.msrb.mxu3 %v563_v7 }
  0xa6   : > { %865 = vmatmul.f32.gmra.mxu0 %v675_v11  ;;  %995 = vmatmul.f32.gmra.mxu2 %v677_v12  ;;  %v710_v11 = vld [vmem:[#allocation5 + $0x398] sm:$0xff]  ;;  %v2019_v12 = vld [vmem:[%s7387_s4] sm:$0xff] }
  0xa7   : > { %2149 = vperm.xlu1 %4441, %v2019_v12   ;;  %v626_v12 = vld [vmem:[#allocation5 + $0xf8] sm:$0xff] }
  0xa8   : > { %930 = vmatmul.f32.gmra.mxu1 %v676_v15  ;;  %1060 = vmatmul.f32.gmra.mxu3 %v678_v16  ;;  %v715_v15 = vld [vmem:[#allocation5 + $0x3c0] sm:$0xff]  ;;  %v717_v16 = vld [vmem:[#allocation5 + $0x3d0] sm:$0xff] }
  0xae   : > { %868 = vmatmul.f32.gmra.mxu0 %v683_v27  ;;  %998 = vmatmul.f32.gmra.mxu2 %v685_v28  ;;  %v600_v27 = vld [vmem:[#allocation5 + $0x28] sm:$0xff]  ;;  %v602_v28 = vld [vmem:[#allocation5 + $0x38] sm:$0xff] }
  0xaf   : > { %2164 = vperm.xlu1 %4441, %v2022_v19  }
  0xb0   : > { %933 = vmatmul.f32.gmra.mxu1 %v684_v31  ;;  %1063 = vmatmul.f32.gmra.mxu3 %v686_v32  ;;  %v2027_v31 = vld [vmem:[%s7387_s4 + $0x40] sm:$0xff] }
  0xb1   : > { %2189 = vperm.xlu0 %4440, %v2027_v31   ;;  %v2037_v31 = vld [vmem:[%s7387_s4 + $0x90] sm:$0xff] }
  0xb6   : > { %871 = vmatmul.f32.gmra.mxu0 %v691_v43  ;;  %1001 = vmatmul.f32.gmra.mxu2 %v693_v44  ;;  %v608_v43 = vld [vmem:[#allocation5 + $0x68] sm:$0xff]  ;;  %v610_v44 = vld [vmem:[#allocation5 + $0x78] sm:$0xff] }
  0xb7   : > { %2179 = vperm.xlu1 %4441, %v2025_v30  }
  0xb8   : > { %936 = vmatmul.f32.gmra.mxu1 %v692_v47  ;;  %1066 = vmatmul.f32.gmra.mxu3 %v694_v48  ;;  %v2030_v48 = vld [vmem:[%s7387_s4 + $0x58] sm:$0xff] }
  0xb9   : > { %2204 = vperm.xlu0 %4440, %v2030_v48   ;;  %v642_v48 = vld [vmem:[#allocation5 + $0x178] sm:$0xff] }
  0xbe   : > { %874 = vmatmul.f32.gmra.mxu0 %v699_v59  ;;  %1004 = vmatmul.f32.gmra.mxu2 %v701_v60  ;;  %v616_v59 = vld [vmem:[#allocation5 + $0xa8] sm:$0xff]  ;;  %v618_v60 = vld [vmem:[#allocation5 + $0xb8] sm:$0xff] }
  0xbf   : > { %2194 = vperm.xlu1 %4441, %v2028_v46   ;;  %v640_v46 = vld [vmem:[#allocation5 + $0x168] sm:$0xff] }
  0xc0   : > { %939 = vmatmul.f32.gmra.mxu1 %v700_v63  ;;  %1069 = vmatmul.f32.gmra.mxu3 %v702_v0  ;;  %v2033_v63 = vld [vmem:[%s7387_s4 + $0x70] sm:$0xff] }
  0xc1   : > { %2219 = vperm.xlu0 %4440, %v2033_v63  }
  0xc6   : > { %877 = vmatmul.f32.gmra.mxu0 %v707_v8  ;;  %1007 = vmatmul.f32.gmra.mxu2 %v709_v9  ;;  %v2026_v9 = vld [vmem:[%s7387_s4 + $0x38] sm:$0xff] }
  0xc7   : > { %2209 = vperm.xlu1 %4441, %v2031_v62   ;;  %2184 = vperm.xlu2 %4442, %v2026_v9   ;;  %v2035_v62 = vld [vmem:[%s7387_s4 + $0x80] sm:$0xff] }
  0xc8   : > { %942 = vmatmul.f32.gmra.mxu1 %v708_v10  ;;  %1072 = vmatmul.f32.gmra.mxu3 %v710_v11  ;;  %v624_v11 = vld [vmem:[#allocation5 + $0xe8] sm:$0xff] }
  0xcc   : > { %v5133_v20 = vpop.permute.xlu0 %741  ;;  %v5156_v47 = vpop.permute.xlu1 %751 }
  0xce   : > { %880 = vmatmul.f32.gmra.mxu0 %v715_v15  ;;  %1010 = vmatmul.f32.gmra.mxu2 %v717_v16  ;;  %v5184_v15 = vpop.permute.xlu2 %761  ;;  %v2036_v16 = vld [vmem:[%s7387_s4 + $0x88] sm:$0xff] }
  0xcf   : > { %2224 = vperm.xlu1 %4441, %v2034_v14   ;;  %2234 = vperm.xlu0 %4440, %v2036_v16  }
  0xd0   : > { %945 = vmatmul.f32.gmra.mxu1 %v716_v17  ;;  %1075 = vmatmul.f32.gmra.mxu3 %v718_v18 }
  0xd3   : > { %v836_v22 = vpop.f32.mrf.mxu0 }
  0xd4   : > { %v837_v25 = vadd.f32 %v836_v22, %v5133_v20  ;;  %v5145_v33 = vpop.permute.xlu0 %746  ;;  %v5173_v1 = vpop.permute.xlu1 %756  ;;  %v631_v22 = vld [vmem:[#allocation5 + $0x120] sm:$0xff] }
  0xd5   : > { %v901_v26 = vpop.f32.mrf.mxu1 }
  0xd6   : > { %v902_v29 = vadd.f32 %v901_v26, %v837_v25  ;;  %1095 = vmatmul.f32.vlgmr.msrb.gmra.mxu0 %v599_v23  ;;  %1225 = vmatmul.f32.vlgmr.msrb.gmra.mxu2 %v601_v24  ;;  %v633_v23 = vld [vmem:[#allocation5 + $0x130] sm:$0xff] }
  0xd7   : > { %v2029_v26 = vld [vmem:[%s7387_s4 + $0x50] sm:$0xff]  ;;  %2239 = vperm.xlu1 %4441, %v2037_v31   ;;  %v663_v31 = vld [vmem:[#allocation5 + $0x220] sm:$0xff] }
  0xd8   : > { %1160 = vmatmul.f32.vlgmr.msrb.gmra.mxu1 %v600_v27  ;;  %1290 = vmatmul.f32.vlgmr.msrb.gmra.mxu3 %v602_v28  ;;  %v632_v28 = vld [vmem:[#allocation5 + $0x128] sm:$0xff] }
  0xd9   : > { %v966_v32 = vpop.f32.mrf.mxu2  ;;  %2199 = vperm.xlu2 %4442, %v2029_v26  }
  0xda   : > { %v967_v34 = vadd.f32 %v966_v32, %v902_v29  ;;  %v634_v29 = vld [vmem:[#allocation5 + $0x138] sm:$0xff]  ;;  %v2039_v32 = vld [vmem:[%s7387_s4 + $0xa0] sm:$0xff] }
  0xdb   : > { %v839_v35 = vpop.f32.mrf.mxu0  ;;  %v1031_v36 = vpop.f32.mrf.mxu3  ;;  %2249 = vperm.xlu0 %4440, %v2039_v32   ;;  %v665_v32 = vld [vmem:[#allocation5 + $0x230] sm:$0xff] }
  0xdc   : > { %v5147_v39 = vadd.f32 %v1031_v36, %v967_v34  ;;  %v840_v40 = vadd.f32 %v839_v35, %v5145_v33  ;;  %v5201_v35 = vpop.permute.xlu2 %766 }
  0xdd   : > { %v904_v42 = vpop.f32.mrf.mxu1 }
  0xde   : > { %v905_v45 = vadd.f32 %v904_v42, %v840_v40  ;;  %1098 = vmatmul.f32.gmra.mxu0 %v607_v37  ;;  %1228 = vmatmul.f32.gmra.mxu2 %v609_v38  ;;  %v639_v40 = vld [vmem:[#allocation5 + $0x160] sm:$0xff] }
  0xe0   : > { %1163 = vmatmul.f32.gmra.mxu1 %v608_v43  ;;  %1293 = vmatmul.f32.gmra.mxu3 %v610_v44  ;;  %v2032_v44 = vld [vmem:[%s7387_s4 + $0x68] sm:$0xff] }
  0xe1   : > { %v969_v49 = vpop.f32.mrf.mxu2  ;;  %2214 = vperm.xlu2 %4442, %v2032_v44   ;;  %v370_v44 = vld [vmem:[%s4938_s11 + $0xf8] sm:$0xff] }
  0xe2   : > { %v970_v50 = vadd.f32 %v969_v49, %v905_v45  ;;  %1339 = vmatpush.msra.mxu0 %v370_v44  ;;  %v2049_v44 = vld [vmem:[%s7387_s4 + $0xf0] sm:$0xff] }
  0xe3   : > { %v842_v51 = vpop.f32.mrf.mxu0  ;;  %v1034_v52 = vpop.f32.mrf.mxu3 }
  0xe4   : > { %v5161_v55 = vadd.f32 %v1034_v52, %v970_v50  ;;  %v843_v56 = vadd.f32 %v842_v51, %v5156_v47  ;;  %v2040_v50 = vld [vmem:[%s7387_s4 + $0xa8] sm:$0xff]  ;;  %v2042_v51 = vld [vmem:[%s7387_s4 + $0xb8] sm:$0xff] }
  0xe5   : > { %v907_v58 = vpop.f32.mrf.mxu1  ;;  %2254 = vperm.xlu1 %4441, %v2040_v50   ;;  %2264 = vperm.xlu0 %4440, %v2042_v51   ;;  %v432_v50 = vld [vmem:[%s4938_s11 + $0x2e8] sm:$0xff] }
  0xe6   : > { %v908_v61 = vadd.f32 %v907_v58, %v843_v56  ;;  %1101 = vmatmul.f32.gmra.mxu0 %v615_v53  ;;  %1231 = vmatmul.f32.gmra.mxu2 %v617_v54  ;;  %v5215_v53 = vpop.permute.xlu0 %771  ;;  %v647_v58 = vld [vmem:[#allocation5 + $0x1a0] sm:$0xff] }
  0xe8   : > { %1166 = vmatmul.f32.gmra.mxu1 %v616_v59  ;;  %1296 = vmatmul.f32.gmra.mxu3 %v618_v60  ;;  %v649_v59 = vld [vmem:[#allocation5 + $0x1b0] sm:$0xff] }
  0xe9   : > { %v972_v0 = vpop.f32.mrf.mxu2  ;;  %2229 = vperm.xlu2 %4442, %v2035_v62  }
  0xea   : > { %v973_v2 = vadd.f32 %v972_v0, %v908_v61  ;;  %v648_v0 = vld [vmem:[#allocation5 + $0x1a8] sm:$0xff] }
  0xeb   : > { %v845_v3 = vpop.f32.mrf.mxu0  ;;  %v1037_v4 = vpop.f32.mrf.mxu3 }
  0xec   : > { %v5175_v7 = vadd.f32 %v1037_v4, %v973_v2  ;;  %v846_v8 = vadd.f32 %v845_v3, %v5173_v1  ;;  %v650_v2 = vld [vmem:[#allocation5 + $0x1b8] sm:$0xff]  ;;  %v2043_v4 = vld [vmem:[%s7387_s4 + $0xc0] sm:$0xff] }
  0xed   : > { %v910_v10 = vpop.f32.mrf.mxu1  ;;  %2269 = vperm.xlu1 %4441, %v2043_v4  }
  0xee   : > { %v911_v13 = vadd.f32 %v910_v10, %v846_v8  ;;  %1104 = vmatmul.f32.gmra.mxu0 %v623_v5  ;;  %1234 = vmatmul.f32.gmra.mxu2 %v625_v6  ;;  %v2045_v5 = vld [vmem:[%s7387_s4 + $0xd0] sm:$0xff]  ;;  %v5229_v8 = vpop.permute.xlu1 %776 }
  0xef   : > { %2279 = vperm.xlu0 %4440, %v2045_v5   ;;  %v364_v5 = vld [vmem:[%s4938_s11 + $0xc8] sm:$0xff] }
  0xf0   : > { %1169 = vmatmul.f32.gmra.mxu1 %v624_v11  ;;  %1299 = vmatmul.f32.gmra.mxu3 %v626_v12  ;;  %v655_v12 = vld [vmem:[#allocation5 + $0x1e0] sm:$0xff] }
  0xf1   : > { %v975_v17 = vpop.f32.mrf.mxu2 }
  0xf2   : > { %v976_v18 = vadd.f32 %v975_v17, %v911_v13  ;;  %v657_v13 = vld [vmem:[#allocation5 + $0x1f0] sm:$0xff]  ;;  %v2038_v17 = vld [vmem:[%s7387_s4 + $0x98] sm:$0xff] }
  0xf3   : > { %v848_v19 = vpop.f32.mrf.mxu0  ;;  %v1040_v21 = vpop.f32.mrf.mxu3  ;;  %2244 = vperm.xlu2 %4442, %v2038_v17   ;;  %v362_v17 = vld [vmem:[%s4938_s11 + $0xb8] sm:$0xff] }
  0xf4   : > { %v5189_v24 = vadd.f32 %v1040_v21, %v976_v18  ;;  %v849_v25 = vadd.f32 %v848_v19, %v5184_v15  ;;  %v656_v19 = vld [vmem:[#allocation5 + $0x1e8] sm:$0xff]  ;;  %v658_v21 = vld [vmem:[#allocation5 + $0x1f8] sm:$0xff] }
  0xf5   : > { %v913_v27 = vpop.f32.mrf.mxu1 }
  0xf6   : > { %v914_v30 = vadd.f32 %v913_v27, %v849_v25  ;;  %1107 = vmatmul.f32.gmra.mxu0 %v631_v22  ;;  %1237 = vmatmul.f32.gmra.mxu2 %v633_v23  ;;  %v2046_v23 = vld [vmem:[%s7387_s4 + $0xd8] sm:$0xff]  ;;  %v2048_v25 = vld [vmem:[%s7387_s4 + $0xe8] sm:$0xff]  ;;  %v5243_v27 = vpop.permute.xlu2 %781 }
  0xf7   : > { %2284 = vperm.xlu1 %4441, %v2046_v23   ;;  %2294 = vperm.xlu0 %4440, %v2048_v25   ;;  %v5280_v25 = vpop.permute.xlu1 %791 }
  0xf8   : > { %1172 = vmatmul.f32.gmra.mxu1 %v632_v28  ;;  %1302 = vmatmul.f32.gmra.mxu3 %v634_v29 }
  0xf9   : > { %v978_v34 = vpop.f32.mrf.mxu2 }
  0xfa   : > { %v979_v36 = vadd.f32 %v978_v34, %v914_v30 }
  0xfb   : > { %v851_v37 = vpop.f32.mrf.mxu0  ;;  %v1043_v38 = vpop.f32.mrf.mxu3 }
  0xfc   : > { %v5203_v42 = vadd.f32 %v1043_v38, %v979_v36  ;;  %v852_v43 = vadd.f32 %v851_v37, %v5201_v35  ;;  %v2041_v37 = vld [vmem:[%s7387_s4 + $0xb0] sm:$0xff] }
  0xfd   : > { %v916_v45 = vpop.f32.mrf.mxu1  ;;  %2259 = vperm.xlu2 %4442, %v2041_v37   ;;  %v679_v37 = vld [vmem:[#allocation5 + $0x2a0] sm:$0xff] }
  0xfe   : > { %v917_v49 = vadd.f32 %v916_v45, %v852_v43  ;;  %1110 = vmatmul.f32.gmra.mxu0 %v639_v40  ;;  %1240 = vmatmul.f32.gmra.mxu2 %v641_v41  ;;  %v664_v40 = vld [vmem:[#allocation5 + $0x228] sm:$0xff]  ;;  %v666_v41 = vld [vmem:[#allocation5 + $0x238] sm:$0xff] }
  0xff   : > { %v434_v45 = vld [vmem:[%s4938_s11 + $0x2f8] sm:$0xff]  ;;  %2299 = vperm.xlu1 %4441, %v2049_v44  }
 0x100   : > { %1175 = vmatmul.f32.gmra.mxu1 %v640_v46  ;;  %1305 = vmatmul.f32.gmra.mxu3 %v642_v48  ;;  %v2051_v46 = vld [vmem:[%s7387_s4 + $0x100] sm:$0xff]  ;;  %v368_v48 = vld [vmem:[%s4938_s11 + $0xe8] sm:$0xff] }
 0x101   : > { %v981_v52 = vpop.f32.mrf.mxu2  ;;  %1469 = vmatpush.msra.mxu2 %v434_v45  ;;  %1340 = vmatpush.msra.mxu0 %v368_v48  ;;  %v682_v48 = vld [vmem:[#allocation5 + $0x2b8] sm:$0xff] }
 0x102   : > { %v982_v54 = vadd.f32 %v981_v52, %v917_v49  ;;  %v402_v49 = vld [vmem:[%s4938_s11 + $0x1f8] sm:$0xff]  ;;  %v5259_v52 = vpop.permute.xlu0 %786  ;;  %2309 = vperm.xlu0 %4440, %v2051_v46   ;;  %v680_v46 = vld [vmem:[#allocation5 + $0x2a8] sm:$0xff] }
 0x103   : > { %v854_v56 = vpop.f32.mrf.mxu0  ;;  %v1046_v57 = vpop.f32.mrf.mxu3  ;;  %1404 = vmatpush.msra.mxu1 %v402_v49  ;;  %1470 = vmatpush.msra.mxu2 %v432_v50  ;;  %v358_v50 = vld [vmem:[%s4938_s11 + $0x98] sm:$0xff] }
 0x104   : > { %v5217_v60 = vadd.f32 %v1046_v57, %v982_v54  ;;  %v855_v61 = vadd.f32 %v854_v56, %v5215_v53  ;;  %v466_v54 = vld [vmem:[%s4938_s11 + $0x3f8] sm:$0xff]  ;;  %v671_v57 = vld [vmem:[#allocation5 + $0x260] sm:$0xff] }
 0x105   : > { %v919_v63 = vpop.f32.mrf.mxu1  ;;  %1534 = vmatpush.msra.mxu3 %v466_v54  ;;  %v422_v54 = vld [vmem:[%s4938_s11 + $0x298] sm:$0xff] }
 0x106   : > { %v920_v3 = vadd.f32 %v919_v63, %v855_v61  ;;  %1113 = vmatmul.f32.gmra.mxu0 %v647_v58  ;;  %1243 = vmatmul.f32.gmra.mxu2 %v649_v59  ;;  %v366_v58 = vld [vmem:[%s4938_s11 + $0xd8] sm:$0xff]  ;;  %v400_v59 = vld [vmem:[%s4938_s11 + $0x1e8] sm:$0xff]  ;;  %v673_v63 = vld [vmem:[#allocation5 + $0x270] sm:$0xff] }
 0x107   : > { %1341 = vmatpush.msra.mxu0 %v366_v58  ;;  %1405 = vmatpush.msra.mxu1 %v400_v59  ;;  %v356_v58 = vld [vmem:[%s4938_s11 + $0x88] sm:$0xff] }
 0x108   : > { %1178 = vmatmul.f32.gmra.mxu1 %v648_v0  ;;  %1308 = vmatmul.f32.gmra.mxu3 %v650_v2  ;;  %v430_v0 = vld [vmem:[%s4938_s11 + $0x2d8] sm:$0xff]  ;;  %v464_v2 = vld [vmem:[%s4938_s11 + $0x3e8] sm:$0xff] }
 0x109   : > { %v984_v6 = vpop.f32.mrf.mxu2  ;;  %1471 = vmatpush.msra.mxu2 %v430_v0  ;;  %1535 = vmatpush.msra.mxu3 %v464_v2  ;;  %v454_v2 = vld [vmem:[%s4938_s11 + $0x398] sm:$0xff] }
 0x10a   : > { %v985_v9 = vadd.f32 %v984_v6, %v920_v3  ;;  %v398_v6 = vld [vmem:[%s4938_s11 + $0x1d8] sm:$0xff]  ;;  %1342 = vmatpush.msra.mxu0 %v364_v5 }
 0x10b   : > { %v857_v10 = vpop.f32.mrf.mxu0  ;;  %v1049_v11 = vpop.f32.mrf.mxu3  ;;  %1406 = vmatpush.msra.mxu1 %v398_v6 }
 0x10c   : > { %v5231_v14 = vadd.f32 %v1049_v11, %v985_v9  ;;  %v858_v16 = vadd.f32 %v857_v10, %v5229_v8  ;;  %v428_v9 = vld [vmem:[%s4938_s11 + $0x2c8] sm:$0xff]  ;;  %1343 = vmatpush.msra.mxu0 %v362_v17 }
 0x10d   : > { %v922_v18 = vpop.f32.mrf.mxu1  ;;  %v672_v11 = vld [vmem:[#allocation5 + $0x268] sm:$0xff]  ;;  %1472 = vmatpush.msra.mxu2 %v428_v9  ;;  %v687_v9 = vld [vmem:[#allocation5 + $0x2e0] sm:$0xff] }
 0x10e   : > { %v923_v22 = vadd.f32 %v922_v18, %v858_v16  ;;  %1116 = vmatmul.f32.gmra.mxu0 %v655_v12  ;;  %1246 = vmatmul.f32.gmra.mxu2 %v657_v13  ;;  %v674_v12 = vld [vmem:[#allocation5 + $0x278] sm:$0xff]  ;;  %v396_v18 = vld [vmem:[%s4938_s11 + $0x1c8] sm:$0xff] }
 0x10f   : > { %v462_v16 = vld [vmem:[%s4938_s11 + $0x3d8] sm:$0xff]  ;;  %1407 = vmatpush.msra.mxu1 %v396_v18  ;;  %v688_v18 = vld [vmem:[#allocation5 + $0x2e8] sm:$0xff] }
 0x110   : > { %1181 = vmatmul.f32.gmra.mxu1 %v656_v19  ;;  %1311 = vmatmul.f32.gmra.mxu3 %v658_v21  ;;  %v426_v19 = vld [vmem:[%s4938_s11 + $0x2b8] sm:$0xff] }
 0x111   : > { %v987_v26 = vpop.f32.mrf.mxu2  ;;  %v2054_v21 = vld [vmem:[%s7387_s4 + $0x118] sm:$0xff]  ;;  %1536 = vmatpush.msra.mxu3 %v462_v16  ;;  %1473 = vmatpush.msra.mxu2 %v426_v19 }
 0x112   : > { %v988_v28 = vadd.f32 %v987_v26, %v923_v22  ;;  %v460_v22 = vld [vmem:[%s4938_s11 + $0x3c8] sm:$0xff]  ;;  %2324 = vperm.xlu0 %4440, %v2054_v21   ;;  %v418_v16 = vld [vmem:[%s4938_s11 + $0x278] sm:$0xff] }
 0x113   : > { %v860_v29 = vpop.f32.mrf.mxu0  ;;  %v1052_v30 = vpop.f32.mrf.mxu3  ;;  %v360_v26 = vld [vmem:[%s4938_s11 + $0xa8] sm:$0xff]  ;;  %1537 = vmatpush.msra.mxu3 %v460_v22  ;;  %v690_v19 = vld [vmem:[#allocation5 + $0x2f8] sm:$0xff] }
 0x114   : > { %v5245_v34 = vadd.f32 %v1052_v30, %v988_v28  ;;  %v861_v36 = vadd.f32 %v860_v29, %v5243_v27  ;;  %v394_v28 = vld [vmem:[%s4938_s11 + $0x1b8] sm:$0xff]  ;;  %v424_v30 = vld [vmem:[%s4938_s11 + $0x2a8] sm:$0xff]  ;;  %1344 = vmatpush.msra.mxu0 %v360_v26 }
 0x115   : > { %v925_v38 = vpop.f32.mrf.mxu1  ;;  %1408 = vmatpush.msra.mxu1 %v394_v28  ;;  %1474 = vmatpush.msra.mxu2 %v424_v30  ;;  %v452_v22 = vld [vmem:[%s4938_s11 + $0x388] sm:$0xff]  ;;  %v386_v26 = vld [vmem:[%s4938_s11 + $0x178] sm:$0xff]  ;;  %v2047_v30 = vld [vmem:[%s7387_s4 + $0xe0] sm:$0xff] }
 0x116   : > { %v926_v43 = vadd.f32 %v925_v38, %v861_v36  ;;  %1119 = vmatmul.f32.gmra.mxu0 %v663_v31  ;;  %1249 = vmatmul.f32.gmra.mxu2 %v665_v32  ;;  %v458_v31 = vld [vmem:[%s4938_s11 + $0x3b8] sm:$0xff]  ;;  %v681_v38 = vld [vmem:[#allocation5 + $0x2b0] sm:$0xff]  ;;  %v416_v28 = vld [vmem:[%s4938_s11 + $0x268] sm:$0xff] }
 0x117   : > { %1538 = vmatpush.msra.mxu3 %v458_v31  ;;  %1345 = vmatpush.msra.mxu0 %v358_v50 }
 0x118   : > { %1184 = vmatmul.f32.gmra.mxu1 %v664_v40  ;;  %1314 = vmatmul.f32.gmra.mxu3 %v666_v41 }
 0x119   : > { %v990_v51 = vpop.f32.mrf.mxu2  ;;  %1475 = vmatpush.msra.mxu2 %v422_v54  ;;  %1346 = vmatpush.msra.mxu0 %v356_v58  ;;  %v448_v54 = vld [vmem:[%s4938_s11 + $0x368] sm:$0xff]  ;;  %v698_v58 = vld [vmem:[#allocation5 + $0x338] sm:$0xff] }
 0x11a   : > { %v991_v56 = vadd.f32 %v990_v51, %v926_v43  ;;  %v2044_v43 = vld [vmem:[%s7387_s4 + $0xc8] sm:$0xff] }
 0x11b   : > { %v863_v61 = vpop.f32.mrf.mxu0  ;;  %v1055_v62 = vpop.f32.mrf.mxu3  ;;  %v392_v51 = vld [vmem:[%s4938_s11 + $0x1a8] sm:$0xff]  ;;  %2274 = vperm.xlu2 %4442, %v2044_v43  }
 0x11c   : > { %v5266_v3 = vadd.f32 %v1055_v62, %v991_v56  ;;  %v864_v4 = vadd.f32 %v863_v61, %v5259_v52  ;;  %v456_v56 = vld [vmem:[%s4938_s11 + $0x3a8] sm:$0xff]  ;;  %v5303_v61 = vpop.permute.xlu2 %796  ;;  %1409 = vmatpush.msra.mxu1 %v392_v51  ;;  %v390_v62 = vld [vmem:[%s4938_s11 + $0x198] sm:$0xff] }
 0x11d   : > { %v928_v10 = vpop.f32.mrf.mxu1  ;;  %1539 = vmatpush.msra.mxu3 %v456_v56  ;;  %v384_v43 = vld [vmem:[%s4938_s11 + $0x168] sm:$0xff]  ;;  %v414_v51 = vld [vmem:[%s4938_s11 + $0x258] sm:$0xff] }
 0x11e   : > { %v929_v13 = vadd.f32 %v928_v10, %v864_v4  ;;  %1122 = vmatmul.f32.gmra.mxu0 %v671_v57  ;;  %1252 = vmatmul.f32.gmra.mxu2 %v673_v63  ;;  %v2057_v57 = vld [vmem:[%s7387_s4 + $0x130] sm:$0xff]  ;;  %v420_v63 = vld [vmem:[%s4938_s11 + $0x288] sm:$0xff]  ;;  %v354_v4 = vld [vmem:[%s4938_s11 + $0x78] sm:$0xff] }
 0x11f   : > { %v689_v10 = vld [vmem:[#allocation5 + $0x2f0] sm:$0xff]  ;;  %2339 = vperm.xlu0 %4440, %v2057_v57   ;;  %1410 = vmatpush.msra.mxu1 %v390_v62  ;;  %v696_v57 = vld [vmem:[#allocation5 + $0x328] sm:$0xff] }
 0x120   : > { %1187 = vmatmul.f32.gmra.mxu1 %v672_v11  ;;  %1317 = vmatmul.f32.gmra.mxu3 %v674_v12  ;;  %v348_v62 = vld [vmem:[%s4938_s11 + $0x48] sm:$0xff] }
 0x121   : > { %v993_v23 = vpop.f32.mrf.mxu2  ;;  %1476 = vmatpush.msra.mxu2 %v420_v63  ;;  %1540 = vmatpush.msra.mxu3 %v454_v2  ;;  %v382_v63 = vld [vmem:[%s4938_s11 + $0x158] sm:$0xff] }
 0x122   : > { %v994_v29 = vadd.f32 %v993_v23, %v929_v13  ;;  %v388_v13 = vld [vmem:[%s4938_s11 + $0x188] sm:$0xff]  ;;  %1347 = vmatpush.msra.mxu0 %v354_v4  ;;  %v446_v2 = vld [vmem:[%s4938_s11 + $0x358] sm:$0xff] }
 0x123   : > { %v866_v32 = vpop.f32.mrf.mxu0  ;;  %v1058_v36 = vpop.f32.mrf.mxu3  ;;  %v352_v23 = vld [vmem:[%s4938_s11 + $0x68] sm:$0xff]  ;;  %1411 = vmatpush.msra.mxu1 %v388_v13  ;;  %1477 = vmatpush.msra.mxu2 %v418_v16  ;;  %v346_v4 = vld [vmem:[%s4938_s11 + $0x38] sm:$0xff] }
 0x124   : > { %v5286_v40 = vadd.f32 %v1058_v36, %v994_v29  ;;  %v867_v41 = vadd.f32 %v866_v32, %v5280_v25  ;;  %v450_v29 = vld [vmem:[%s4938_s11 + $0x378] sm:$0xff]  ;;  %v5322_v32 = vpop.permute.xlu0 %801  ;;  %1541 = vmatpush.msra.mxu3 %v452_v22  ;;  %1348 = vmatpush.msra.mxu0 %v352_v23  ;;  %v2052_v36 = vld [vmem:[%s7387_s4 + $0x108] sm:$0xff]  ;;  %v705_v22 = vld [vmem:[#allocation5 + $0x370] sm:$0xff] }
 0x125   : > { %v931_v45 = vpop.f32.mrf.mxu1  ;;  %1412 = vmatpush.msra.mxu1 %v386_v26  ;;  %1478 = vmatpush.msra.mxu2 %v416_v28  ;;  %v344_v16 = vld [vmem:[%s4938_s11 + $0x28] sm:$0xff] }
 0x126   : > { %v932_v49 = vadd.f32 %v931_v45, %v867_v41  ;;  %1125 = vmatmul.f32.gmra.mxu0 %v679_v37  ;;  %1255 = vmatmul.f32.gmra.mxu2 %v681_v38  ;;  %v2060_v37 = vld [vmem:[%s7387_s4 + $0x148] sm:$0xff]  ;;  %v350_v41 = vld [vmem:[%s4938_s11 + $0x58] sm:$0xff] }
 0x127   : > { %1542 = vmatpush.msra.mxu3 %v450_v29  ;;  %2289 = vperm.xlu2 %4442, %v2047_v30   ;;  %v408_v28 = vld [vmem:[%s4938_s11 + $0x228] sm:$0xff]  ;;  %v442_v29 = vld [vmem:[%s4938_s11 + $0x338] sm:$0xff] }
 0x128   : > { %1190 = vmatmul.f32.gmra.mxu1 %v680_v46  ;;  %1320 = vmatmul.f32.gmra.mxu3 %v682_v48  ;;  %v695_v46 = vld [vmem:[#allocation5 + $0x320] sm:$0xff]  ;;  %v697_v48 = vld [vmem:[#allocation5 + $0x330] sm:$0xff] }
 0x129   : > { %v996_v59 = vpop.f32.mrf.mxu2  ;;  %2314 = vperm.xlu1 %4441, %v2052_v36   ;;  %2354 = vperm.xlu0 %4440, %v2060_v37   ;;  %v706_v36 = vld [vmem:[#allocation5 + $0x378] sm:$0xff] }
 0x12a   : > { %v997_v0 = vadd.f32 %v996_v59, %v932_v49  ;;  %1349 = vmatpush.msra.mxu0 %v350_v41  ;;  %1413 = vmatpush.msra.mxu1 %v384_v43  ;;  %v2055_v41 = vld [vmem:[%s7387_s4 + $0x120] sm:$0xff] }
 0x12b   : > { %v869_v5 = vpop.f32.mrf.mxu0  ;;  %v1061_v6 = vpop.f32.mrf.mxu3  ;;  %1479 = vmatpush.msra.mxu2 %v414_v51  ;;  %1543 = vmatpush.msra.mxu3 %v448_v54  ;;  %v2063_v43 = vld [vmem:[%s7387_s4 + $0x160] sm:$0xff]  ;;  %v440_v51 = vld [vmem:[%s4938_s11 + $0x328] sm:$0xff] }
 0x12c   : > { %v5309_v11 = vadd.f32 %v1061_v6, %v997_v0  ;;  %v870_v12 = vadd.f32 %v869_v5, %v5303_v61  ;;  %v412_v0 = vld [vmem:[%s4938_s11 + $0x248] sm:$0xff]  ;;  %1350 = vmatpush.msra.mxu0 %v348_v62  ;;  %1414 = vmatpush.msra.mxu1 %v382_v63  ;;  %v711_v63 = vld [vmem:[#allocation5 + $0x3a0] sm:$0xff] }
 0x12d   : > { %v934_v17 = vpop.f32.mrf.mxu1  ;;  %v380_v5 = vld [vmem:[%s4938_s11 + $0x148] sm:$0xff]  ;;  %1480 = vmatpush.msra.mxu2 %v412_v0  ;;  %1544 = vmatpush.msra.mxu3 %v446_v2  ;;  %v713_v0 = vld [vmem:[#allocation5 + $0x3b0] sm:$0xff] }
 0x12e   : > { %v935_v21 = vadd.f32 %v934_v17, %v870_v12  ;;  %1128 = vmatmul.f32.gmra.mxu0 %v687_v9  ;;  %1258 = vmatmul.f32.gmra.mxu2 %v689_v10  ;;  %v5343_v9 = vpop.permute.xlu1 %806  ;;  %v410_v10 = vld [vmem:[%s4938_s11 + $0x238] sm:$0xff]  ;;  %v444_v12 = vld [vmem:[%s4938_s11 + $0x348] sm:$0xff] }
 0x12f   : > { %v378_v17 = vld [vmem:[%s4938_s11 + $0x138] sm:$0xff]  ;;  %1351 = vmatpush.msra.mxu0 %v346_v4  ;;  %1415 = vmatpush.msra.mxu1 %v380_v5  ;;  %v340_v54 = vld [vmem:[%s4938_s11 + $0x8] sm:$0xff] }
 0x130   : > { %1193 = vmatmul.f32.gmra.mxu1 %v688_v18  ;;  %1323 = vmatmul.f32.gmra.mxu3 %v690_v19  ;;  %v438_v5 = vld [vmem:[%s4938_s11 + $0x318] sm:$0xff] }
 0x131   : > { %v999_v31 = vpop.f32.mrf.mxu2  ;;  %1481 = vmatpush.msra.mxu2 %v410_v10  ;;  %1545 = vmatpush.msra.mxu3 %v444_v12  ;;  %v712_v12 = vld [vmem:[#allocation5 + $0x3a8] sm:$0xff] }
 0x132   : > { %v1000_v38 = vadd.f32 %v999_v31, %v935_v21  ;;  %v703_v21 = vld [vmem:[#allocation5 + $0x360] sm:$0xff]  ;;  %v704_v31 = vld [vmem:[#allocation5 + $0x368] sm:$0xff]  ;;  %1352 = vmatpush.msra.mxu0 %v344_v16  ;;  %1416 = vmatpush.msra.mxu1 %v378_v17 }
 0x133   : > { %v872_v44 = vpop.f32.mrf.mxu0  ;;  %v1064_v45 = vpop.f32.mrf.mxu3  ;;  %1482 = vmatpush.msra.mxu2 %v408_v28  ;;  %1546 = vmatpush.msra.mxu3 %v442_v29  ;;  %v436_v17 = vld [vmem:[%s4938_s11 + $0x308] sm:$0xff] }
 0x134   : > { %v5332_v49 = vadd.f32 %v1064_v45, %v1000_v38  ;;  %v873_v50 = vadd.f32 %v872_v44, %v5322_v32  ;;  %v2050_v38 = vld [vmem:[%s7387_s4 + $0xf8] sm:$0xff]  ;;  %v376_v45 = vld [vmem:[%s4938_s11 + $0x128] sm:$0xff]  ;;  %2329 = vperm.xlu1 %4441, %v2055_v41   ;;  %2369 = vperm.xlu0 %4440, %v2063_v43  }
 0x135   : > { %v937_v56 = vpop.f32.mrf.mxu1  ;;  %v342_v44 = vld [vmem:[%s4938_s11 + $0x18] sm:$0xff]  ;;  %2304 = vperm.xlu2 %4442, %v2050_v38   ;;  %1417 = vmatpush.msra.mxu1 %v376_v45  ;;  %v720_v43 = vld [vmem:[#allocation5 + $0x3e8] sm:$0xff] }
 0x136   : > { %v938_v59 = vadd.f32 %v937_v56, %v873_v50  ;;  %1131 = vmatmul.f32.gmra.mxu0 %v695_v46  ;;  %1261 = vmatmul.f32.gmra.mxu2 %v697_v48  ;;  %v406_v46 = vld [vmem:[%s4938_s11 + $0x218] sm:$0xff]  ;;  %v5366_v50 = vpop.permute.xlu2 %811 }
 0x137   : > { %1353 = vmatpush.msra.mxu0 %v342_v44  ;;  %1483 = vmatpush.msra.mxu2 %v406_v46  ;;  %v722_v44 = vld [vmem:[#allocation5 + $0x3f8] sm:$0xff]  ;;  %v2056_v46 = vld [vmem:[%s7387_s4 + $0x128] sm:$0xff] }
 0x138   : > { %1196 = vmatmul.f32.gmra.mxu1 %v696_v57  ;;  %1326 = vmatmul.f32.gmra.mxu3 %v698_v58  ;;  %v374_v57 = vld [vmem:[%s4938_s11 + $0x118] sm:$0xff]  ;;  %v404_v58 = vld [vmem:[%s4938_s11 + $0x208] sm:$0xff] }
 0x139   : > { %v1002_v6 = vpop.f32.mrf.mxu2  ;;  %1547 = vmatpush.msra.mxu3 %v440_v51  ;;  %1354 = vmatpush.msra.mxu0 %v340_v54  ;;  %v2069_v51 = vld [vmem:[%s7387_s4 + $0x190] sm:$0xff] }
 0x13a   : > { %v1003_v13 = vadd.f32 %v1002_v6, %v938_v59  ;;  %v372_v6 = vld [vmem:[%s4938_s11 + $0x108] sm:$0xff]  ;;  %1418 = vmatpush.msra.mxu1 %v374_v57  ;;  %1484 = vmatpush.msra.mxu2 %v404_v58 }
 0x13b   : > { %v875_v18 = vpop.f32.mrf.mxu0  ;;  %v1067_v19 = vpop.f32.mrf.mxu3  ;;  %1548 = vmatpush.msra.mxu3 %v438_v5  ;;  %v2059_v5 = vld [vmem:[%s7387_s4 + $0x140] sm:$0xff] }
 0x13c   : > { %v5349_v23 = vadd.f32 %v1067_v19, %v1003_v13  ;;  %v876_v26 = vadd.f32 %v875_v18, %v5343_v9  ;;  %v714_v13 = vld [vmem:[#allocation5 + $0x3b8] sm:$0xff]  ;;  %v2053_v18 = vld [vmem:[%s7387_s4 + $0x110] sm:$0xff]  ;;  %1419 = vmatpush.msra.mxu1 %v372_v6  ;;  %v2064_v6 = vld [vmem:[%s7387_s4 + $0x168] sm:$0xff] }
 0x13d   : > { %v940_v30 = vpop.f32.mrf.mxu1  ;;  %v2058_v19 = vld [vmem:[%s7387_s4 + $0x138] sm:$0xff]  ;;  %1549 = vmatpush.msra.mxu3 %v436_v17  ;;  %2319 = vperm.xlu2 %4442, %v2053_v18  }
 0x13e   : > { %v941_v37 = vadd.f32 %v940_v30, %v876_v26  ;;  %1134 = vmatmul.f32.gmra.mxu0 %v703_v21  ;;  %1264 = vmatmul.f32.gmra.mxu2 %v705_v22  ;;  %v2066_v21 = vld [vmem:[%s7387_s4 + $0x178] sm:$0xff]  ;;  %v5387_v26 = vpop.permute.xlu0 %816 }
 0x13f   : > { %2344 = vperm.xlu1 %4441, %v2058_v19   ;;  %2384 = vperm.xlu0 %4440, %v2066_v21  }
 0x140   : > { %1199 = vmatmul.f32.gmra.mxu1 %v704_v31  ;;  %1329 = vmatmul.f32.gmra.mxu3 %v706_v36  ;;  %v719_v31 = vld [vmem:[#allocation5 + $0x3e0] sm:$0xff]  ;;  %v721_v36 = vld [vmem:[#allocation5 + $0x3f0] sm:$0xff] }
 0x141   : > { %v1005_v48 = vpop.f32.mrf.mxu2 }
 0x142   : > { %v1006_v56 = vadd.f32 %v1005_v48, %v941_v37  ;;  %v2061_v48 = vld [vmem:[%s7387_s4 + $0x150] sm:$0xff] }
 0x143   : > { %v878_v59 = vpop.f32.mrf.mxu0  ;;  %v1070_v62 = vpop.f32.mrf.mxu3 }
 0x144   : > { %v5372_v2 = vadd.f32 %v1070_v62, %v1006_v56  ;;  %v879_v4 = vadd.f32 %v878_v59, %v5366_v50 }
 0x145   : > { %v943_v10 = vpop.f32.mrf.mxu1  ;;  %2334 = vperm.xlu2 %4442, %v2056_v46  }
 0x146   : > { %v944_v16 = vadd.f32 %v943_v10, %v879_v4  ;;  %1137 = vmatmul.f32.gmra.mxu0 %v711_v63  ;;  %1267 = vmatmul.f32.gmra.mxu2 %v713_v0  ;;  %v4443_v0 = vld [vmem:[#allocation5] sm:$0xff]  ;;  %v4444_v4 = vld [vmem:[#allocation5 + $0x10] sm:$0xff]  ;;  %v2072_v10 = vld [vmem:[%s7387_s4 + $0x1a8] sm:$0xff] }
 0x147   : > { %2359 = vperm.xlu1 %4441, %v2061_v48   ;;  %2399 = vperm.xlu0 %4440, %v2069_v51  }
 0x148   : > { %1202 = vmatmul.f32.gmra.mxu1 %v712_v12  ;;  %1332 = vmatmul.f32.gmra.mxu3 %v714_v13  ;;  %v4445_v13 = vld [vmem:[#allocation5 + $0x8] sm:$0xff] }
 0x149   : > { %v1008_v22 = vpop.f32.mrf.mxu2 }
 0x14a   : > { %v1009_v28 = vadd.f32 %v1008_v22, %v944_v16 }
 0x14b   : > { %v881_v29 = vpop.f32.mrf.mxu0  ;;  %v1073_v30 = vpop.f32.mrf.mxu3 }
 0x14c   : > { %v5389_v37 = vadd.f32 %v1073_v30, %v1009_v28  ;;  %v882_v38 = vadd.f32 %v881_v29, %v5387_v26  ;;  %v4447_v29 = vld [vmem:[#allocation5 + $0x40] sm:$0xff]  ;;  %v4448_v30 = vld [vmem:[#allocation5 + $0x50] sm:$0xff] }
 0x14d   : > { %v946_v41 = vpop.f32.mrf.mxu1  ;;  %2349 = vperm.xlu2 %4442, %v2059_v5   ;;  %v4454_v5 = vld [vmem:[#allocation5 + $0x98] sm:$0xff] }
 0x14e   : > { %v947_v45 = vadd.f32 %v946_v41, %v882_v38  ;;  %1140 = vmatmul.f32.gmra.mxu0 %v719_v31  ;;  %1270 = vmatmul.f32.gmra.mxu2 %v721_v36  ;;  %v2062_v31 = vld [vmem:[%s7387_s4 + $0x158] sm:$0xff]  ;;  %v2075_v36 = vld [vmem:[%s7387_s4 + $0x1c0] sm:$0xff]  ;;  %v4449_v41 = vld [vmem:[#allocation5 + $0x48] sm:$0xff] }
 0x14f   : > { %2374 = vperm.xlu1 %4441, %v2064_v6   ;;  %2414 = vperm.xlu0 %4440, %v2072_v10  }
 0x150   : > { %1205 = vmatmul.f32.gmra.mxu1 %v720_v43  ;;  %1335 = vmatmul.f32.gmra.mxu3 %v722_v44  ;;  %v4450_v43 = vld [vmem:[#allocation5 + $0x58] sm:$0xff] }
 0x151   : > { %v1011_v54 = vpop.f32.mrf.mxu2 }
 0x152   : > { %v1012_v56 = vadd.f32 %v1011_v54, %v947_v45 }
 0x153   : > { %v1076_v57 = vpop.f32.mrf.mxu3  ;;  %v1096_v58 = vpop.f32.mrf.mxu0 }
 0x154   : > { %v5401_v59 = vadd.f32 %v1076_v57, %v1012_v56  ;;  %v1097_v62 = vadd.f32 %v1096_v58, %v5147_v39  ;;  %v4446_v39 = vld [vmem:[#allocation5 + $0x18] sm:$0xff]  ;;  %v4451_v57 = vld [vmem:[#allocation5 + $0x80] sm:$0xff]  ;;  %v4452_v58 = vld [vmem:[#allocation5 + $0x90] sm:$0xff] }
 0x155   : > { %v1161_v63 = vpop.f32.mrf.mxu1  ;;  %2364 = vperm.xlu2 %4442, %v2062_v31   ;;  %v4458_v31 = vld [vmem:[#allocation5 + $0xd8] sm:$0xff] }
 0x156   : > { %1355 = vmatmul.f32.vlgmr.msra.gmra.mxu0 %v4443_v0  ;;  %1485 = vmatmul.f32.vlgmr.msra.gmra.mxu2 %v4444_v4  ;;  %v1162_v12 = vadd.f32 %v1161_v63, %v1097_v62  ;;  %v2065_v62 = vld [vmem:[%s7387_s4 + $0x170] sm:$0xff]  ;;  %v2070_v63 = vld [vmem:[%s7387_s4 + $0x198] sm:$0xff]  ;;  %v4453_v4 = vld [vmem:[#allocation5 + $0x88] sm:$0xff] }
 0x157   : > { %2429 = vperm.xlu0 %4440, %v2075_v36  }
 0x158   : > { %1420 = vmatmul.f32.vlgmr.msra.gmra.mxu1 %v4445_v13  ;;  %1550 = vmatmul.f32.vlgmr.msra.gmra.mxu3 %v4446_v39 }
 0x159   : > { %v1226_v16 = vpop.f32.mrf.mxu2 }
 0x15a   : > { %v1227_v17 = vadd.f32 %v1226_v16, %v1162_v12 }
 0x15b   : > { %v1099_v18 = vpop.f32.mrf.mxu0  ;;  %v1291_v19 = vpop.f32.mrf.mxu3 }
 0x15c   : > { %v1100_v21 = vadd.f32 %v1099_v18, %v5161_v55  ;;  %v5415_v22 = vadd.f32 %v1291_v19, %v1227_v17  ;;  %v2067_v55 = vld [vmem:[%s7387_s4 + $0x180] sm:$0xff]  ;;  %v4456_v19 = vld [vmem:[#allocation5 + $0xd0] sm:$0xff] }
 0x15d   : > { %v1164_v28 = vpop.f32.mrf.mxu1  ;;  %2389 = vperm.xlu1 %4441, %v2067_v55   ;;  %2379 = vperm.xlu2 %4442, %v2065_v62   ;;  %v4455_v18 = vld [vmem:[#allocation5 + $0xc0] sm:$0xff]  ;;  %v4462_v62 = vld [vmem:[#allocation5 + $0x118] sm:$0xff] }
 0x15e   : > { %1859 = vst [vmem:[%s5417_s20] sm:$0xff] %v5415_v22  ;;  %1358 = vmatmul.f32.gmra.mxu0 %v4447_v29  ;;  %1488 = vmatmul.f32.gmra.mxu2 %v4448_v30  ;;  %v1165_v38 = vadd.f32 %v1164_v28, %v1100_v21  ;;  %v2068_v21 = vld [vmem:[%s7387_s4 + $0x188] sm:$0xff]  ;;  %v2073_v28 = vld [vmem:[%s7387_s4 + $0x1b0] sm:$0xff] }
 0x15f   : > { %v4457_v30 = vld [vmem:[#allocation5 + $0xc8] sm:$0xff] }
 0x160   : > { %1423 = vmatmul.f32.gmra.mxu1 %v4449_v41  ;;  %1553 = vmatmul.f32.gmra.mxu3 %v4450_v43 }
 0x161   : > { %v1229_v44 = vpop.f32.mrf.mxu2 }
 0x162   : > { %v1230_v45 = vadd.f32 %v1229_v44, %v1165_v38 }
 0x163   : > { %v1102_v46 = vpop.f32.mrf.mxu0  ;;  %v1294_v48 = vpop.f32.mrf.mxu3 }
 0x164   : > { %v1103_v51 = vadd.f32 %v1102_v46, %v5175_v7  ;;  %v5431_v54 = vadd.f32 %v1294_v48, %v1230_v45  ;;  %v2078_v7 = vld [vmem:[%s7387_s4 + $0x1d8] sm:$0xff]  ;;  %v4459_v46 = vld [vmem:[#allocation5 + $0x100] sm:$0xff]  ;;  %v4460_v48 = vld [vmem:[#allocation5 + $0x110] sm:$0xff] }
 0x165   : > { %v1167_v56 = vpop.f32.mrf.mxu1  ;;  %2404 = vperm.xlu1 %4441, %v2070_v63   ;;  %2444 = vperm.xlu0 %4440, %v2078_v7  }
 0x166   : > { %1861 = vst [vmem:[%s5417_s20 + $0x10] sm:$0xff] %v5431_v54  ;;  %1361 = vmatmul.f32.gmra.mxu0 %v4451_v57  ;;  %1491 = vmatmul.f32.gmra.mxu2 %v4452_v58  ;;  %v1168_v0 = vadd.f32 %v1167_v56, %v1103_v51  ;;  %v2071_v51 = vld [vmem:[%s7387_s4 + $0x1a0] sm:$0xff]  ;;  %v2076_v56 = vld [vmem:[%s7387_s4 + $0x1c8] sm:$0xff] }
 0x167   : > { %2394 = vperm.xlu2 %4442, %v2068_v21   ;;  %v4461_v58 = vld [vmem:[#allocation5 + $0x108] sm:$0xff]  ;;  %v4466_v21 = vld [vmem:[#allocation5 + $0x158] sm:$0xff] }
 0x168   : > { %1426 = vmatmul.f32.gmra.mxu1 %v4453_v4  ;;  %1556 = vmatmul.f32.gmra.mxu3 %v4454_v5 }
 0x169   : > { %v1232_v6 = vpop.f32.mrf.mxu2 }
 0x16a   : > { %v1233_v10 = vadd.f32 %v1232_v6, %v1168_v0 }
 0x16b   : > { %v1105_v12 = vpop.f32.mrf.mxu0  ;;  %v1297_v13 = vpop.f32.mrf.mxu3 }
 0x16c   : > { %v1106_v39 = vadd.f32 %v1105_v12, %v5189_v24  ;;  %v5445_v16 = vadd.f32 %v1297_v13, %v1233_v10  ;;  %v2081_v24 = vld [vmem:[%s7387_s4 + $0x1f0] sm:$0xff]  ;;  %v4463_v12 = vld [vmem:[#allocation5 + $0x140] sm:$0xff] }
 0x16d   : > { %v1170_v17 = vpop.f32.mrf.mxu1  ;;  %2419 = vperm.xlu1 %4441, %v2073_v28   ;;  %2459 = vperm.xlu0 %4440, %v2081_v24   ;;  %v4464_v13 = vld [vmem:[#allocation5 + $0x150] sm:$0xff] }
 0x16e   : > { %1863 = vst [vmem:[%s5417_s20 + $0x20] sm:$0xff] %v5445_v16  ;;  %1364 = vmatmul.f32.gmra.mxu0 %v4455_v18  ;;  %1494 = vmatmul.f32.gmra.mxu2 %v4456_v19  ;;  %v1171_v29 = vadd.f32 %v1170_v17, %v1106_v39  ;;  %v2074_v39 = vld [vmem:[%s7387_s4 + $0x1b8] sm:$0xff]  ;;  %v2079_v17 = vld [vmem:[%s7387_s4 + $0x1e0] sm:$0xff]  ;;  %v4465_v19 = vld [vmem:[#allocation5 + $0x148] sm:$0xff] }
 0x16f   : > { %2409 = vperm.xlu2 %4442, %v2071_v51   ;;  %v4470_v51 = vld [vmem:[#allocation5 + $0x198] sm:$0xff] }
 0x170   : > { %1429 = vmatmul.f32.gmra.mxu1 %v4457_v30  ;;  %1559 = vmatmul.f32.gmra.mxu3 %v4458_v31 }
 0x171   : > { %v1235_v55 = vpop.f32.mrf.mxu2 }
 0x172   : > { %v1236_v36 = vadd.f32 %v1235_v55, %v1171_v29 }
 0x173   : > { %v1108_v38 = vpop.f32.mrf.mxu0  ;;  %v1300_v41 = vpop.f32.mrf.mxu3 }
 0x174   : > { %v1109_v43 = vadd.f32 %v1108_v38, %v5203_v42  ;;  %v5459_v44 = vadd.f32 %v1300_v41, %v1236_v36  ;;  %v2084_v42 = vld [vmem:[%s7387_s4 + $0x208] sm:$0xff]  ;;  %v4467_v38 = vld [vmem:[#allocation5 + $0x180] sm:$0xff]  ;;  %v4468_v41 = vld [vmem:[#allocation5 + $0x190] sm:$0xff] }
 0x175   : > { %v1173_v45 = vpop.f32.mrf.mxu1  ;;  %2434 = vperm.xlu1 %4441, %v2076_v56   ;;  %2474 = vperm.xlu0 %4440, %v2084_v42  }
 0x176   : > { %1865 = vst [vmem:[%s5417_s20 + $0x30] sm:$0xff] %v5459_v44  ;;  %1367 = vmatmul.f32.gmra.mxu0 %v4459_v46  ;;  %1497 = vmatmul.f32.gmra.mxu2 %v4460_v48  ;;  %v1174_v57 = vadd.f32 %v1173_v45, %v1109_v43  ;;  %v2077_v43 = vld [vmem:[%s7387_s4 + $0x1d0] sm:$0xff]  ;;  %v2082_v45 = vld [vmem:[%s7387_s4 + $0x1f8] sm:$0xff]  ;;  %v4469_v48 = vld [vmem:[#allocation5 + $0x188] sm:$0xff] }
 0x177   : > { %2424 = vperm.xlu2 %4442, %v2074_v39   ;;  %v4474_v39 = vld [vmem:[#allocation5 + $0x1d8] sm:$0xff] }
 0x178   : > { %1432 = vmatmul.f32.gmra.mxu1 %v4461_v58  ;;  %1562 = vmatmul.f32.gmra.mxu3 %v4462_v62 }
 0x179   : > { %v1238_v63 = vpop.f32.mrf.mxu2 }
 0x17a   : > { %v1239_v7 = vadd.f32 %v1238_v63, %v1174_v57 }
 0x17b   : > { %v1111_v0 = vpop.f32.mrf.mxu0  ;;  %v1303_v4 = vpop.f32.mrf.mxu3 }
 0x17c   : > { %v1112_v5 = vadd.f32 %v1111_v0, %v5217_v60  ;;  %v5473_v6 = vadd.f32 %v1303_v4, %v1239_v7  ;;  %v2087_v60 = vld [vmem:[%s7387_s4 + $0x220] sm:$0xff]  ;;  %v4472_v4 = vld [vmem:[#allocation5 + $0x1d0] sm:$0xff] }
 0x17d   : > { %v1176_v10 = vpop.f32.mrf.mxu1  ;;  %2449 = vperm.xlu1 %4441, %v2079_v17   ;;  %2489 = vperm.xlu0 %4440, %v2087_v60   ;;  %v4471_v0 = vld [vmem:[#allocation5 + $0x1c0] sm:$0xff] }
 0x17e   : > { %1867 = vst [vmem:[%s5417_s20 + $0x40] sm:$0xff] %v5473_v6  ;;  %1370 = vmatmul.f32.gmra.mxu0 %v4463_v12  ;;  %1500 = vmatmul.f32.gmra.mxu2 %v4464_v13  ;;  %v1177_v18 = vadd.f32 %v1176_v10, %v1112_v5  ;;  %v2080_v5 = vld [vmem:[%s7387_s4 + $0x1e8] sm:$0xff]  ;;  %v2085_v10 = vld [vmem:[%s7387_s4 + $0x210] sm:$0xff] }
 0x17f   : > { %2439 = vperm.xlu2 %4442, %v2077_v43   ;;  %v4473_v13 = vld [vmem:[#allocation5 + $0x1c8] sm:$0xff] }
 0x180   : > { %1435 = vmatmul.f32.gmra.mxu1 %v4465_v19  ;;  %1565 = vmatmul.f32.gmra.mxu3 %v4466_v21 }
 0x181   : > { %v1241_v28 = vpop.f32.mrf.mxu2 }
 0x182   : > { %v1242_v24 = vadd.f32 %v1241_v28, %v1177_v18 }
 0x183   : > { %v1114_v29 = vpop.f32.mrf.mxu0  ;;  %v1306_v30 = vpop.f32.mrf.mxu3 }
 0x184   : > { %v1115_v31 = vadd.f32 %v1114_v29, %v5231_v14  ;;  %v5487_v55 = vadd.f32 %v1306_v30, %v1242_v24  ;;  %v2090_v14 = vld [vmem:[%s7387_s4 + $0x238] sm:$0xff]  ;;  %v4475_v29 = vld [vmem:[#allocation5 + $0x200] sm:$0xff]  ;;  %v4476_v30 = vld [vmem:[#allocation5 + $0x210] sm:$0xff] }
 0x185   : > { %v1179_v36 = vpop.f32.mrf.mxu1  ;;  %2464 = vperm.xlu1 %4441, %v2082_v45   ;;  %2504 = vperm.xlu0 %4440, %v2090_v14   ;;  %v4477_v45 = vld [vmem:[#allocation5 + $0x208] sm:$0xff]  ;;  %v4478_v14 = vld [vmem:[#allocation5 + $0x218] sm:$0xff] }
 0x186   : > { %1869 = vst [vmem:[%s5417_s20 + $0x50] sm:$0xff] %v5487_v55  ;;  %1373 = vmatmul.f32.gmra.mxu0 %v4467_v38  ;;  %1503 = vmatmul.f32.gmra.mxu2 %v4468_v41  ;;  %v1180_v46 = vadd.f32 %v1179_v36, %v1115_v31  ;;  %v2083_v31 = vld [vmem:[%s7387_s4 + $0x200] sm:$0xff]  ;;  %v498_v36 = vld [vmem:[%s4938_s11 + $0x4f8] sm:$0xff]  ;;  %v2096_v41 = vld [vmem:[%s7387_s4 + $0x268] sm:$0xff] }
 0x187   : > { %2454 = vperm.xlu2 %4442, %v2080_v5   ;;  %v562_v38 = vld [vmem:[%s4938_s11 + $0x6f8] sm:$0xff]  ;;  %1599 = vmatpush.msrb.mxu0 %v498_v36 }
 0x188   : > { %1438 = vmatmul.f32.gmra.mxu1 %v4469_v48  ;;  %1568 = vmatmul.f32.gmra.mxu3 %v4470_v51  ;;  %v530_v48 = vld [vmem:[%s4938_s11 + $0x5f8] sm:$0xff]  ;;  %v560_v51 = vld [vmem:[%s4938_s11 + $0x6e8] sm:$0xff] }
 0x189   : > { %v1244_v56 = vpop.f32.mrf.mxu2  ;;  %1729 = vmatpush.msrb.mxu2 %v562_v38  ;;  %1664 = vmatpush.msrb.mxu1 %v530_v48  ;;  %v490_v38 = vld [vmem:[%s4938_s11 + $0x4b8] sm:$0xff] }
 0x18a   : > { %v1245_v42 = vadd.f32 %v1244_v56, %v1180_v46  ;;  %v496_v46 = vld [vmem:[%s4938_s11 + $0x4e8] sm:$0xff] }
 0x18b   : > { %v1117_v57 = vpop.f32.mrf.mxu0  ;;  %v1309_v58 = vpop.f32.mrf.mxu3  ;;  %1600 = vmatpush.msrb.mxu0 %v496_v46  ;;  %1730 = vmatpush.msrb.mxu2 %v560_v51 }
 0x18c   : > { %v1118_v62 = vadd.f32 %v1117_v57, %v5245_v34  ;;  %v5501_v63 = vadd.f32 %v1309_v58, %v1245_v42  ;;  %v2093_v34 = vld [vmem:[%s7387_s4 + $0x250] sm:$0xff]  ;;  %v594_v42 = vld [vmem:[%s4938_s11 + $0x7f8] sm:$0xff] }
 0x18d   : > { %v1182_v7 = vpop.f32.mrf.mxu1  ;;  %2479 = vperm.xlu1 %4441, %v2085_v10   ;;  %2519 = vperm.xlu0 %4440, %v2093_v34   ;;  %v494_v58 = vld [vmem:[%s4938_s11 + $0x4d8] sm:$0xff]  ;;  %v592_v34 = vld [vmem:[%s4938_s11 + $0x7e8] sm:$0xff] }
 0x18e   : > { %1871 = vst [vmem:[%s5417_s20 + $0x60] sm:$0xff] %v5501_v63  ;;  %1376 = vmatmul.f32.gmra.mxu0 %v4471_v0  ;;  %1506 = vmatmul.f32.gmra.mxu2 %v4472_v4  ;;  %v1183_v12 = vadd.f32 %v1182_v7, %v1118_v62  ;;  %v528_v62 = vld [vmem:[%s4938_s11 + $0x5e8] sm:$0xff]  ;;  %v558_v4 = vld [vmem:[%s4938_s11 + $0x6d8] sm:$0xff] }
 0x18f   : > { %2469 = vperm.xlu2 %4442, %v2083_v31   ;;  %1794 = vmatpush.msrb.mxu3 %v594_v42  ;;  %v590_v31 = vld [vmem:[%s4938_s11 + $0x7d8] sm:$0xff] }
 0x190   : > { %1441 = vmatmul.f32.gmra.mxu1 %v4473_v13  ;;  %1571 = vmatmul.f32.gmra.mxu3 %v4474_v39  ;;  %v4479_v39 = vld [vmem:[#allocation5 + $0x240] sm:$0xff]  ;;  %v522_v42 = vld [vmem:[%s4938_s11 + $0x5b8] sm:$0xff] }
 0x191   : > { %v1247_v17 = vpop.f32.mrf.mxu2  ;;  %1601 = vmatpush.msrb.mxu0 %v494_v58  ;;  %1665 = vmatpush.msrb.mxu1 %v528_v62  ;;  %v4483_v58 = vld [vmem:[#allocation5 + $0x280] sm:$0xff]  ;;  %v4484_v62 = vld [vmem:[#allocation5 + $0x290] sm:$0xff] }
 0x192   : > { %v1248_v60 = vadd.f32 %v1247_v17, %v1183_v12  ;;  %v492_v12 = vld [vmem:[%s4938_s11 + $0x4c8] sm:$0xff]  ;;  %1731 = vmatpush.msrb.mxu2 %v558_v4  ;;  %v4480_v17 = vld [vmem:[#allocation5 + $0x250] sm:$0xff]  ;;  %1795 = vmatpush.msrb.mxu3 %v592_v34  ;;  %v2102_v4 = vld [vmem:[%s7387_s4 + $0x298] sm:$0xff] }
 0x193   : > { %v1120_v18 = vpop.f32.mrf.mxu0  ;;  %v1312_v19 = vpop.f32.mrf.mxu3  ;;  %1602 = vmatpush.msrb.mxu0 %v492_v12  ;;  %v4485_v34 = vld [vmem:[#allocation5 + $0x288] sm:$0xff]  ;;  %v4486_v12 = vld [vmem:[#allocation5 + $0x298] sm:$0xff] }
 0x194   : > { %v1121_v21 = vadd.f32 %v1120_v18, %v5266_v3  ;;  %v5515_v28 = vadd.f32 %v1312_v19, %v1248_v60  ;;  %v2088_v3 = vld [vmem:[%s7387_s4 + $0x228] sm:$0xff]  ;;  %v526_v60 = vld [vmem:[%s4938_s11 + $0x5d8] sm:$0xff]  ;;  %v2091_v18 = vld [vmem:[%s7387_s4 + $0x240] sm:$0xff]  ;;  %1796 = vmatpush.msrb.mxu3 %v590_v31 }
 0x195   : > { %v1185_v24 = vpop.f32.mrf.mxu1  ;;  %2494 = vperm.xlu1 %4441, %v2088_v3   ;;  %2534 = vperm.xlu0 %4440, %v2096_v41   ;;  %v2099_v19 = vld [vmem:[%s7387_s4 + $0x280] sm:$0xff]  ;;  %v524_v3 = vld [vmem:[%s4938_s11 + $0x5c8] sm:$0xff] }
 0x196   : > { %1873 = vst [vmem:[%s5417_s20 + $0x70] sm:$0xff] %v5515_v28  ;;  %1379 = vmatmul.f32.gmra.mxu0 %v4475_v29  ;;  %1509 = vmatmul.f32.gmra.mxu2 %v4476_v30  ;;  %v1186_v43 = vadd.f32 %v1185_v24, %v1121_v21  ;;  %v4481_v24 = vld [vmem:[#allocation5 + $0x248] sm:$0xff]  ;;  %v4482_v29 = vld [vmem:[#allocation5 + $0x258] sm:$0xff] }
 0x197   : > { %v556_v30 = vld [vmem:[%s4938_s11 + $0x6c8] sm:$0xff]  ;;  %1666 = vmatpush.msrb.mxu1 %v526_v60  ;;  %1603 = vmatpush.msrb.mxu0 %v490_v38  ;;  %v550_v60 = vld [vmem:[%s4938_s11 + $0x698] sm:$0xff] }
 0x198   : > { %1444 = vmatmul.f32.gmra.mxu1 %v4477_v45  ;;  %1574 = vmatmul.f32.gmra.mxu3 %v4478_v14  ;;  %v588_v45 = vld [vmem:[%s4938_s11 + $0x7c8] sm:$0xff] }
 0x199   : > { %v1250_v56 = vpop.f32.mrf.mxu2  ;;  %1732 = vmatpush.msrb.mxu2 %v556_v30  ;;  %1667 = vmatpush.msrb.mxu1 %v524_v3  ;;  %v548_v38 = vld [vmem:[%s4938_s11 + $0x688] sm:$0xff] }
 0x19a   : > { %v1251_v57 = vadd.f32 %v1250_v56, %v1186_v43  ;;  %v554_v43 = vld [vmem:[%s4938_s11 + $0x6b8] sm:$0xff]  ;;  %v488_v56 = vld [vmem:[%s4938_s11 + $0x4a8] sm:$0xff]  ;;  %1797 = vmatpush.msrb.mxu3 %v588_v45 }
 0x19b   : > { %v1123_v7 = vpop.f32.mrf.mxu0  ;;  %v1315_v0 = vpop.f32.mrf.mxu3  ;;  %1733 = vmatpush.msrb.mxu2 %v554_v43  ;;  %1604 = vmatpush.msrb.mxu0 %v488_v56  ;;  %v4488_v43 = vld [vmem:[#allocation5 + $0x2d0] sm:$0xff]  ;;  %v582_v45 = vld [vmem:[%s4938_s11 + $0x798] sm:$0xff]  ;;  %v4489_v56 = vld [vmem:[#allocation5 + $0x2c8] sm:$0xff] }
 0x19c   : > { %v1124_v5 = vadd.f32 %v1123_v7, %v5286_v40  ;;  %v5538_v10 = vadd.f32 %v1315_v0, %v1251_v57  ;;  %v2086_v40 = vld [vmem:[%s7387_s4 + $0x218] sm:$0xff]  ;;  %v552_v7 = vld [vmem:[%s4938_s11 + $0x6a8] sm:$0xff]  ;;  %1668 = vmatpush.msrb.mxu1 %v522_v42 }
 0x19d   : > { %v1188_v13 = vpop.f32.mrf.mxu1  ;;  %2484 = vperm.xlu2 %4442, %v2086_v40   ;;  %2509 = vperm.xlu1 %4441, %v2091_v18   ;;  %v2094_v0 = vld [vmem:[%s7387_s4 + $0x258] sm:$0xff]  ;;  %v520_v40 = vld [vmem:[%s4938_s11 + $0x5a8] sm:$0xff] }
 0x19e   : > { %1875 = vst [vmem:[%s5417_s20 + $0x80] sm:$0xff] %v5538_v10  ;;  %1382 = vmatmul.f32.gmra.mxu0 %v4479_v39  ;;  %1512 = vmatmul.f32.gmra.mxu2 %v4480_v17  ;;  %v1189_v21 = vadd.f32 %v1188_v13, %v1124_v5  ;;  %v586_v13 = vld [vmem:[%s4938_s11 + $0x7b8] sm:$0xff] }
 0x19f   : > { %2549 = vperm.xlu0 %4440, %v2099_v19   ;;  %v486_v39 = vld [vmem:[%s4938_s11 + $0x498] sm:$0xff]  ;;  %1734 = vmatpush.msrb.mxu2 %v552_v7  ;;  %v584_v19 = vld [vmem:[%s4938_s11 + $0x7a8] sm:$0xff] }
 0x1a0   : > { %1447 = vmatmul.f32.gmra.mxu1 %v4481_v24  ;;  %1577 = vmatmul.f32.gmra.mxu3 %v4482_v29  ;;  %v4490_v42 = vld [vmem:[#allocation5 + $0x2d8] sm:$0xff]  ;;  %v580_v7 = vld [vmem:[%s4938_s11 + $0x788] sm:$0xff] }
 0x1a1   : > { %v1253_v36 = vpop.f32.mrf.mxu2  ;;  %1798 = vmatpush.msrb.mxu3 %v586_v13  ;;  %1605 = vmatpush.msrb.mxu0 %v486_v39 }
 0x1a2   : > { %v1254_v41 = vadd.f32 %v1253_v36, %v1189_v21  ;;  %v484_v21 = vld [vmem:[%s4938_s11 + $0x488] sm:$0xff]  ;;  %1669 = vmatpush.msrb.mxu1 %v520_v40  ;;  %1735 = vmatpush.msrb.mxu2 %v550_v60  ;;  %v518_v36 = vld [vmem:[%s4938_s11 + $0x598] sm:$0xff] }
 0x1a3   : > { %v1126_v14 = vpop.f32.mrf.mxu0  ;;  %v1318_v46 = vpop.f32.mrf.mxu3  ;;  %1799 = vmatpush.msrb.mxu3 %v584_v19  ;;  %1606 = vmatpush.msrb.mxu0 %v484_v21  ;;  %v578_v40 = vld [vmem:[%s4938_s11 + $0x778] sm:$0xff]  ;;  %v4492_v19 = vld [vmem:[#allocation5 + $0x310] sm:$0xff] }
 0x1a4   : > { %v1127_v48 = vadd.f32 %v1126_v14, %v5309_v11  ;;  %v5561_v51 = vadd.f32 %v1318_v46, %v1254_v41  ;;  %v2089_v11 = vld [vmem:[%s7387_s4 + $0x230] sm:$0xff]  ;;  %v4487_v41 = vld [vmem:[#allocation5 + $0x2c0] sm:$0xff]  ;;  %1670 = vmatpush.msrb.mxu1 %v518_v36  ;;  %1736 = vmatpush.msrb.mxu2 %v548_v38  ;;  %v478_v21 = vld [vmem:[%s4938_s11 + $0x458] sm:$0xff] }
 0x1a5   : > { %v1191_v57 = vpop.f32.mrf.mxu1  ;;  %2499 = vperm.xlu2 %4442, %v2089_v11   ;;  %2524 = vperm.xlu1 %4441, %v2094_v0   ;;  %v2097_v14 = vld [vmem:[%s7387_s4 + $0x270] sm:$0xff]  ;;  %v546_v11 = vld [vmem:[%s4938_s11 + $0x678] sm:$0xff]  ;;  %v4493_v36 = vld [vmem:[#allocation5 + $0x308] sm:$0xff] }
 0x1a6   : > { %1877 = vst [vmem:[%s5417_s20 + $0x90] sm:$0xff] %v5561_v51  ;;  %1385 = vmatmul.f32.gmra.mxu0 %v4483_v58  ;;  %1515 = vmatmul.f32.gmra.mxu2 %v4484_v62  ;;  %v1192_v5 = vadd.f32 %v1191_v57, %v1127_v48  ;;  %v2105_v46 = vld [vmem:[%s7387_s4 + $0x2b0] sm:$0xff]  ;;  %v482_v57 = vld [vmem:[%s4938_s11 + $0x478] sm:$0xff]  ;;  %v516_v58 = vld [vmem:[%s4938_s11 + $0x588] sm:$0xff] }
 0x1a7   : > { %2564 = vperm.xlu0 %4440, %v2102_v4   ;;  %1800 = vmatpush.msrb.mxu3 %v582_v45  ;;  %v480_v4 = vld [vmem:[%s4938_s11 + $0x468] sm:$0xff]  ;;  %v4494_v38 = vld [vmem:[#allocation5 + $0x318] sm:$0xff] }
 0x1a8   : > { %1450 = vmatmul.f32.gmra.mxu1 %v4485_v34  ;;  %1580 = vmatmul.f32.gmra.mxu3 %v4486_v12  ;;  %v476_v45 = vld [vmem:[%s4938_s11 + $0x448] sm:$0xff] }
 0x1a9   : > { %v1256_v17 = vpop.f32.mrf.mxu2  ;;  %1607 = vmatpush.msrb.mxu0 %v482_v57  ;;  %1671 = vmatpush.msrb.mxu1 %v516_v58 }
 0x1aa   : > { %v1257_v18 = vadd.f32 %v1256_v17, %v1192_v5  ;;  %v514_v5 = vld [vmem:[%s4938_s11 + $0x578] sm:$0xff]  ;;  %1737 = vmatpush.msrb.mxu2 %v546_v11  ;;  %1801 = vmatpush.msrb.mxu3 %v580_v7  ;;  %v544_v17 = vld [vmem:[%s4938_s11 + $0x668] sm:$0xff] }
 0x1ab   : > { %v1129_v24 = vpop.f32.mrf.mxu0  ;;  %v1321_v29 = vpop.f32.mrf.mxu3  ;;  %1608 = vmatpush.msrb.mxu0 %v480_v4  ;;  %1672 = vmatpush.msrb.mxu1 %v514_v5  ;;  %v474_v11 = vld [vmem:[%s4938_s11 + $0x438] sm:$0xff]  ;;  %v4496_v4 = vld [vmem:[#allocation5 + $0x350] sm:$0xff] }
 0x1ac   : > { %v1130_v30 = vadd.f32 %v1129_v24, %v5332_v49  ;;  %v5584_v31 = vadd.f32 %v1321_v29, %v1257_v18  ;;  %v2092_v49 = vld [vmem:[%s7387_s4 + $0x248] sm:$0xff]  ;;  %v4491_v18 = vld [vmem:[#allocation5 + $0x300] sm:$0xff]  ;;  %1738 = vmatpush.msrb.mxu2 %v544_v17  ;;  %1802 = vmatpush.msrb.mxu3 %v578_v40  ;;  %v538_v5 = vld [vmem:[%s4938_s11 + $0x638] sm:$0xff] }
 0x1ad   : > { %v1194_v3 = vpop.f32.mrf.mxu1  ;;  %2514 = vperm.xlu2 %4442, %v2092_v49   ;;  %2539 = vperm.xlu1 %4441, %v2097_v14   ;;  %v2100_v24 = vld [vmem:[%s7387_s4 + $0x288] sm:$0xff]  ;;  %v4498_v40 = vld [vmem:[#allocation5 + $0x358] sm:$0xff] }
 0x1ae   : > { %1879 = vst [vmem:[%s5417_s20 + $0xa0] sm:$0xff] %v5584_v31  ;;  %1388 = vmatmul.f32.gmra.mxu0 %v4487_v41  ;;  %1518 = vmatmul.f32.gmra.mxu2 %v4488_v43  ;;  %v1195_v48 = vadd.f32 %v1194_v3, %v1130_v30  ;;  %v2108_v29 = vld [vmem:[%s7387_s4 + $0x2c8] sm:$0xff]  ;;  %v542_v41 = vld [vmem:[%s4938_s11 + $0x658] sm:$0xff] }
 0x1af   : > { %2579 = vperm.xlu0 %4440, %v2105_v46   ;;  %v512_v3 = vld [vmem:[%s4938_s11 + $0x568] sm:$0xff]  ;;  %1609 = vmatpush.msrb.mxu0 %v478_v21  ;;  %v510_v46 = vld [vmem:[%s4938_s11 + $0x558] sm:$0xff] }
 0x1b0   : > { %1453 = vmatmul.f32.gmra.mxu1 %v4489_v56  ;;  %1583 = vmatmul.f32.gmra.mxu3 %v4490_v42  ;;  %v576_v49 = vld [vmem:[%s4938_s11 + $0x768] sm:$0xff]  ;;  %v2098_v21 = vld [vmem:[%s7387_s4 + $0x278] sm:$0xff] }
 0x1b1   : > { %v1259_v62 = vpop.f32.mrf.mxu2  ;;  %1673 = vmatpush.msrb.mxu1 %v512_v3  ;;  %1739 = vmatpush.msrb.mxu2 %v542_v41  ;;  %v4497_v17 = vld [vmem:[#allocation5 + $0x348] sm:$0xff] }
 0x1b2   : > { %v1260_v0 = vadd.f32 %v1259_v62, %v1195_v48  ;;  %v540_v48 = vld [vmem:[%s4938_s11 + $0x648] sm:$0xff]  ;;  %1803 = vmatpush.msrb.mxu3 %v576_v49  ;;  %1610 = vmatpush.msrb.mxu0 %v476_v45  ;;  %v574_v62 = vld [vmem:[%s4938_s11 + $0x758] sm:$0xff] }
 0x1b3   : > { %v1132_v34 = vpop.f32.mrf.mxu0  ;;  %v1324_v12 = vpop.f32.mrf.mxu3  ;;  %1674 = vmatpush.msrb.mxu1 %v510_v46  ;;  %1740 = vmatpush.msrb.mxu2 %v540_v48  ;;  %v504_v49 = vld [vmem:[%s4938_s11 + $0x528] sm:$0xff]  ;;  %v4500_v46 = vld [vmem:[#allocation5 + $0x390] sm:$0xff] }
 0x1b4   : > { %v1133_v13 = vadd.f32 %v1132_v34, %v5349_v23  ;;  %v5607_v39 = vadd.f32 %v1324_v12, %v1260_v0  ;;  %v2095_v23 = vld [vmem:[%s7387_s4 + $0x260] sm:$0xff]  ;;  %1804 = vmatpush.msrb.mxu3 %v574_v62  ;;  %1611 = vmatpush.msrb.mxu0 %v474_v11  ;;  %v572_v34 = vld [vmem:[%s4938_s11 + $0x748] sm:$0xff]  ;;  %v4502_v11 = vld [vmem:[#allocation5 + $0x398] sm:$0xff] }
 0x1b5   : > { %v1197_v60 = vpop.f32.mrf.mxu1  ;;  %2529 = vperm.xlu2 %4442, %v2095_v23   ;;  %2554 = vperm.xlu1 %4441, %v2100_v24   ;;  %v4495_v0 = vld [vmem:[#allocation5 + $0x340] sm:$0xff]  ;;  %v472_v12 = vld [vmem:[%s4938_s11 + $0x428] sm:$0xff]  ;;  %v570_v23 = vld [vmem:[%s4938_s11 + $0x738] sm:$0xff] }
 0x1b6   : > { %1881 = vst [vmem:[%s5417_s20 + $0xb0] sm:$0xff] %v5607_v39  ;;  %1391 = vmatmul.f32.gmra.mxu0 %v4491_v18  ;;  %1521 = vmatmul.f32.gmra.mxu2 %v4492_v19  ;;  %v1198_v30 = vadd.f32 %v1197_v60, %v1133_v13  ;;  %v506_v60 = vld [vmem:[%s4938_s11 + $0x538] sm:$0xff]  ;;  %v536_v18 = vld [vmem:[%s4938_s11 + $0x628] sm:$0xff] }
 0x1b7   : > { %2594 = vperm.xlu0 %4440, %v2108_v29   ;;  %1741 = vmatpush.msrb.mxu2 %v538_v5  ;;  %v2103_v29 = vld [vmem:[%s7387_s4 + $0x2a0] sm:$0xff]  ;;  %v568_v48 = vld [vmem:[%s4938_s11 + $0x728] sm:$0xff]  ;;  %v2101_v5 = vld [vmem:[%s7387_s4 + $0x290] sm:$0xff] }
 0x1b8   : > { %1456 = vmatmul.f32.gmra.mxu1 %v4493_v36  ;;  %1586 = vmatmul.f32.gmra.mxu3 %v4494_v38  ;;  %v4501_v62 = vld [vmem:[#allocation5 + $0x388] sm:$0xff] }
 0x1b9   : > { %v1262_v43 = vpop.f32.mrf.mxu2  ;;  %1805 = vmatpush.msrb.mxu3 %v572_v34  ;;  %1612 = vmatpush.msrb.mxu0 %v472_v12  ;;  %v564_v12 = vld [vmem:[%s4938_s11 + $0x708] sm:$0xff] }
 0x1ba   : > { %v1263_v14 = vadd.f32 %v1262_v43, %v1198_v30  ;;  %v2111_v30 = vld [vmem:[%s7387_s4 + $0x2e0] sm:$0xff]  ;;  %1742 = vmatpush.msrb.mxu2 %v536_v18  ;;  %v470_v43 = vld [vmem:[%s4938_s11 + $0x418] sm:$0xff] }
 0x1bb   : > { %v1135_v56 = vpop.f32.mrf.mxu0  ;;  %v1327_v42 = vpop.f32.mrf.mxu3  ;;  %1806 = vmatpush.msrb.mxu3 %v570_v23  ;;  %1613 = vmatpush.msrb.mxu0 %v470_v43  ;;  %v2109_v43 = vld [vmem:[%s7387_s4 + $0x2d0] sm:$0xff] }
 0x1bc   : > { %v1136_v57 = vadd.f32 %v1135_v56, %v5372_v2  ;;  %v5630_v58 = vadd.f32 %v1327_v42, %v1263_v14  ;;  %v508_v2 = vld [vmem:[%s4938_s11 + $0x548] sm:$0xff]  ;;  %v4499_v14 = vld [vmem:[#allocation5 + $0x380] sm:$0xff]  ;;  %v502_v42 = vld [vmem:[%s4938_s11 + $0x518] sm:$0xff] }
 0x1bd   : > { %v1200_v7 = vpop.f32.mrf.mxu1  ;;  %1675 = vmatpush.msrb.mxu1 %v508_v2  ;;  %2544 = vperm.xlu2 %4442, %v2098_v21   ;;  %v468_v56 = vld [vmem:[%s4938_s11 + $0x408] sm:$0xff]  ;;  %v4503_v21 = vld [vmem:[#allocation5 + $0x3c0] sm:$0xff] }
 0x1be   : > { %1883 = vst [vmem:[%s5417_s20 + $0xc0] sm:$0xff] %v5630_v58  ;;  %1394 = vmatmul.f32.gmra.mxu0 %v4495_v0  ;;  %1524 = vmatmul.f32.gmra.mxu2 %v4496_v4  ;;  %v1201_v13 = vadd.f32 %v1200_v7, %v1136_v57  ;;  %v532_v7 = vld [vmem:[%s4938_s11 + $0x608] sm:$0xff]  ;;  %v566_v0 = vld [vmem:[%s4938_s11 + $0x718] sm:$0xff] }
 0x1bf   : > { %1676 = vmatpush.msrb.mxu1 %v506_v60  ;;  %2569 = vperm.xlu1 %4441, %v2103_v29   ;;  %v500_v2 = vld [vmem:[%s4938_s11 + $0x508] sm:$0xff] }
 0x1c0   : > { %1459 = vmatmul.f32.gmra.mxu1 %v4497_v17  ;;  %1589 = vmatmul.f32.gmra.mxu3 %v4498_v40 }
 0x1c1   : > { %v1265_v19 = vpop.f32.mrf.mxu2  ;;  %2609 = vperm.xlu0 %4440, %v2111_v30   ;;  %1677 = vmatpush.msrb.mxu1 %v504_v49  ;;  %v4505_v30 = vld [vmem:[#allocation5 + $0x3c8] sm:$0xff] }
 0x1c2   : > { %v1266_v24 = vadd.f32 %v1265_v19, %v1201_v13  ;;  %1807 = vmatpush.msrb.mxu3 %v568_v48  ;;  %1614 = vmatpush.msrb.mxu0 %v468_v56  ;;  %v2106_v13 = vld [vmem:[%s7387_s4 + $0x2b8] sm:$0xff]  ;;  %v4507_v56 = vld [vmem:[#allocation5 + $0x20] sm:$0xff] }
 0x1c3   : > { %v1138_v36 = vpop.f32.mrf.mxu0  ;;  %v1330_v38 = vpop.f32.mrf.mxu3  ;;  %1678 = vmatpush.msrb.mxu1 %v502_v42  ;;  %v2114_v19 = vld [vmem:[%s7387_s4 + $0x2f8] sm:$0xff]  ;;  %v4508_v42 = vld [vmem:[#allocation5 + $0x30] sm:$0xff] }
 0x1c4   : > { %v1139_v3 = vadd.f32 %v1138_v36, %v5389_v37  ;;  %v5653_v41 = vadd.f32 %v1330_v38, %v1266_v24  ;;  %v534_v37 = vld [vmem:[%s4938_s11 + $0x618] sm:$0xff]  ;;  %1808 = vmatpush.msrb.mxu3 %v566_v0  ;;  %v4504_v24 = vld [vmem:[#allocation5 + $0x3d0] sm:$0xff]  ;;  %v2104_v38 = vld [vmem:[%s7387_s4 + $0x2a8] sm:$0xff] }
 0x1c5   : > { %v1203_v45 = vpop.f32.mrf.mxu1  ;;  %1743 = vmatpush.msrb.mxu2 %v534_v37  ;;  %1679 = vmatpush.msrb.mxu1 %v500_v2 }
 0x1c6   : > { %1885 = vst [vmem:[%s5417_s20 + $0xd0] sm:$0xff] %v5653_v41  ;;  %1397 = vmatmul.f32.gmra.mxu0 %v4499_v14  ;;  %1527 = vmatmul.f32.gmra.mxu2 %v4500_v46  ;;  %v1204_v57 = vadd.f32 %v1203_v45, %v1139_v3 }
 0x1c7   : > { %1744 = vmatpush.msrb.mxu2 %v532_v7  ;;  %2559 = vperm.xlu2 %4442, %v2101_v5   ;;  %v2107_v7 = vld [vmem:[%s7387_s4 + $0x2c0] sm:$0xff] }
 0x1c8   : > { %1462 = vmatmul.f32.gmra.mxu1 %v4501_v62  ;;  %1592 = vmatmul.f32.gmra.mxu3 %v4502_v11  ;;  %v4509_v62 = vld [vmem:[#allocation5 + $0x28] sm:$0xff]  ;;  %v4510_v11 = vld [vmem:[#allocation5 + $0x38] sm:$0xff] }
 0x1c9   : > { %v1268_v4 = vpop.f32.mrf.mxu2  ;;  %1809 = vmatpush.msrb.mxu3 %v564_v12  ;;  %2584 = vperm.xlu1 %4441, %v2106_v13  }
 0x1ca   : > { %v1269_v34 = vadd.f32 %v1268_v4, %v1204_v57  ;;  %2624 = vperm.xlu0 %4440, %v2114_v19   ;;  %v2117_v57 = vld [vmem:[%s7387_s4 + $0x310] sm:$0xff] }
 0x1cb   : > { %v1141_v17 = vpop.f32.mrf.mxu0  ;;  %v1333_v40 = vpop.f32.mrf.mxu3 }
 0x1cc   : > { %v1142_v60 = vadd.f32 %v1141_v17, %v5401_v59  ;;  %v1334_v18 = vadd.f32 %v1333_v40, %v1269_v34  ;;  %v4506_v59 = vld [vmem:[#allocation5 + $0x3d8] sm:$0xff]  ;;  %v4511_v17 = vld [vmem:[#allocation5 + $0x60] sm:$0xff]  ;;  %v4512_v40 = vld [vmem:[#allocation5 + $0x70] sm:$0xff] }
 0x1cd   : > { %v1206_v23 = vpop.f32.mrf.mxu1 }
 0x1ce   : > { %1887 = vst [vmem:[%s5417_s20 + $0xe0] sm:$0xff] %v1334_v18  ;;  %1400 = vmatmul.f32.gmra.mxu0 %v4503_v21  ;;  %1530 = vmatmul.f32.gmra.mxu2 %v4504_v24  ;;  %v1207_v29 = vadd.f32 %v1206_v23, %v1142_v60  ;;  %v4513_v60 = vld [vmem:[#allocation5 + $0x68] sm:$0xff] }
 0x1cf   : > { %2574 = vperm.xlu2 %4442, %v2104_v38   ;;  %v4517_v38 = vld [vmem:[#allocation5 + $0xa8] sm:$0xff] }
 0x1d0   : > { %1465 = vmatmul.f32.gmra.mxu1 %v4505_v30  ;;  %1595 = vmatmul.f32.gmra.mxu3 %v4506_v59  ;;  %v4515_v59 = vld [vmem:[#allocation5 + $0xa0] sm:$0xff] }
 0x1d1   : > { %v1271_v36 = vpop.f32.mrf.mxu2  ;;  %2599 = vperm.xlu1 %4441, %v2109_v43  }
 0x1d2   : > { %v1272_v3 = vadd.f32 %v1271_v36, %v1207_v29  ;;  %2639 = vperm.xlu0 %4440, %v2117_v57   ;;  %v4516_v36 = vld [vmem:[#allocation5 + $0xb0] sm:$0xff] }
 0x1d3   : > { %v1336_v49 = vpop.f32.mrf.mxu3  ;;  %v1356_v45 = vpop.f32.mrf.mxu0 }
 0x1d4   : > { %v1337_v14 = vadd.f32 %v1336_v49, %v1272_v3  ;;  %v1357_v46 = vadd.f32 %v1356_v45, %v5133_v20 }
 0x1d5   : > { %v1421_v37 = vpop.f32.mrf.mxu1 }
 0x1d6   : > { %1889 = vst [vmem:[%s5417_s20 + $0xf0] sm:$0xff] %v1337_v14  ;;  %v1422_v48 = vadd.f32 %v1421_v37, %v1357_v46  ;;  %1615 = vmatmul.f32.vlgmr.msrb.gmra.mxu0 %v4507_v56  ;;  %1745 = vmatmul.f32.vlgmr.msrb.gmra.mxu2 %v4508_v42  ;;  %v4520_v56 = vld [vmem:[#allocation5 + $0xf0] sm:$0xff]  ;;  %v4521_v42 = vld [vmem:[#allocation5 + $0xe8] sm:$0xff] }
 0x1d7   : > { %2787 = vmatpush.msra.mxu0 %v1337_v14  ;;  %4311 = vmatpush.msra.mxu2 %v1337_v14 }
 0x1d8   : > { %1680 = vmatmul.f32.vlgmr.msrb.gmra.mxu1 %v4509_v62  ;;  %1810 = vmatmul.f32.vlgmr.msrb.gmra.mxu3 %v4510_v11 }
 0x1d9   : > { %2788 = vmatpush.msra.mxu0 %v1334_v18  ;;  %4312 = vmatpush.msra.mxu2 %v1334_v18  ;;  %v1486_v20 = vpop.f32.mrf.mxu2 }
 0x1da   : > { %v1487_v0 = vadd.f32 %v1486_v20, %v1422_v48  ;;  %2589 = vperm.xlu2 %4442, %v2107_v7   ;;  %v4519_v48 = vld [vmem:[#allocation5 + $0xe0] sm:$0xff] }
 0x1db   : > { %2789 = vmatpush.msra.mxu0 %v5653_v41  ;;  %4313 = vmatpush.msra.mxu2 %v5653_v41  ;;  %v1359_v4 = vpop.f32.mrf.mxu0  ;;  %v1551_v2 = vpop.f32.mrf.mxu3  ;;  %v2120_v41 = vld [vmem:[%s7387_s4 + $0x328] sm:$0xff] }
 0x1dc   : > { %v1360_v5 = vadd.f32 %v1359_v4, %v5145_v33  ;;  %v5695_v34 = vadd.f32 %v1551_v2, %v1487_v0  ;;  %v2112_v33 = vld [vmem:[%s7387_s4 + $0x2e8] sm:$0xff]  ;;  %2654 = vperm.xlu0 %4440, %v2120_v41  }
 0x1dd   : > { %2790 = vmatpush.msra.mxu0 %v5630_v58  ;;  %4314 = vmatpush.msra.mxu2 %v5630_v58  ;;  %v1424_v12 = vpop.f32.mrf.mxu1  ;;  %v4514_v58 = vld [vmem:[#allocation5 + $0x78] sm:$0xff] }
 0x1de   : > { %v1425_v13 = vadd.f32 %v1424_v12, %v1360_v5  ;;  %1618 = vmatmul.f32.gmra.mxu0 %v4511_v17  ;;  %1748 = vmatmul.f32.gmra.mxu2 %v4512_v40  ;;  %v4524_v5 = vld [vmem:[#allocation5 + $0x120] sm:$0xff]  ;;  %v4525_v12 = vld [vmem:[#allocation5 + $0x130] sm:$0xff]  ;;  %v4527_v17 = vld [vmem:[#allocation5 + $0x138] sm:$0xff] }
 0x1df   : > { %2791 = vmatpush.msra.mxu0 %v5607_v39  ;;  %4315 = vmatpush.msra.mxu2 %v5607_v39  ;;  %v2110_v39 = vld [vmem:[%s7387_s4 + $0x2d8] sm:$0xff]  ;;  %v2119_v40 = vld [vmem:[%s7387_s4 + $0x320] sm:$0xff] }
 0x1e0   : > { %1683 = vmatmul.f32.gmra.mxu1 %v4513_v60  ;;  %1813 = vmatmul.f32.gmra.mxu3 %v4514_v58 }
 0x1e1   : > { %2792 = vmatpush.msra.mxu0 %v5584_v31  ;;  %4316 = vmatpush.msra.mxu2 %v5584_v31  ;;  %v1489_v18 = vpop.f32.mrf.mxu2 }
 0x1e2   : > { %v1490_v19 = vadd.f32 %v1489_v18, %v1425_v13  ;;  %2614 = vperm.xlu1 %4441, %v2112_v33   ;;  %2604 = vperm.xlu2 %4442, %v2110_v39   ;;  %v4526_v13 = vld [vmem:[#allocation5 + $0x128] sm:$0xff] }
 0x1e3   : > { %2793 = vmatpush.msra.mxu0 %v5561_v51  ;;  %4317 = vmatpush.msra.mxu2 %v5561_v51  ;;  %v1362_v23 = vpop.f32.mrf.mxu0  ;;  %v1554_v21 = vpop.f32.mrf.mxu3  ;;  %v2123_v51 = vld [vmem:[%s7387_s4 + $0x340] sm:$0xff] }
 0x1e4   : > { %v1363_v24 = vadd.f32 %v1362_v23, %v5156_v47  ;;  %v5715_v29 = vadd.f32 %v1554_v21, %v1490_v19  ;;  %v2115_v47 = vld [vmem:[%s7387_s4 + $0x300] sm:$0xff]  ;;  %2669 = vperm.xlu0 %4440, %v2123_v51   ;;  %v4529_v21 = vld [vmem:[#allocation5 + $0x170] sm:$0xff] }
 0x1e5   : > { %2794 = vmatpush.msra.mxu0 %v5538_v10  ;;  %4318 = vmatpush.msra.mxu2 %v5538_v10  ;;  %v1427_v31 = vpop.f32.mrf.mxu1  ;;  %v4518_v10 = vld [vmem:[#allocation5 + $0xb8] sm:$0xff]  ;;  %v4528_v23 = vld [vmem:[#allocation5 + $0x160] sm:$0xff] }
 0x1e6   : > { %v1428_v30 = vadd.f32 %v1427_v31, %v1363_v24  ;;  %1621 = vmatmul.f32.gmra.mxu0 %v4515_v59  ;;  %1751 = vmatmul.f32.gmra.mxu2 %v4516_v36  ;;  %v2124_v24 = vld [vmem:[%s7387_s4 + $0x348] sm:$0xff]  ;;  %v2122_v36 = vld [vmem:[%s7387_s4 + $0x338] sm:$0xff] }
 0x1e7   : > { %2795 = vmatpush.msra.mxu0 %v5515_v28  ;;  %4319 = vmatpush.msra.mxu2 %v5515_v28  ;;  %v2113_v28 = vld [vmem:[%s7387_s4 + $0x2f0] sm:$0xff]  ;;  %v2132_v31 = vld [vmem:[%s7387_s4 + $0x388] sm:$0xff] }
 0x1e8   : > { %1686 = vmatmul.f32.gmra.mxu1 %v4517_v38  ;;  %1816 = vmatmul.f32.gmra.mxu3 %v4518_v10 }
 0x1e9   : > { %2796 = vmatpush.msra.mxu0 %v5501_v63  ;;  %4320 = vmatpush.msra.mxu2 %v5501_v63  ;;  %v1492_v3 = vpop.f32.mrf.mxu2 }
 0x1ea   : > { %v1493_v43 = vadd.f32 %v1492_v3, %v1428_v30  ;;  %2629 = vperm.xlu1 %4441, %v2115_v47   ;;  %2619 = vperm.xlu2 %4442, %v2113_v28   ;;  %v4530_v30 = vld [vmem:[#allocation5 + $0x168] sm:$0xff] }
 0x1eb   : > { %2797 = vmatpush.msra.mxu0 %v5487_v55  ;;  %4321 = vmatpush.msra.mxu2 %v5487_v55  ;;  %v1365_v49 = vpop.f32.mrf.mxu0  ;;  %v1557_v45 = vpop.f32.mrf.mxu3  ;;  %v2126_v55 = vld [vmem:[%s7387_s4 + $0x358] sm:$0xff] }
 0x1ec   : > { %v1366_v14 = vadd.f32 %v1365_v49, %v5173_v1  ;;  %v5735_v46 = vadd.f32 %v1557_v45, %v1493_v43  ;;  %v2118_v1 = vld [vmem:[%s7387_s4 + $0x318] sm:$0xff]  ;;  %2684 = vperm.xlu0 %4440, %v2126_v55   ;;  %v5783_v43 = vpop.permute.xlu2 %2154  ;;  %v4532_v45 = vld [vmem:[#allocation5 + $0x1a0] sm:$0xff] }
 0x1ed   : > { %2798 = vmatpush.msra.mxu0 %v5473_v6  ;;  %4322 = vmatpush.msra.mxu2 %v5473_v6  ;;  %v1430_v63 = vpop.f32.mrf.mxu1  ;;  %v4522_v6 = vld [vmem:[#allocation5 + $0xf8] sm:$0xff]  ;;  %7530 = vst [vmem:[#allocation17_spill] sm:$0xff] %v5783_v43 }
 0x1ee   : > { %v1431_v37 = vadd.f32 %v1430_v63, %v1366_v14  ;;  %1624 = vmatmul.f32.gmra.mxu0 %v4519_v48  ;;  %1754 = vmatmul.f32.gmra.mxu2 %v4520_v56  ;;  %v4533_v14 = vld [vmem:[#allocation5 + $0x1b0] sm:$0xff]  ;;  %v2127_v63 = vld [vmem:[%s7387_s4 + $0x360] sm:$0xff]  ;;  %v4535_v48 = vld [vmem:[#allocation5 + $0x1b8] sm:$0xff] }
 0x1ef   : > { %2799 = vmatpush.msra.mxu0 %v5459_v44  ;;  %4323 = vmatpush.msra.mxu2 %v5459_v44  ;;  %v2116_v44 = vld [vmem:[%s7387_s4 + $0x308] sm:$0xff] }
 0x1f0   : > { %1689 = vmatmul.f32.gmra.mxu1 %v4521_v42  ;;  %1819 = vmatmul.f32.gmra.mxu3 %v4522_v6 }
 0x1f1   : > { %2800 = vmatpush.msra.mxu0 %v5445_v16  ;;  %4324 = vmatpush.msra.mxu2 %v5445_v16  ;;  %v1495_v57 = vpop.f32.mrf.mxu2  ;;  %v4523_v16 = vld [vmem:[%s5417_s20] sm:$0xff] }
 0x1f2   : > { %v1496_v62 = vadd.f32 %v1495_v57, %v1431_v37  ;;  %2644 = vperm.xlu1 %4441, %v2118_v1   ;;  %2634 = vperm.xlu2 %4442, %v2116_v44   ;;  %v2135_v37 = vld [vmem:[%s7387_s4 + $0x3a0] sm:$0xff]  ;;  %v2125_v1 = vld [vmem:[%s7387_s4 + $0x350] sm:$0xff]  ;;  %v5794_v57 = vpop.permute.xlu1 %2149 }
 0x1f3   : > { %2801 = vmatpush.msra.mxu0 %v5431_v54  ;;  %4325 = vmatpush.msra.mxu2 %v5431_v54  ;;  %v1368_v11 = vpop.f32.mrf.mxu0  ;;  %v1560_v20 = vpop.f32.mrf.mxu3  ;;  %v2121_v54 = vld [vmem:[%s7387_s4 + $0x330] sm:$0xff] }
 0x1f4   : > { %v1369_v7 = vadd.f32 %v1368_v11, %v5184_v15  ;;  %v5755_v0 = vadd.f32 %v1560_v20, %v1496_v62  ;;  %v2129_v15 = vld [vmem:[%s7387_s4 + $0x370] sm:$0xff]  ;;  %v5799_v20 = vpop.permute.xlu0 %2159 }
 0x1f5   : > { %2802 = vmatpush.msra.mxu0 %v5415_v22  ;;  %4326 = vmatpush.msra.mxu2 %v4523_v16  ;;  %v1433_v4 = vpop.f32.mrf.mxu1  ;;  %7531 = vst [vmem:[#allocation18_spill] sm:$0xff] %v5799_v20  ;;  %v4536_v16 = vld [vmem:[#allocation5 + $0x1e0] sm:$0xff]  ;;  %v5968_v20 = vld [vmem:[#allocation7 + $0x208] sm:$0xff] }
 0x1f6   : > { %v1434_v2 = vadd.f32 %v1433_v4, %v1369_v7  ;;  %1627 = vmatmul.f32.gmra.mxu0 %v4524_v5  ;;  %1757 = vmatmul.f32.gmra.mxu2 %v4525_v12  ;;  %v4537_v4 = vld [vmem:[#allocation5 + $0x1f0] sm:$0xff]  ;;  %v2138_v5 = vld [vmem:[%s7387_s4 + $0x3b8] sm:$0xff]  ;;  %v4538_v12 = vld [vmem:[#allocation5 + $0x1e8] sm:$0xff]  ;;  %7557 = vst [vmem:[#allocation44_spill] sm:$0xff] %v5968_v20 }
 0x1f7   : > { %2699 = vperm.xlu0 %4440, %v2129_v15  }
 0x1f8   : > { %1692 = vmatmul.f32.gmra.mxu1 %v4526_v13  ;;  %1822 = vmatmul.f32.gmra.mxu3 %v4527_v17  ;;  %v2128_v13 = vld [vmem:[%s7387_s4 + $0x368] sm:$0xff] }
 0x1f9   : > { %v1498_v22 = vpop.f32.mrf.mxu2 }
 0x1fa   : > { %v1499_v33 = vadd.f32 %v1498_v22, %v1434_v2  ;;  %2659 = vperm.xlu1 %4441, %v2121_v54   ;;  %2649 = vperm.xlu2 %4442, %v2119_v40   ;;  %v2130_v2 = vld [vmem:[%s7387_s4 + $0x378] sm:$0xff] }
 0x1fb   : > { %v1371_v41 = vpop.f32.mrf.mxu0  ;;  %v1563_v60 = vpop.f32.mrf.mxu3  ;;  %v4539_v54 = vld [vmem:[#allocation5 + $0x1f8] sm:$0xff] }
 0x1fc   : > { %v1372_v58 = vadd.f32 %v1371_v41, %v5201_v35  ;;  %v5769_v18 = vadd.f32 %v1563_v60, %v1499_v33  ;;  %v4531_v35 = vld [vmem:[#allocation5 + $0x178] sm:$0xff]  ;;  %v5818_v60 = vpop.permute.xlu1 %2164 }
 0x1fd   : > { %v1436_v39 = vpop.f32.mrf.mxu1  ;;  %7533 = vst [vmem:[#allocation20_spill] sm:$0xff] %v5818_v60  ;;  %v5966_v60 = vld [vmem:[#allocation7 + $0x8] sm:$0xff] }
 0x1fe   : > { %v1437_v19 = vadd.f32 %v1436_v39, %v1372_v58  ;;  %1630 = vmatmul.f32.gmra.mxu0 %v4528_v23  ;;  %1760 = vmatmul.f32.gmra.mxu2 %v4529_v21  ;;  %v4540_v58 = vld [vmem:[#allocation5 + $0x220] sm:$0xff]  ;;  %v4541_v39 = vld [vmem:[#allocation5 + $0x230] sm:$0xff]  ;;  %v5826_v21 = vpop.permute.xlu0 %2174  ;;  %7556 = vst [vmem:[#allocation43_spill] sm:$0xff] %v5966_v60 }
 0x1ff   : > { %2714 = vperm.xlu0 %4440, %v2132_v31   ;;  %v2141_v23 = vld [vmem:[%s7387_s4 + $0x3d0] sm:$0xff]  ;;  %7534 = vst [vmem:[#allocation21_spill] sm:$0xff] %v5826_v21  ;;  %v4543_v31 = vld [vmem:[#allocation5 + $0x238] sm:$0xff] }
 0x200   : > { %1695 = vmatmul.f32.gmra.mxu1 %v4530_v30  ;;  %1825 = vmatmul.f32.gmra.mxu3 %v4531_v35  ;;  %v2131_v35 = vld [vmem:[%s7387_s4 + $0x380] sm:$0xff] }
 0x201   : > { %v1501_v59 = vpop.f32.mrf.mxu2 }
 0x202   : > { %v1502_v47 = vadd.f32 %v1501_v59, %v1437_v19  ;;  %2674 = vperm.xlu1 %4441, %v2124_v24   ;;  %2664 = vperm.xlu2 %4442, %v2122_v36   ;;  %v2133_v19 = vld [vmem:[%s7387_s4 + $0x390] sm:$0xff]  ;;  %v4542_v24 = vld [vmem:[#allocation5 + $0x228] sm:$0xff] }
 0x203   : > { %v1374_v51 = vpop.f32.mrf.mxu0  ;;  %v1566_v38 = vpop.f32.mrf.mxu3 }
 0x204   : > { %v1375_v10 = vadd.f32 %v1374_v51, %v5215_v53  ;;  %v5781_v3 = vadd.f32 %v1566_v38, %v1502_v47  ;;  %v4534_v53 = vld [vmem:[#allocation5 + $0x1a8] sm:$0xff]  ;;  %v4544_v38 = vld [vmem:[#allocation5 + $0x260] sm:$0xff] }
 0x205   : > { %v1439_v28 = vpop.f32.mrf.mxu1 }
 0x206   : > { %v1440_v49 = vadd.f32 %v1439_v28, %v1375_v10  ;;  %1633 = vmatmul.f32.gmra.mxu0 %v4532_v45  ;;  %1763 = vmatmul.f32.gmra.mxu2 %v4533_v14  ;;  %v4545_v10 = vld [vmem:[#allocation5 + $0x270] sm:$0xff]  ;;  %v2136_v28 = vld [vmem:[%s7387_s4 + $0x3a8] sm:$0xff]  ;;  %v5847_v45 = vpop.permute.xlu1 %2179 }
 0x207   : > { %2729 = vperm.xlu0 %4440, %v2135_v37   ;;  %7536 = vst [vmem:[#allocation23_spill] sm:$0xff] %v5847_v45  ;;  %v4546_v14 = vld [vmem:[#allocation5 + $0x268] sm:$0xff] }
 0x208   : > { %1698 = vmatmul.f32.gmra.mxu1 %v4534_v53  ;;  %1828 = vmatmul.f32.gmra.mxu3 %v4535_v48  ;;  %v2134_v53 = vld [vmem:[%s7387_s4 + $0x398] sm:$0xff]  ;;  %v5854_v48 = vpop.permute.xlu0 %2189 }
 0x209   : > { %v1504_v56 = vpop.f32.mrf.mxu2  ;;  %7537 = vst [vmem:[#allocation24_spill] sm:$0xff] %v5854_v48  ;;  %v5955_v48 = vld [vmem:[#allocation7] sm:$0xff] }
 0x20a   : > { %v1505_v55 = vadd.f32 %v1504_v56, %v1440_v49  ;;  %2689 = vperm.xlu1 %4441, %v2127_v63   ;;  %2679 = vperm.xlu2 %4442, %v2125_v1   ;;  %v2144_v49 = vld [vmem:[%s7387_s4 + $0x3e8] sm:$0xff]  ;;  %v4547_v63 = vld [vmem:[#allocation5 + $0x278] sm:$0xff]  ;;  %7552 = vst [vmem:[#allocation39_spill] sm:$0xff] %v5955_v48 }
 0x20b   : > { %v1377_v42 = vpop.f32.mrf.mxu0  ;;  %v1569_v6 = vpop.f32.mrf.mxu3 }
 0x20c   : > { %v1378_v44 = vadd.f32 %v1377_v42, %v5229_v8  ;;  %v5797_v62 = vadd.f32 %v1569_v6, %v1505_v55  ;;  %v5807_v8 = vpop.permute.xlu2 %2169  ;;  %v4548_v6 = vld [vmem:[#allocation5 + $0x2a0] sm:$0xff] }
 0x20d   : > { %v1442_v11 = vpop.f32.mrf.mxu1  ;;  %7532 = vst [vmem:[#allocation19_spill] sm:$0xff] %v5807_v8 }
 0x20e   : > { %v1443_v7 = vadd.f32 %v1442_v11, %v1378_v44  ;;  %1636 = vmatmul.f32.gmra.mxu0 %v4536_v16  ;;  %1766 = vmatmul.f32.gmra.mxu2 %v4537_v4  ;;  %v4549_v44 = vld [vmem:[#allocation5 + $0x2b0] sm:$0xff]  ;;  %v2139_v11 = vld [vmem:[%s7387_s4 + $0x3c0] sm:$0xff]  ;;  %v4551_v16 = vld [vmem:[#allocation5 + $0x2b8] sm:$0xff] }
 0x20f   : > { %2744 = vperm.xlu0 %4440, %v2138_v5   ;;  %v5872_v5 = vpop.permute.xlu1 %2194 }
 0x210   : > { %1701 = vmatmul.f32.gmra.mxu1 %v4538_v12  ;;  %1831 = vmatmul.f32.gmra.mxu3 %v4539_v54  ;;  %7539 = vst [vmem:[#allocation26_spill] sm:$0xff] %v5872_v5 }
 0x211   : > { %v1507_v15 = vpop.f32.mrf.mxu2 }
 0x212   : > { %v1508_v17 = vadd.f32 %v1507_v15, %v1443_v7  ;;  %2704 = vperm.xlu1 %4441, %v2130_v2   ;;  %2694 = vperm.xlu2 %4442, %v2128_v13   ;;  %v4550_v7 = vld [vmem:[#allocation5 + $0x2a8] sm:$0xff]  ;;  %v2137_v2 = vld [vmem:[%s7387_s4 + $0x3b0] sm:$0xff]  ;;  %v5878_v15 = vpop.permute.xlu0 %2204 }
 0x213   : > { %v5812_v22 = vpop.f32.mrf.mxu0  ;;  %v1572_v40 = vpop.f32.mrf.mxu3  ;;  %7540 = vst [vmem:[#allocation27_spill] sm:$0xff] %v5878_v15 }
 0x214   : > { %v5814_v33 = vadd.f32 %v1572_v40, %v1508_v17  ;;  %v5833_v59 = vpop.permute.xlu2 %2184  ;;  %v4552_v40 = vld [vmem:[#allocation5 + $0x2e0] sm:$0xff] }
 0x215   : > { %v5816_v41 = vpop.f32.mrf.mxu1  ;;  %7535 = vst [vmem:[#allocation22_spill] sm:$0xff] %v5833_v59 }
 0x216   : > { %1639 = vmatmul.f32.gmra.mxu0 %v4540_v58  ;;  %1769 = vmatmul.f32.gmra.mxu2 %v4541_v39  ;;  %v4553_v58 = vld [vmem:[#allocation5 + $0x2f0] sm:$0xff]  ;;  %v2142_v39 = vld [vmem:[%s7387_s4 + $0x3d8] sm:$0xff] }
 0x217   : > { %2759 = vperm.xlu0 %4440, %v2141_v23   ;;  %v4555_v23 = vld [vmem:[#allocation5 + $0x2f8] sm:$0xff] }
 0x218   : > { %1704 = vmatmul.f32.gmra.mxu1 %v4542_v24  ;;  %1834 = vmatmul.f32.gmra.mxu3 %v4543_v31  ;;  %v2140_v31 = vld [vmem:[%s7387_s4 + $0x3c8] sm:$0xff] }
 0x219   : > { %v5828_v30 = vpop.f32.mrf.mxu2 }
 0x21a   : > { %2719 = vperm.xlu1 %4441, %v2133_v19   ;;  %2709 = vperm.xlu2 %4442, %v2131_v35   ;;  %v4554_v19 = vld [vmem:[#allocation5 + $0x2e8] sm:$0xff] }
 0x21b   : > { %v5835_v36 = vpop.f32.mrf.mxu0  ;;  %v5837_v47 = vpop.f32.mrf.mxu3 }
 0x21c   : > { %v5860_v55 = vpop.permute.xlu2 %2199 }
 0x21d   : > { %v5839_v51 = vpop.f32.mrf.mxu1  ;;  %7538 = vst [vmem:[#allocation25_spill] sm:$0xff] %v5860_v55 }
 0x21e   : > { %1642 = vmatmul.f32.gmra.mxu0 %v4544_v38  ;;  %1772 = vmatmul.f32.gmra.mxu2 %v4545_v10  ;;  %v5896_v10 = vpop.permute.xlu1 %2209 }
 0x21f   : > { %2774 = vperm.xlu0 %4440, %v2144_v49   ;;  %7542 = vst [vmem:[#allocation29_spill] sm:$0xff] %v5896_v10  ;;  %v5900_v49 = vpop.permute.xlu0 %2219 }
 0x220   : > { %1707 = vmatmul.f32.gmra.mxu1 %v4546_v14  ;;  %1837 = vmatmul.f32.gmra.mxu3 %v4547_v63  ;;  %7543 = vst [vmem:[#allocation30_spill] sm:$0xff] %v5900_v49  ;;  %v4556_v14 = vld [vmem:[#allocation5 + $0x320] sm:$0xff]  ;;  %v4557_v63 = vld [vmem:[#allocation5 + $0x330] sm:$0xff] }
 0x221   : > { %v5849_v37 = vpop.f32.mrf.mxu2 }
 0x222   : > { %2734 = vperm.xlu1 %4441, %v2136_v28   ;;  %2724 = vperm.xlu2 %4442, %v2134_v53   ;;  %v2145_v53 = vld [vmem:[%s7387_s4 + $0x3f0] sm:$0xff] }
 0x223   : > { %v5856_v56 = vpop.f32.mrf.mxu0  ;;  %v5858_v1 = vpop.f32.mrf.mxu3 }
 0x224   : > { %v5882_v17 = vpop.permute.xlu2 %2214 }
 0x225   : > { %v5862_v42 = vpop.f32.mrf.mxu1  ;;  %7541 = vst [vmem:[#allocation28_spill] sm:$0xff] %v5882_v17 }
 0x226   : > { %1645 = vmatmul.f32.gmra.mxu0 %v4548_v6  ;;  %1775 = vmatmul.f32.gmra.mxu2 %v4549_v44  ;;  %v4558_v44 = vld [vmem:[#allocation5 + $0x328] sm:$0xff] }
 0x228   : > { %1710 = vmatmul.f32.gmra.mxu1 %v4550_v7  ;;  %1840 = vmatmul.f32.gmra.mxu3 %v4551_v16  ;;  %v2143_v16 = vld [vmem:[%s7387_s4 + $0x3e0] sm:$0xff] }
 0x229   : > { %v5867_v4 = vpop.f32.mrf.mxu2 }
 0x22a   : > { %2749 = vperm.xlu1 %4441, %v2139_v11   ;;  %2739 = vperm.xlu2 %4442, %v2137_v2   ;;  %v4559_v11 = vld [vmem:[#allocation5 + $0x338] sm:$0xff] }
 0x22b   : > { %v5874_v12 = vpop.f32.mrf.mxu0  ;;  %v5876_v54 = vpop.f32.mrf.mxu3 }
 0x22c   : > { %v5905_v6 = vpop.permute.xlu2 %2229 }
 0x22d   : > { %v5880_v13 = vpop.f32.mrf.mxu1  ;;  %7544 = vst [vmem:[#allocation31_spill] sm:$0xff] %v5905_v6 }
 0x22e   : > { %1648 = vmatmul.f32.gmra.mxu0 %v4552_v40  ;;  %1778 = vmatmul.f32.gmra.mxu2 %v4553_v58 }
 0x230   : > { %1713 = vmatmul.f32.gmra.mxu1 %v4554_v19  ;;  %1843 = vmatmul.f32.gmra.mxu3 %v4555_v23  ;;  %v4560_v19 = vld [vmem:[#allocation5 + $0x360] sm:$0xff]  ;;  %v4561_v23 = vld [vmem:[#allocation5 + $0x370] sm:$0xff] }
 0x231   : > { %v5887_v24 = vpop.f32.mrf.mxu2 }
 0x232   : > { %2764 = vperm.xlu1 %4441, %v2142_v39   ;;  %2754 = vperm.xlu2 %4442, %v2140_v31   ;;  %v5918_v39 = vpop.permute.xlu1 %2224  ;;  %v5920_v31 = vpop.permute.xlu0 %2234 }
 0x233   : > { %v5892_v35 = vpop.f32.mrf.mxu0  ;;  %v5894_v38 = vpop.f32.mrf.mxu3  ;;  %7545 = vst [vmem:[#allocation32_spill] sm:$0xff] %v5918_v39  ;;  %v4567_v39 = vld [vmem:[#allocation5 + $0x3b8] sm:$0xff] }
 0x234   : > { %7546 = vst [vmem:[#allocation33_spill] sm:$0xff] %v5920_v31  ;;  %v4566_v31 = vld [vmem:[#allocation5 + $0x3a8] sm:$0xff] }
 0x235   : > { %v5898_v28 = vpop.f32.mrf.mxu1 }
 0x236   : > { %1651 = vmatmul.f32.gmra.mxu0 %v4556_v14  ;;  %1781 = vmatmul.f32.gmra.mxu2 %v4557_v63  ;;  %v4562_v14 = vld [vmem:[#allocation5 + $0x368] sm:$0xff]  ;;  %v4563_v63 = vld [vmem:[#allocation5 + $0x378] sm:$0xff] }
 0x238   : > { %1716 = vmatmul.f32.gmra.mxu1 %v4558_v44  ;;  %1846 = vmatmul.f32.gmra.mxu3 %v4559_v11  ;;  %v2146_v44 = vld [vmem:[%s7387_s4 + $0x3f8] sm:$0xff]  ;;  %v5927_v11 = vpop.permute.xlu2 %2244 }
 0x239   : > { %v5907_v7 = vpop.f32.mrf.mxu2  ;;  %7547 = vst [vmem:[#allocation34_spill] sm:$0xff] %v5927_v11 }
 0x23a   : > { %2779 = vperm.xlu1 %4441, %v2145_v53   ;;  %2769 = vperm.xlu2 %4442, %v2143_v16   ;;  %v5939_v11 = vpop.permute.xlu0 %2249 }
 0x23b   : > { %v5912_v2 = vpop.f32.mrf.mxu0  ;;  %v5914_v40 = vpop.f32.mrf.mxu3  ;;  %7549 = vst [vmem:[#allocation36_spill] sm:$0xff] %v5939_v11 }
 0x23d   : > { %v5916_v58 = vpop.f32.mrf.mxu1 }
 0x23e   : > { %1654 = vmatmul.f32.gmra.mxu0 %v4560_v19  ;;  %1784 = vmatmul.f32.gmra.mxu2 %v4561_v23  ;;  %v4564_v23 = vld [vmem:[#allocation5 + $0x3a0] sm:$0xff] }
 0x240   : > { %1719 = vmatmul.f32.gmra.mxu1 %v4562_v14  ;;  %1849 = vmatmul.f32.gmra.mxu3 %v4563_v63  ;;  %v4565_v14 = vld [vmem:[#allocation5 + $0x3b0] sm:$0xff]  ;;  %v5935_v63 = vpop.permute.xlu1 %2239 }
 0x241   : > { %v5922_v53 = vpop.f32.mrf.mxu2  ;;  %7548 = vst [vmem:[#allocation35_spill] sm:$0xff] %v5935_v63  ;;  %v4570_v63 = vld [vmem:[#allocation5 + $0x3e8] sm:$0xff] }
 0x242   : > { %2784 = vperm.xlu2 %4442, %v2146_v44   ;;  %v5945_v44 = vpop.permute.xlu2 %2259  ;;  %v5959_v59 = vpop.permute.xlu0 %2264 }
 0x243   : > { %v5929_v16 = vpop.f32.mrf.mxu0  ;;  %v5931_v6 = vpop.f32.mrf.mxu3  ;;  %7550 = vst [vmem:[#allocation37_spill] sm:$0xff] %v5945_v44  ;;  %v5957_v44 = vld [vmem:[#allocation7 + $0x200] sm:$0xff] }
 0x244   : > { %7553 = vst [vmem:[#allocation40_spill] sm:$0xff] %v5957_v44 }
 0x245   : > { %v5933_v19 = vpop.f32.mrf.mxu1  ;;  %7554 = vst [vmem:[#allocation41_spill] sm:$0xff] %v5959_v59 }
 0x246   : > { %1657 = vmatmul.f32.gmra.mxu0 %v4564_v23  ;;  %1787 = vmatmul.f32.gmra.mxu2 %v4565_v14  ;;  %v4568_v23 = vld [vmem:[#allocation5 + $0x3e0] sm:$0xff]  ;;  %v4569_v14 = vld [vmem:[#allocation5 + $0x3f0] sm:$0xff] }
 0x248   : > { %1722 = vmatmul.f32.gmra.mxu1 %v4566_v31  ;;  %1852 = vmatmul.f32.gmra.mxu3 %v4567_v39  ;;  %v4571_v31 = vld [vmem:[#allocation5 + $0x3f8] sm:$0xff]  ;;  %v5951_v55 = vpop.permute.xlu1 %2254 }
 0x249   : > { %v5937_v49 = vpop.f32.mrf.mxu2  ;;  %7551 = vst [vmem:[#allocation38_spill] sm:$0xff] %v5951_v55 }
 0x24a   : > { %v5975_v43 = vpop.permute.xlu0 %2279 }
 0x24b   : > { %v5941_v17 = vpop.f32.mrf.mxu0  ;;  %v5943_v10 = vpop.f32.mrf.mxu3  ;;  %7559 = vst [vmem:[#allocation46_spill] sm:$0xff] %v5975_v43 }
 0x24d   : > { %v5947_v15 = vpop.f32.mrf.mxu1 }
 0x24e   : > { %1660 = vmatmul.f32.gmra.mxu0 %v4568_v23  ;;  %1790 = vmatmul.f32.gmra.mxu2 %v4569_v14 }
 0x250   : > { %1725 = vmatmul.f32.gmra.mxu1 %v4570_v63  ;;  %1855 = vmatmul.f32.gmra.mxu3 %v4571_v31  ;;  %v5962_v63 = vpop.permute.xlu2 %2274  ;;  %v5970_v59 = vpop.permute.xlu1 %2269 }
 0x251   : > { %v5949_v39 = vpop.f32.mrf.mxu2  ;;  %7555 = vst [vmem:[#allocation42_spill] sm:$0xff] %v5962_v63 }
 0x252   : > { %7558 = vst [vmem:[#allocation45_spill] sm:$0xff] %v5970_v59 }
 0x253   : > { %v5953_v11 = vpop.f32.mrf.mxu3  ;;  %v1616_v5 = vpop.f32.mrf.mxu0 }
 0x254   : > { %v1617_v23 = vadd.f32 %v1616_v5, %v5695_v34 }
 0x255   : > { %v1681_v14 = vpop.f32.mrf.mxu1 }
 0x256   : > { %2803 = vmatmul.f32.vlgmr.msra.gmra.mxu0 %v5955_v48  ;;  %2995 = vmatmul.f32.vlgmr.msra.gmra.mxu2 %v5957_v44  ;;  %v1682_v31 = vadd.f32 %v1681_v14, %v1617_v23 }
 0x258   : > { %v5990_v48 = vpop.permute.xlu1 %2284 }
 0x259   : > { %v1746_v55 = vpop.f32.mrf.mxu2  ;;  %7563 = vst [vmem:[#allocation50_spill] sm:$0xff] %v5990_v48 }
 0x25a   : > { %v1747_v45 = vadd.f32 %v1746_v55, %v1682_v31  ;;  %v5981_v55 = vpop.permute.xlu2 %2289 }
 0x25b   : > { %v1619_v21 = vpop.f32.mrf.mxu0  ;;  %v1811_v8 = vpop.f32.mrf.mxu3  ;;  %7560 = vst [vmem:[#allocation47_spill] sm:$0xff] %v5981_v55 }
 0x25c   : > { %v1620_v34 = vadd.f32 %v1619_v21, %v5715_v29  ;;  %v5973_v5 = vadd.f32 %v1811_v8, %v1747_v45  ;;  %v5983_v29 = vld [vmem:[#allocation7 + $0x10] sm:$0xff] }
 0x25d   : > { %v1684_v63 = vpop.f32.mrf.mxu1  ;;  %7561 = vst [vmem:[#allocation48_spill] sm:$0xff] %v5983_v29  ;;  %v5985_v8 = vld [vmem:[#allocation7 + $0x210] sm:$0xff] }
 0x25e   : > { %1860 = vst [vmem:[%s5417_s20 + $0x8] sm:$0xff] %v5973_v5  ;;  %2806 = vmatmul.f32.gmra.mxu0 %v5966_v60  ;;  %2998 = vmatmul.f32.gmra.mxu2 %v5968_v20  ;;  %v1685_v23 = vadd.f32 %v1684_v63, %v1620_v34  ;;  %v5996_v63 = vpop.permute.xlu0 %2294 }
 0x25f   : > { %7562 = vst [vmem:[#allocation49_spill] sm:$0xff] %v5985_v8 }
 0x260   : > { %7564 = vst [vmem:[#allocation51_spill] sm:$0xff] %v5996_v63 }
 0x261   : > { %v1749_v14 = vpop.f32.mrf.mxu2 }
 0x262   : > { %v1750_v31 = vadd.f32 %v1749_v14, %v1685_v23  ;;  %v5998_v14 = vpop.permute.xlu2 %2304 }
 0x263   : > { %v1622_v59 = vpop.f32.mrf.mxu0  ;;  %v1814_v44 = vpop.f32.mrf.mxu3  ;;  %7565 = vst [vmem:[#allocation52_spill] sm:$0xff] %v5998_v14 }
 0x264   : > { %v1623_v21 = vadd.f32 %v1622_v59, %v5735_v46  ;;  %v5988_v45 = vadd.f32 %v1814_v44, %v1750_v31  ;;  %v6000_v44 = vld [vmem:[#allocation7 + $0x18] sm:$0xff] }
 0x265   : > { %v1687_v43 = vpop.f32.mrf.mxu1  ;;  %7566 = vst [vmem:[#allocation53_spill] sm:$0xff] %v6000_v44  ;;  %v6002_v31 = vld [vmem:[#allocation7 + $0x218] sm:$0xff] }
 0x266   : > { %1862 = vst [vmem:[%s5417_s20 + $0x18] sm:$0xff] %v5988_v45  ;;  %2809 = vmatmul.f32.gmra.mxu0 %v5983_v29  ;;  %3001 = vmatmul.f32.gmra.mxu2 %v5985_v8  ;;  %v1688_v34 = vadd.f32 %v1687_v43, %v1623_v21  ;;  %v6011_v43 = vpop.permute.xlu1 %2299 }
 0x267   : > { %7567 = vst [vmem:[#allocation54_spill] sm:$0xff] %v6002_v31 }
 0x268   : > { %7568 = vst [vmem:[#allocation55_spill] sm:$0xff] %v6011_v43 }
 0x269   : > { %v1752_v23 = vpop.f32.mrf.mxu2 }
 0x26a   : > { %v1753_v55 = vadd.f32 %v1752_v23, %v1688_v34  ;;  %v6013_v23 = vpop.permute.xlu0 %2309 }
 0x26b   : > { %v1625_v46 = vpop.f32.mrf.mxu0  ;;  %v1817_v59 = vpop.f32.mrf.mxu3  ;;  %7569 = vst [vmem:[#allocation56_spill] sm:$0xff] %v6013_v23 }
 0x26c   : > { %v1626_v48 = vadd.f32 %v1625_v46, %v5755_v0  ;;  %v6005_v20 = vadd.f32 %v1817_v59, %v1753_v55  ;;  %v6015_v0 = vld [vmem:[#allocation7 + $0x20] sm:$0xff]  ;;  %v6019_v46 = vpop.permute.xlu2 %2319 }
 0x26d   : > { %v1690_v29 = vpop.f32.mrf.mxu1  ;;  %7570 = vst [vmem:[#allocation57_spill] sm:$0xff] %v6015_v0  ;;  %v6017_v55 = vld [vmem:[#allocation7 + $0x220] sm:$0xff] }
 0x26e   : > { %1864 = vst [vmem:[%s5417_s20 + $0x28] sm:$0xff] %v6005_v20  ;;  %2812 = vmatmul.f32.gmra.mxu0 %v6000_v44  ;;  %3004 = vmatmul.f32.gmra.mxu2 %v6002_v31  ;;  %v1691_v21 = vadd.f32 %v1690_v29, %v1626_v48 }
 0x26f   : > { %7571 = vst [vmem:[#allocation58_spill] sm:$0xff] %v6017_v55 }
 0x270   : > { %7572 = vst [vmem:[#allocation59_spill] sm:$0xff] %v6019_v46  ;;  %v6030_v46 = vld [vmem:[#allocation7 + $0x28] sm:$0xff] }
 0x271   : > { %v1755_v34 = vpop.f32.mrf.mxu2 }
 0x272   : > { %v1756_v14 = vadd.f32 %v1755_v34, %v1691_v21  ;;  %v6028_v21 = vpop.permute.xlu1 %2314 }
 0x273   : > { %v1628_v63 = vpop.f32.mrf.mxu0  ;;  %v1820_v8 = vpop.f32.mrf.mxu3  ;;  %7573 = vst [vmem:[#allocation60_spill] sm:$0xff] %v6028_v21 }
 0x274   : > { %v1629_v59 = vadd.f32 %v1628_v63, %v5769_v18  ;;  %v6022_v44 = vadd.f32 %v1820_v8, %v1756_v14  ;;  %v6032_v18 = vld [vmem:[#allocation7 + $0x228] sm:$0xff]  ;;  %v6034_v8 = vpop.permute.xlu0 %2324  ;;  %v6039_v60 = vpop.permute.xlu2 %2334 }
 0x275   : > { %v1693_v31 = vpop.f32.mrf.mxu1  ;;  %7574 = vst [vmem:[#allocation61_spill] sm:$0xff] %v6034_v8  ;;  %v6045_v8 = vld [vmem:[#allocation7 + $0x30] sm:$0xff] }
 0x276   : > { %1866 = vst [vmem:[%s5417_s20 + $0x38] sm:$0xff] %v6022_v44  ;;  %2815 = vmatmul.f32.gmra.mxu0 %v6015_v0  ;;  %3007 = vmatmul.f32.gmra.mxu2 %v6017_v55  ;;  %v1694_v48 = vadd.f32 %v1693_v31, %v1629_v59 }
 0x277   : > { %7575 = vst [vmem:[#allocation62_spill] sm:$0xff] %v6039_v60 }
 0x278   : > { %7576 = vst [vmem:[#allocation63_spill] sm:$0xff] %v6045_v8 }
 0x279   : > { %v1758_v29 = vpop.f32.mrf.mxu2 }
 0x27a   : > { %v1759_v34 = vadd.f32 %v1758_v29, %v1694_v48 }
 0x27b   : > { %v1631_v23 = vpop.f32.mrf.mxu0  ;;  %v1823_v43 = vpop.f32.mrf.mxu3 }
 0x27c   : > { %v1632_v63 = vadd.f32 %v1631_v23, %v5781_v3  ;;  %v6037_v14 = vadd.f32 %v1823_v43, %v1759_v34  ;;  %v6047_v3 = vld [vmem:[#allocation7 + $0x230] sm:$0xff]  ;;  %v6049_v43 = vpop.permute.xlu1 %2329  ;;  %v6054_v55 = vpop.permute.xlu0 %2339 }
 0x27d   : > { %v1696_v0 = vpop.f32.mrf.mxu1  ;;  %7577 = vst [vmem:[#allocation64_spill] sm:$0xff] %v6047_v3 }
 0x27e   : > { %1868 = vst [vmem:[%s5417_s20 + $0x48] sm:$0xff] %v6037_v14  ;;  %2818 = vmatmul.f32.gmra.mxu0 %v6030_v46  ;;  %3010 = vmatmul.f32.gmra.mxu2 %v6032_v18  ;;  %v1697_v31 = vadd.f32 %v1696_v0, %v1632_v63  ;;  %v1381_v0 = vadd.f32 %v5812_v22, %v5243_v27  ;;  %v6062_v63 = vpop.permute.xlu2 %2349 }
 0x27f   : > { %7578 = vst [vmem:[#allocation65_spill] sm:$0xff] %v6049_v43  ;;  %v6067_v43 = vld [vmem:[#allocation7 + $0x238] sm:$0xff] }
 0x280   : > { %7579 = vst [vmem:[#allocation66_spill] sm:$0xff] %v6054_v55  ;;  %v6065_v55 = vld [vmem:[#allocation7 + $0x38] sm:$0xff] }
 0x281   : > { %v1761_v59 = vpop.f32.mrf.mxu2  ;;  %7580 = vst [vmem:[#allocation67_spill] sm:$0xff] %v6062_v63 }
 0x282   : > { %v1762_v48 = vadd.f32 %v1761_v59, %v1697_v31 }
 0x283   : > { %v1634_v29 = vpop.f32.mrf.mxu0  ;;  %v1826_v21 = vpop.f32.mrf.mxu3 }
 0x284   : > { %v1635_v23 = vadd.f32 %v1634_v29, %v5797_v62  ;;  %v6052_v34 = vadd.f32 %v1826_v21, %v1762_v48  ;;  %v1446_v62 = vadd.f32 %v5816_v41, %v1381_v0  ;;  %v6081_v41 = vpop.permute.xlu0 %2354 }
 0x285   : > { %v1699_v60 = vpop.f32.mrf.mxu1  ;;  %7582 = vst [vmem:[#allocation69_spill] sm:$0xff] %v6081_v41 }
 0x286   : > { %1870 = vst [vmem:[%s5417_s20 + $0x58] sm:$0xff] %v6052_v34  ;;  %2821 = vmatmul.f32.gmra.mxu0 %v6045_v8  ;;  %3013 = vmatmul.f32.gmra.mxu2 %v6047_v3  ;;  %v1700_v31 = vadd.f32 %v1699_v60, %v1635_v23  ;;  %v6072_v3 = vpop.permute.xlu1 %2344  ;;  %v1511_v63 = vadd.f32 %v5828_v30, %v1446_v62  ;;  %v6083_v0 = vpop.permute.xlu2 %2364 }
 0x287   : > { %7581 = vst [vmem:[#allocation68_spill] sm:$0xff] %v6072_v3  ;;  %v1384_v60 = vadd.f32 %v5835_v36, %v5259_v52  ;;  %v6087_v36 = vld [vmem:[#allocation7 + $0x40] sm:$0xff]  ;;  %v7623_v3 = vld [vmem:[#allocation58_spill] sm:$0xff] }
 0x288   : > { %7583 = vst [vmem:[#allocation70_spill] sm:$0xff] %v6083_v0  ;;  %v7621_v0 = vld [vmem:[#allocation24_spill] sm:$0xff] }
 0x289   : > { %v1764_v59 = vpop.f32.mrf.mxu2  ;;  %v1449_v30 = vadd.f32 %v5839_v51, %v1384_v60 }
 0x28a   : > { %v1765_v21 = vadd.f32 %v1764_v59, %v1700_v31  ;;  %v1576_v31 = vadd.f32 %v5837_v47, %v1511_v63 }
 0x28b   : > { %v1637_v48 = vpop.f32.mrf.mxu0  ;;  %v1829_v29 = vpop.f32.mrf.mxu3 }
 0x28c   : > { %v1638_v27 = vadd.f32 %v1637_v48, %v5814_v33  ;;  %v6070_v22 = vadd.f32 %v1829_v29, %v1765_v21  ;;  %v6089_v21 = vld [vmem:[#allocation7 + $0x240] sm:$0xff]  ;;  %v6102_v60 = vpop.permute.xlu0 %2369 }
 0x28d   : > { %v1702_v8 = vpop.f32.mrf.mxu1  ;;  %7585 = vst [vmem:[#allocation72_spill] sm:$0xff] %v6102_v60 }
 0x28e   : > { %1872 = vst [vmem:[%s5417_s20 + $0x68] sm:$0xff] %v6070_v22  ;;  %2824 = vmatmul.f32.gmra.mxu0 %v6065_v55  ;;  %3016 = vmatmul.f32.gmra.mxu2 %v6067_v43  ;;  %v1703_v33 = vadd.f32 %v1702_v8, %v1638_v27  ;;  %v1514_v8 = vadd.f32 %v5849_v37, %v1449_v30  ;;  %v6100_v47 = vpop.permute.xlu1 %2359  ;;  %v6108_v30 = vld [vmem:[#allocation7 + $0x248] sm:$0xff] }
 0x28f   : > { %v1387_v27 = vadd.f32 %v5856_v56, %v5280_v25  ;;  %7584 = vst [vmem:[#allocation71_spill] sm:$0xff] %v6100_v47  ;;  %v6106_v56 = vld [vmem:[#allocation7 + $0x48] sm:$0xff]  ;;  %v7622_v47 = vld [vmem:[#allocation57_spill] sm:$0xff] }
 0x291   : > { %v1767_v23 = vpop.f32.mrf.mxu2  ;;  %v1452_v37 = vadd.f32 %v5862_v42, %v1387_v27 }
 0x292   : > { %v1768_v59 = vadd.f32 %v1767_v23, %v1703_v33  ;;  %v1579_v33 = vadd.f32 %v5858_v1, %v1514_v8  ;;  %v1390_v1 = vadd.f32 %v5874_v12, %v5303_v61  ;;  %v6127_v61 = vld [vmem:[#allocation7 + $0x250] sm:$0xff] }
 0x293   : > { %v1640_v62 = vpop.f32.mrf.mxu0  ;;  %v1832_v52 = vpop.f32.mrf.mxu3 }
 0x294   : > { %v1641_v48 = vadd.f32 %v1640_v62, %v1576_v31  ;;  %v6091_v29 = vadd.f32 %v1832_v52, %v1768_v59  ;;  %v6110_v59 = vpop.permute.xlu2 %2379  ;;  %v6129_v12 = vpop.permute.xlu0 %2384 }
 0x295   : > { %v1705_v41 = vpop.f32.mrf.mxu1  ;;  %7586 = vst [vmem:[#allocation73_spill] sm:$0xff] %v6110_v59 }
 0x296   : > { %1874 = vst [vmem:[%s5417_s20 + $0x78] sm:$0xff] %v6091_v29  ;;  %2827 = vmatmul.f32.gmra.mxu0 %v6087_v36  ;;  %3019 = vmatmul.f32.gmra.mxu2 %v6089_v21  ;;  %v1706_v51 = vadd.f32 %v1705_v41, %v1641_v48  ;;  %v1517_v48 = vadd.f32 %v5867_v4, %v1452_v37  ;;  %v6121_v27 = vpop.permute.xlu1 %2374 }
 0x297   : > { %7587 = vst [vmem:[#allocation74_spill] sm:$0xff] %v6121_v27  ;;  %v7619_v27 = vld [vmem:[#allocation54_spill] sm:$0xff] }
 0x298   : > { %7588 = vst [vmem:[#allocation75_spill] sm:$0xff] %v6129_v12  ;;  %v7618_v12 = vld [vmem:[#allocation53_spill] sm:$0xff] }
 0x299   : > { %v1770_v63 = vpop.f32.mrf.mxu2 }
 0x29a   : > { %v1771_v23 = vadd.f32 %v1770_v63, %v1706_v51  ;;  %v1582_v51 = vadd.f32 %v5876_v54, %v1517_v48  ;;  %v1455_v63 = vadd.f32 %v5880_v13, %v1390_v1  ;;  %v1393_v54 = vadd.f32 %v5892_v35, %v5322_v32 }
 0x29b   : > { %v1643_v31 = vpop.f32.mrf.mxu0  ;;  %v1835_v25 = vpop.f32.mrf.mxu3 }
 0x29c   : > { %v1644_v62 = vadd.f32 %v1643_v31, %v1579_v33  ;;  %v6112_v52 = vadd.f32 %v1835_v25, %v1771_v23  ;;  %v6125_v23 = vld [vmem:[#allocation7 + $0x50] sm:$0xff]  ;;  %v1520_v59 = vadd.f32 %v5887_v24, %v1455_v63  ;;  %v6144_v24 = vld [vmem:[#allocation7 + $0x58] sm:$0xff] }
 0x29d   : > { %v1708_v41 = vpop.f32.mrf.mxu1  ;;  %v6146_v63 = vld [vmem:[#allocation7 + $0x258] sm:$0xff] }
 0x29e   : > { %1876 = vst [vmem:[%s5417_s20 + $0x88] sm:$0xff] %v6112_v52  ;;  %2830 = vmatmul.f32.gmra.mxu0 %v6106_v56  ;;  %3022 = vmatmul.f32.gmra.mxu2 %v6108_v30  ;;  %v1709_v42 = vadd.f32 %v1708_v41, %v1644_v62  ;;  %v6133_v41 = vpop.permute.xlu2 %2394  ;;  %v1585_v1 = vadd.f32 %v5894_v38, %v1520_v59  ;;  %v6148_v32 = vpop.permute.xlu1 %2389 }
 0x29f   : > { %7589 = vst [vmem:[#allocation76_spill] sm:$0xff] %v6133_v41  ;;  %v1396_v38 = vadd.f32 %v5912_v2, %v5343_v9  ;;  %v6167_v9 = vld [vmem:[#allocation7 + $0x260] sm:$0xff] }
 0x2a0   : > { %7590 = vst [vmem:[#allocation77_spill] sm:$0xff] %v6148_v32  ;;  %v7617_v32 = vld [vmem:[#allocation22_spill] sm:$0xff] }
 0x2a1   : > { %v1773_v8 = vpop.f32.mrf.mxu2 }
 0x2a2   : > { %v1774_v33 = vadd.f32 %v1773_v8, %v1709_v42  ;;  %v1458_v42 = vadd.f32 %v5898_v28, %v1393_v54 }
 0x2a3   : > { %v1646_v4 = vpop.f32.mrf.mxu0  ;;  %v1838_v37 = vpop.f32.mrf.mxu3 }
 0x2a4   : > { %v1647_v31 = vadd.f32 %v1646_v4, %v1582_v51  ;;  %v6131_v25 = vadd.f32 %v1838_v37, %v1774_v33 }
 0x2a5   : > { %v1711_v62 = vpop.f32.mrf.mxu1 }
 0x2a6   : > { %1878 = vst [vmem:[%s5417_s20 + $0x98] sm:$0xff] %v6131_v25  ;;  %2833 = vmatmul.f32.gmra.mxu0 %v6125_v23  ;;  %3025 = vmatmul.f32.gmra.mxu2 %v6127_v61  ;;  %v1712_v13 = vadd.f32 %v1711_v62, %v1647_v31  ;;  %v6152_v31 = vpop.permute.xlu0 %2399  ;;  %v1523_v62 = vadd.f32 %v5907_v7, %v1458_v42  ;;  %v6161_v28 = vpop.permute.xlu2 %2409 }
 0x2a7   : > { %7591 = vst [vmem:[#allocation78_spill] sm:$0xff] %v6152_v31  ;;  %v6171_v31 = vpop.permute.xlu1 %2404 }
 0x2a8   : > { %7592 = vst [vmem:[#allocation79_spill] sm:$0xff] %v6161_v28  ;;  %v7615_v28 = vld [vmem:[#allocation48_spill] sm:$0xff] }
 0x2a9   : > { %v1776_v48 = vpop.f32.mrf.mxu2  ;;  %7593 = vst [vmem:[#allocation80_spill] sm:$0xff] %v6171_v31  ;;  %v7616_v31 = vld [vmem:[#allocation49_spill] sm:$0xff] }
 0x2aa   : > { %v1777_v8 = vadd.f32 %v1776_v48, %v1712_v13  ;;  %v1588_v13 = vadd.f32 %v5914_v40, %v1523_v62  ;;  %v1461_v48 = vadd.f32 %v5916_v58, %v1396_v38  ;;  %v1399_v40 = vadd.f32 %v5929_v16, %v5366_v50  ;;  %v6186_v16 = vld [vmem:[#allocation7 + $0x68] sm:$0xff] }
 0x2ab   : > { %v1649_v51 = vpop.f32.mrf.mxu0  ;;  %v1841_v33 = vpop.f32.mrf.mxu3 }
 0x2ac   : > { %v1650_v35 = vadd.f32 %v1649_v51, %v1585_v1  ;;  %v6150_v4 = vadd.f32 %v1841_v33, %v1777_v8  ;;  %v6165_v8 = vld [vmem:[#allocation7 + $0x60] sm:$0xff] }
 0x2ad   : > { %v1714_v37 = vpop.f32.mrf.mxu1 }
 0x2ae   : > { %1880 = vst [vmem:[%s5417_s20 + $0xa8] sm:$0xff] %v6150_v4  ;;  %2836 = vmatmul.f32.gmra.mxu0 %v6144_v24  ;;  %3028 = vmatmul.f32.gmra.mxu2 %v6146_v63  ;;  %v1715_v59 = vadd.f32 %v1714_v37, %v1650_v35  ;;  %v1526_v35 = vadd.f32 %v5922_v53, %v1461_v48  ;;  %v6180_v58 = vpop.permute.xlu0 %2414  ;;  %v6182_v38 = vpop.permute.xlu2 %2424  ;;  %v6188_v48 = vld [vmem:[#allocation7 + $0x268] sm:$0xff] }
 0x2af   : > { %7594 = vst [vmem:[#allocation81_spill] sm:$0xff] %v6180_v58  ;;  %v1464_v53 = vadd.f32 %v5933_v19, %v1399_v40  ;;  %v7614_v58 = vld [vmem:[#allocation23_spill] sm:$0xff] }
 0x2b0   : > { %7595 = vst [vmem:[#allocation82_spill] sm:$0xff] %v6182_v38 }
 0x2b1   : > { %v1779_v54 = vpop.f32.mrf.mxu2 }
 0x2b2   : > { %v1780_v1 = vadd.f32 %v1779_v54, %v1715_v59  ;;  %v1591_v59 = vadd.f32 %v5931_v6, %v1526_v35  ;;  %v6199_v6 = vpop.permute.xlu1 %2419 }
 0x2b3   : > { %v1652_v7 = vpop.f32.mrf.mxu0  ;;  %v1844_v42 = vpop.f32.mrf.mxu3  ;;  %7596 = vst [vmem:[#allocation83_spill] sm:$0xff] %v6199_v6 }
 0x2b4   : > { %v1653_v2 = vadd.f32 %v1652_v7, %v1588_v13  ;;  %v6169_v51 = vadd.f32 %v1844_v42, %v1780_v1 }
 0x2b5   : > { %v1717_v33 = vpop.f32.mrf.mxu1 }
 0x2b6   : > { %1882 = vst [vmem:[%s5417_s20 + $0xb8] sm:$0xff] %v6169_v51  ;;  %2839 = vmatmul.f32.gmra.mxu0 %v6165_v8  ;;  %3031 = vmatmul.f32.gmra.mxu2 %v6167_v9  ;;  %v1718_v37 = vadd.f32 %v1717_v33, %v1653_v2  ;;  %v1529_v2 = vadd.f32 %v5937_v49, %v1464_v53  ;;  %v6201_v40 = vpop.permute.xlu0 %2429  ;;  %v6207_v53 = vld [vmem:[#allocation7 + $0x270] sm:$0xff] }
 0x2b7   : > { %v1402_v33 = vadd.f32 %v5941_v17, %v5387_v26  ;;  %7597 = vst [vmem:[#allocation84_spill] sm:$0xff] %v6201_v40  ;;  %v6205_v17 = vld [vmem:[#allocation7 + $0x70] sm:$0xff]  ;;  %v7613_v40 = vld [vmem:[#allocation44_spill] sm:$0xff] }
 0x2b9   : > { %v1782_v62 = vpop.f32.mrf.mxu2  ;;  %v1467_v49 = vadd.f32 %v5947_v15, %v1402_v33 }
 0x2ba   : > { %v1783_v54 = vadd.f32 %v1782_v62, %v1718_v37  ;;  %v1594_v37 = vadd.f32 %v5943_v10, %v1529_v2 }
 0x2bb   : > { %v1655_v13 = vpop.f32.mrf.mxu0  ;;  %v1847_v50 = vpop.f32.mrf.mxu3 }
 0x2bc   : > { %v1656_v1 = vadd.f32 %v1655_v13, %v1591_v59  ;;  %v6190_v7 = vadd.f32 %v1847_v50, %v1783_v54  ;;  %v6209_v50 = vpop.permute.xlu2 %2439 }
 0x2bd   : > { %v1720_v42 = vpop.f32.mrf.mxu1  ;;  %7598 = vst [vmem:[#allocation85_spill] sm:$0xff] %v6209_v50  ;;  %v6229_v50 = vld [vmem:[#allocation7 + $0x80] sm:$0xff] }
 0x2be   : > { %1884 = vst [vmem:[%s5417_s20 + $0xc8] sm:$0xff] %v6190_v7  ;;  %2842 = vmatmul.f32.gmra.mxu0 %v6186_v16  ;;  %3034 = vmatmul.f32.gmra.mxu2 %v6188_v48  ;;  %v1721_v19 = vadd.f32 %v1720_v42, %v1656_v1  ;;  %v1532_v1 = vadd.f32 %v5949_v39, %v1467_v49  ;;  %v6215_v42 = vpop.permute.xlu1 %2434 }
 0x2bf   : > { %7599 = vst [vmem:[#allocation86_spill] sm:$0xff] %v6215_v42  ;;  %v7612_v42 = vld [vmem:[#allocation43_spill] sm:$0xff] }
 0x2c0   : > { %v1597_v2 = vadd.f32 %v5953_v11, %v1532_v1 }
 0x2c1   : > { %v1785_v35 = vpop.f32.mrf.mxu2 }
 0x2c2   : > { %v1786_v62 = vadd.f32 %v1785_v35, %v1721_v19 }
 0x2c3   : > { %v1658_v59 = vpop.f32.mrf.mxu0  ;;  %v1850_v26 = vpop.f32.mrf.mxu3 }
 0x2c4   : > { %v1659_v54 = vadd.f32 %v1658_v59, %v1594_v37  ;;  %v1851_v13 = vadd.f32 %v1850_v26, %v1786_v62  ;;  %v6218_v37 = vld [vmem:[#allocation7 + $0x78] sm:$0xff]  ;;  %v6222_v59 = vpop.permute.xlu0 %2444 }
 0x2c5   : > { %v1723_v38 = vpop.f32.mrf.mxu1  ;;  %v6220_v62 = vld [vmem:[#allocation7 + $0x278] sm:$0xff]  ;;  %7600 = vst [vmem:[#allocation87_spill] sm:$0xff] %v6222_v59 }
 0x2c6   : > { %1886 = vst [vmem:[%s5417_s20 + $0xd8] sm:$0xff] %v1851_v13  ;;  %2845 = vmatmul.f32.gmra.mxu0 %v6205_v17  ;;  %3037 = vmatmul.f32.gmra.mxu2 %v6207_v53  ;;  %v1724_v15 = vadd.f32 %v1723_v38, %v1659_v54  ;;  %v6227_v38 = vpop.permute.xlu2 %2454 }
 0x2c7   : > { %7601 = vst [vmem:[#allocation88_spill] sm:$0xff] %v6227_v38 }
 0x2c9   : > { %v1788_v10 = vpop.f32.mrf.mxu2 }
 0x2ca   : > { %v1789_v33 = vadd.f32 %v1788_v10, %v1724_v15 }
 0x2cb   : > { %v1661_v19 = vpop.f32.mrf.mxu0  ;;  %v1853_v35 = vpop.f32.mrf.mxu3 }
 0x2cc   : > { %v1662_v39 = vadd.f32 %v1661_v19, %v1597_v2  ;;  %v1854_v49 = vadd.f32 %v1853_v35, %v1789_v33  ;;  %v6231_v2 = vld [vmem:[#allocation7 + $0x280] sm:$0xff]  ;;  %v6234_v35 = vpop.permute.xlu1 %2449 }
 0x2cd   : > { %v1726_v26 = vpop.f32.mrf.mxu1  ;;  %7602 = vst [vmem:[#allocation89_spill] sm:$0xff] %v6234_v35  ;;  %v7611_v35 = vld [vmem:[#allocation21_spill] sm:$0xff] }
 0x2ce   : > { %1888 = vst [vmem:[%s5417_s20 + $0xe8] sm:$0xff] %v1854_v49  ;;  %2848 = vmatmul.f32.gmra.mxu0 %v6218_v37  ;;  %3040 = vmatmul.f32.gmra.mxu2 %v6220_v62  ;;  %v1727_v11 = vadd.f32 %v1726_v26, %v1662_v39  ;;  %v6239_v39 = vpop.permute.xlu0 %2459  ;;  %v6246_v26 = vpop.permute.xlu2 %2469 }
 0x2cf   : > { %7603 = vst [vmem:[#allocation90_spill] sm:$0xff] %v6239_v39 }
 0x2d1   : > { %v1791_v54 = vpop.f32.mrf.mxu2 }
 0x2d2   : > { %v1792_v1 = vadd.f32 %v1791_v54, %v1727_v11 }
 0x2d3   : > { %v1856_v15 = vpop.f32.mrf.mxu3  ;;  %v2804_v10 = vpop.f32.mrf.mxu0 }
 0x2d4   : > { %v1857_v33 = vadd.f32 %v1856_v15, %v1792_v1  ;;  %v2805_v19 = vadd.f32 %v2804_v10, %v5794_v57  ;;  %v6249_v15 = vld [vmem:[#allocation7 + $0x88] sm:$0xff] }
 0x2d5   : > { %v6251_v10 = vld [vmem:[#allocation7 + $0x288] sm:$0xff] }
 0x2d6   : > { %1890 = vst [vmem:[%s5417_s20 + $0xf8] sm:$0xff] %v1857_v33  ;;  %v3589_v59 = vmax.f32 %v2805_v19, 0.0  ;;  %2851 = vmatmul.f32.gmra.mxu0 %v6229_v50  ;;  %3043 = vmatmul.f32.gmra.mxu2 %v6231_v2  ;;  %v7604_v19 = vld [vmem:[#allocation17_spill] sm:$0xff] }
 0x2d7   : > { %3188 = vmatpush.msra.mxu1 %v1857_v33  ;;  %4327 = vmatpush.msra.mxu3 %v1857_v33 }
 0x2d8   : > { %3845 = vst [vmem:[%s6243_s27] sm:$0xff] %v3589_v59  ;;  %v6259_v59 = vpop.permute.xlu1 %2464 }
 0x2d9   : > { %3189 = vmatpush.msra.mxu1 %v1854_v49  ;;  %4328 = vmatpush.msra.mxu3 %v1854_v49  ;;  %v2996_v11 = vpop.f32.mrf.mxu2  ;;  %7605 = vst [vmem:[#allocation17_spill] sm:$0xff] %v6259_v59  ;;  %v7610_v59 = vld [vmem:[#allocation40_spill] sm:$0xff] }
 0x2da   : > { %v2997_v54 = vadd.f32 %v2996_v11, %v6246_v26 }
 0x2db   : > { %3190 = vmatpush.msra.mxu1 %v1851_v13  ;;  %4329 = vmatpush.msra.mxu3 %v1851_v13  ;;  %v2807_v1 = vpop.f32.mrf.mxu0  ;;  %v6264_v13 = vpop.permute.xlu0 %2474 }
 0x2dc   : > { %v3717_v33 = vmax.f32 %v2997_v54, 0.0  ;;  %v2808_v39 = vadd.f32 %v2807_v1, %v7604_v19  ;;  %v6271_v54 = vld [vmem:[#allocation7 + $0x90] sm:$0xff] }
 0x2dd   : > { %3191 = vmatpush.msra.mxu1 %v6190_v7  ;;  %4330 = vmatpush.msra.mxu3 %v6190_v7 }
 0x2de   : > { %3973 = vst [vmem:[%s6243_s27 + $0x400] sm:$0xff] %v3717_v33  ;;  %v3591_v49 = vmax.f32 %v2808_v39, 0.0  ;;  %2854 = vmatmul.f32.gmra.mxu0 %v6249_v15  ;;  %3046 = vmatmul.f32.gmra.mxu2 %v6251_v10  ;;  %v7606_v33 = vld [vmem:[#allocation18_spill] sm:$0xff] }
 0x2df   : > { %3192 = vmatpush.msra.mxu1 %v6169_v51  ;;  %4331 = vmatpush.msra.mxu3 %v6169_v51  ;;  %v6273_v51 = vld [vmem:[#allocation7 + $0x290] sm:$0xff] }
 0x2e0   : > { %3847 = vst [vmem:[%s6243_s27 + $0x10] sm:$0xff] %v3591_v49 }
 0x2e1   : > { %3193 = vmatpush.msra.mxu1 %v6150_v4  ;;  %4332 = vmatpush.msra.mxu3 %v6150_v4  ;;  %v2999_v7 = vpop.f32.mrf.mxu2 }
 0x2e2   : > { %v3000_v39 = vadd.f32 %v2999_v7, %v6264_v13 }
 0x2e3   : > { %3194 = vmatpush.msra.mxu1 %v6131_v25  ;;  %4333 = vmatpush.msra.mxu3 %v6131_v25  ;;  %v2810_v11 = vpop.f32.mrf.mxu0  ;;  %v6284_v25 = vpop.permute.xlu1 %2479 }
 0x2e4   : > { %v3719_v1 = vmax.f32 %v3000_v39, 0.0  ;;  %v2811_v49 = vadd.f32 %v2810_v11, %v7606_v33  ;;  %v6291_v11 = vld [vmem:[#allocation7 + $0x98] sm:$0xff] }
 0x2e5   : > { %3195 = vmatpush.msra.mxu1 %v6112_v52  ;;  %4334 = vmatpush.msra.mxu3 %v6112_v52 }
 0x2e6   : > { %3975 = vst [vmem:[%s6243_s27 + $0x410] sm:$0xff] %v3719_v1  ;;  %v3593_v4 = vmax.f32 %v2811_v49, 0.0  ;;  %2857 = vmatmul.f32.gmra.mxu0 %v6271_v54  ;;  %3049 = vmatmul.f32.gmra.mxu2 %v6273_v51  ;;  %v7607_v49 = vld [vmem:[#allocation20_spill] sm:$0xff] }
 0x2e7   : > { %3196 = vmatpush.msra.mxu1 %v6091_v29  ;;  %4335 = vmatpush.msra.mxu3 %v6091_v29  ;;  %v6293_v29 = vld [vmem:[#allocation7 + $0x298] sm:$0xff] }
 0x2e8   : > { %3849 = vst [vmem:[%s6243_s27 + $0x20] sm:$0xff] %v3593_v4 }
 0x2e9   : > { %3197 = vmatpush.msra.mxu1 %v6070_v22  ;;  %4336 = vmatpush.msra.mxu3 %v6070_v22  ;;  %v3002_v7 = vpop.f32.mrf.mxu2 }
 0x2ea   : > { %v3003_v52 = vadd.f32 %v3002_v7, %v6284_v25 }
 0x2eb   : > { %3198 = vmatpush.msra.mxu1 %v6052_v34  ;;  %4337 = vmatpush.msra.mxu3 %v6052_v34  ;;  %v2813_v39 = vpop.f32.mrf.mxu0  ;;  %v6304_v34 = vpop.permute.xlu2 %2484 }
 0x2ec   : > { %v3721_v1 = vmax.f32 %v3003_v52, 0.0  ;;  %v2814_v4 = vadd.f32 %v2813_v39, %v7607_v49 }
 0x2ed   : > { %3199 = vmatpush.msra.mxu1 %v6037_v14  ;;  %4338 = vmatpush.msra.mxu3 %v6037_v14 }
 0x2ee   : > { %3977 = vst [vmem:[%s6243_s27 + $0x420] sm:$0xff] %v3721_v1  ;;  %v3595_v22 = vmax.f32 %v2814_v4, 0.0  ;;  %2860 = vmatmul.f32.gmra.mxu0 %v6291_v11  ;;  %3052 = vmatmul.f32.gmra.mxu2 %v6293_v29  ;;  %v7608_v1 = vld [vmem:[#allocation19_spill] sm:$0xff]  ;;  %v6312_v4 = vld [vmem:[#allocation7 + $0xa0] sm:$0xff] }
 0x2ef   : > { %3200 = vmatpush.msra.mxu1 %v6022_v44  ;;  %4339 = vmatpush.msra.mxu3 %v6022_v44 }
 0x2f0   : > { %3851 = vst [vmem:[%s6243_s27 + $0x30] sm:$0xff] %v3595_v22  ;;  %v6314_v22 = vld [vmem:[#allocation7 + $0x2a0] sm:$0xff] }
 0x2f1   : > { %3201 = vmatpush.msra.mxu1 %v6005_v20  ;;  %4340 = vmatpush.msra.mxu3 %v6005_v20  ;;  %v3005_v7 = vpop.f32.mrf.mxu2 }
 0x2f2   : > { %v3006_v14 = vadd.f32 %v3005_v7, %v6304_v34  ;;  %v7609_v7 = vld [vmem:[#allocation39_spill] sm:$0xff] }
 0x2f3   : > { %3202 = vmatpush.msra.mxu1 %v5988_v45  ;;  %4341 = vmatpush.msra.mxu3 %v5988_v45  ;;  %v2816_v52 = vpop.f32.mrf.mxu0  ;;  %v6324_v45 = vpop.permute.xlu0 %2489 }
 0x2f4   : > { %v3723_v39 = vmax.f32 %v3006_v14, 0.0  ;;  %v2817_v44 = vadd.f32 %v2816_v52, %v7608_v1 }
 0x2f5   : > { %3203 = vmatpush.msra.mxu1 %v5973_v5  ;;  %4342 = vmatpush.msra.mxu3 %v5973_v5 }
 0x2f6   : > { %3979 = vst [vmem:[%s6243_s27 + $0x430] sm:$0xff] %v3723_v39  ;;  %v3597_v20 = vmax.f32 %v2817_v44, 0.0  ;;  %3204 = vmatmul.f32.vlgmr.msra.gmra.mxu1 %v7609_v7  ;;  %3396 = vmatmul.f32.vlgmr.msra.gmra.mxu3 %v7610_v59  ;;  %v6328_v44 = vld [vmem:[#allocation7 + $0xa8] sm:$0xff] }
 0x2f7   : > { %2863 = vmatmul.f32.gmra.mxu0 %v6312_v4  ;;  %3055 = vmatmul.f32.gmra.mxu2 %v6314_v22  ;;  %v6330_v7 = vld [vmem:[#allocation7 + $0x2a8] sm:$0xff] }
 0x2f8   : > { %3853 = vst [vmem:[%s6243_s27 + $0x40] sm:$0xff] %v3597_v20  ;;  %v6338_v20 = vpop.permute.xlu1 %2494 }
 0x2f9   : > { %v3008_v14 = vpop.f32.mrf.mxu2 }
 0x2fa   : > { %v3009_v52 = vadd.f32 %v3008_v14, %v6324_v45 }
 0x2fb   : > { %v2819_v38 = vpop.f32.mrf.mxu0 }
 0x2fc   : > { %v3725_v5 = vmax.f32 %v3009_v52, 0.0  ;;  %v2820_v39 = vadd.f32 %v2819_v38, %v7611_v35 }
 0x2fe   : > { %3981 = vst [vmem:[%s6243_s27 + $0x440] sm:$0xff] %v3725_v5  ;;  %v3599_v59 = vmax.f32 %v2820_v39, 0.0  ;;  %3207 = vmatmul.f32.gmra.mxu1 %v7612_v42  ;;  %3399 = vmatmul.f32.gmra.mxu3 %v7613_v40  ;;  %v6342_v39 = vld [vmem:[#allocation7 + $0xb0] sm:$0xff] }
 0x2ff   : > { %2866 = vmatmul.f32.gmra.mxu0 %v6328_v44  ;;  %3058 = vmatmul.f32.gmra.mxu2 %v6330_v7  ;;  %v6344_v42 = vld [vmem:[#allocation7 + $0x2b0] sm:$0xff] }
 0x300   : > { %3855 = vst [vmem:[%s6243_s27 + $0x50] sm:$0xff] %v3599_v59  ;;  %v6352_v59 = vpop.permute.xlu2 %2499 }
 0x301   : > { %v3011_v38 = vpop.f32.mrf.mxu2 }
 0x302   : > { %v3012_v14 = vadd.f32 %v3011_v38, %v6338_v20 }
 0x303   : > { %v2822_v52 = vpop.f32.mrf.mxu0 }
 0x304   : > { %v3727_v6 = vmax.f32 %v3012_v14, 0.0  ;;  %v2823_v5 = vadd.f32 %v2822_v52, %v7614_v58 }
 0x306   : > { %3983 = vst [vmem:[%s6243_s27 + $0x450] sm:$0xff] %v3727_v6  ;;  %v3601_v40 = vmax.f32 %v2823_v5, 0.0  ;;  %3210 = vmatmul.f32.gmra.mxu1 %v7615_v28  ;;  %3402 = vmatmul.f32.gmra.mxu3 %v7616_v31  ;;  %v6356_v5 = vld [vmem:[#allocation7 + $0xb8] sm:$0xff] }
 0x307   : > { %2869 = vmatmul.f32.gmra.mxu0 %v6342_v39  ;;  %3061 = vmatmul.f32.gmra.mxu2 %v6344_v42  ;;  %v6358_v28 = vld [vmem:[#allocation7 + $0x2b8] sm:$0xff] }
 0x308   : > { %3857 = vst [vmem:[%s6243_s27 + $0x60] sm:$0xff] %v3601_v40  ;;  %v6366_v40 = vpop.permute.xlu0 %2504 }
 0x309   : > { %v3014_v38 = vpop.f32.mrf.mxu2  ;;  %7620 = vst [vmem:[#allocation18_spill] sm:$0xff] %v6366_v40 }
 0x30a   : > { %v3015_v14 = vadd.f32 %v3014_v38, %v6352_v59 }
 0x30b   : > { %v2825_v52 = vpop.f32.mrf.mxu0 }
 0x30c   : > { %v3729_v41 = vmax.f32 %v3015_v14, 0.0  ;;  %v2826_v6 = vadd.f32 %v2825_v52, %v7617_v32 }
 0x30e   : > { %3985 = vst [vmem:[%s6243_s27 + $0x460] sm:$0xff] %v3729_v41  ;;  %v3603_v31 = vmax.f32 %v2826_v6, 0.0  ;;  %3213 = vmatmul.f32.gmra.mxu1 %v7618_v12  ;;  %3405 = vmatmul.f32.gmra.mxu3 %v7619_v27  ;;  %v6370_v6 = vld [vmem:[#allocation7 + $0xc0] sm:$0xff] }
 0x30f   : > { %2872 = vmatmul.f32.gmra.mxu0 %v6356_v5  ;;  %3064 = vmatmul.f32.gmra.mxu2 %v6358_v28  ;;  %v6372_v12 = vld [vmem:[#allocation7 + $0x2c0] sm:$0xff] }
 0x310   : > { %3859 = vst [vmem:[%s6243_s27 + $0x70] sm:$0xff] %v3603_v31  ;;  %v6380_v31 = vpop.permute.xlu1 %2509 }
 0x311   : > { %v3017_v38 = vpop.f32.mrf.mxu2  ;;  %7624 = vst [vmem:[#allocation20_spill] sm:$0xff] %v6380_v31 }
 0x312   : > { %v3018_v14 = vadd.f32 %v3017_v38, %v6366_v40  ;;  %v7625_v40 = vld [vmem:[#allocation26_spill] sm:$0xff] }
 0x313   : > { %v2828_v52 = vpop.f32.mrf.mxu0 }
 0x314   : > { %v3731_v60 = vmax.f32 %v3018_v14, 0.0  ;;  %v2829_v41 = vadd.f32 %v2828_v52, %v7621_v0 }
 0x316   : > { %3987 = vst [vmem:[%s6243_s27 + $0x470] sm:$0xff] %v3731_v60  ;;  %v3605_v27 = vmax.f32 %v2829_v41, 0.0  ;;  %3216 = vmatmul.f32.gmra.mxu1 %v7622_v47  ;;  %3408 = vmatmul.f32.gmra.mxu3 %v7623_v3  ;;  %v6384_v41 = vld [vmem:[#allocation7 + $0xc8] sm:$0xff] }
 0x317   : > { %2875 = vmatmul.f32.gmra.mxu0 %v6370_v6  ;;  %3067 = vmatmul.f32.gmra.mxu2 %v6372_v12  ;;  %7626 = vst [vmem:[#allocation19_spill] sm:$0xff] %v6384_v41  ;;  %v6386_v47 = vld [vmem:[#allocation7 + $0x2c8] sm:$0xff] }
 0x318   : > { %3861 = vst [vmem:[%s6243_s27 + $0x80] sm:$0xff] %v3605_v27  ;;  %v6394_v27 = vpop.permute.xlu2 %2514 }
 0x319   : > { %v3020_v38 = vpop.f32.mrf.mxu2  ;;  %7627 = vst [vmem:[#allocation39_spill] sm:$0xff] %v6386_v47 }
 0x31a   : > { %v3021_v14 = vadd.f32 %v3020_v38, %v6380_v31  ;;  %7628 = vst [vmem:[#allocation40_spill] sm:$0xff] %v6394_v27  ;;  %v7629_v31 = vld [vmem:[#allocation25_spill] sm:$0xff] }
 0x31b   : > { %v2831_v52 = vpop.f32.mrf.mxu0 }
 0x31c   : > { %v3733_v0 = vmax.f32 %v3021_v14, 0.0  ;;  %v2832_v60 = vadd.f32 %v2831_v52, %v7625_v40 }
 0x31e   : > { %3989 = vst [vmem:[%s6243_s27 + $0x480] sm:$0xff] %v3733_v0  ;;  %v3607_v3 = vmax.f32 %v2832_v60, 0.0  ;;  %3219 = vmatmul.f32.gmra.mxu1 %v6030_v46  ;;  %3411 = vmatmul.f32.gmra.mxu3 %v6032_v18  ;;  %v6398_v60 = vld [vmem:[#allocation7 + $0xd0] sm:$0xff] }
 0x31f   : > { %2878 = vmatmul.f32.gmra.mxu0 %v6384_v41  ;;  %3070 = vmatmul.f32.gmra.mxu2 %v6386_v47  ;;  %v6400_v46 = vld [vmem:[#allocation7 + $0x2d0] sm:$0xff]  ;;  %v7631_v47 = vld [vmem:[#allocation64_spill] sm:$0xff] }
 0x320   : > { %3863 = vst [vmem:[%s6243_s27 + $0x90] sm:$0xff] %v3607_v3  ;;  %v7630_v41 = vld [vmem:[#allocation63_spill] sm:$0xff]  ;;  %v6408_v3 = vpop.permute.xlu0 %2519 }
 0x321   : > { %v3023_v38 = vpop.f32.mrf.mxu2  ;;  %7632 = vst [vmem:[#allocation21_spill] sm:$0xff] %v6408_v3 }
 0x322   : > { %v3024_v14 = vadd.f32 %v3023_v38, %v6394_v27  ;;  %v7633_v27 = vld [vmem:[#allocation27_spill] sm:$0xff] }
 0x323   : > { %v2834_v52 = vpop.f32.mrf.mxu0 }
 0x324   : > { %v3735_v40 = vmax.f32 %v3024_v14, 0.0  ;;  %v2835_v0 = vadd.f32 %v2834_v52, %v7629_v31 }
 0x326   : > { %3991 = vst [vmem:[%s6243_s27 + $0x490] sm:$0xff] %v3735_v40  ;;  %v3609_v18 = vmax.f32 %v2835_v0, 0.0  ;;  %3222 = vmatmul.f32.gmra.mxu1 %v7630_v41  ;;  %3414 = vmatmul.f32.gmra.mxu3 %v7631_v47  ;;  %v6412_v0 = vld [vmem:[#allocation7 + $0xd8] sm:$0xff] }
 0x327   : > { %2881 = vmatmul.f32.gmra.mxu0 %v6398_v60  ;;  %3073 = vmatmul.f32.gmra.mxu2 %v6400_v46  ;;  %v6414_v41 = vld [vmem:[#allocation7 + $0x2d8] sm:$0xff] }
 0x328   : > { %3865 = vst [vmem:[%s6243_s27 + $0xa0] sm:$0xff] %v3609_v18  ;;  %v6422_v18 = vpop.permute.xlu1 %2524 }
 0x329   : > { %v3026_v38 = vpop.f32.mrf.mxu2  ;;  %7634 = vst [vmem:[#allocation43_spill] sm:$0xff] %v6422_v18 }
 0x32a   : > { %v3027_v14 = vadd.f32 %v3026_v38, %v6408_v3  ;;  %v7635_v3 = vld [vmem:[#allocation29_spill] sm:$0xff] }
 0x32b   : > { %v2837_v52 = vpop.f32.mrf.mxu0 }
 0x32c   : > { %v3737_v31 = vmax.f32 %v3027_v14, 0.0  ;;  %v2838_v40 = vadd.f32 %v2837_v52, %v7633_v27 }
 0x32e   : > { %3993 = vst [vmem:[%s6243_s27 + $0x4a0] sm:$0xff] %v3737_v31  ;;  %v3611_v47 = vmax.f32 %v2838_v40, 0.0  ;;  %3225 = vmatmul.f32.gmra.mxu1 %v6065_v55  ;;  %3417 = vmatmul.f32.gmra.mxu3 %v6067_v43  ;;  %v6426_v40 = vld [vmem:[#allocation7 + $0xe0] sm:$0xff] }
 0x32f   : > { %2884 = vmatmul.f32.gmra.mxu0 %v6412_v0  ;;  %3076 = vmatmul.f32.gmra.mxu2 %v6414_v41  ;;  %v6428_v55 = vld [vmem:[#allocation7 + $0x2e0] sm:$0xff] }
 0x330   : > { %3867 = vst [vmem:[%s6243_s27 + $0xb0] sm:$0xff] %v3611_v47  ;;  %v6436_v47 = vpop.permute.xlu2 %2529 }
 0x331   : > { %v3029_v38 = vpop.f32.mrf.mxu2  ;;  %7636 = vst [vmem:[#allocation44_spill] sm:$0xff] %v6436_v47 }
 0x332   : > { %v3030_v14 = vadd.f32 %v3029_v38, %v6422_v18  ;;  %v7637_v18 = vld [vmem:[#allocation28_spill] sm:$0xff] }
 0x333   : > { %v2840_v52 = vpop.f32.mrf.mxu0 }
 0x334   : > { %v3739_v27 = vmax.f32 %v3030_v14, 0.0  ;;  %v2841_v31 = vadd.f32 %v2840_v52, %v7635_v3 }
 0x336   : > { %3995 = vst [vmem:[%s6243_s27 + $0x4b0] sm:$0xff] %v3739_v27  ;;  %v3613_v43 = vmax.f32 %v2841_v31, 0.0  ;;  %3228 = vmatmul.f32.gmra.mxu1 %v6087_v36  ;;  %3420 = vmatmul.f32.gmra.mxu3 %v6089_v21  ;;  %v6440_v31 = vld [vmem:[#allocation7 + $0xe8] sm:$0xff] }
 0x337   : > { %2887 = vmatmul.f32.gmra.mxu0 %v6426_v40  ;;  %3079 = vmatmul.f32.gmra.mxu2 %v6428_v55  ;;  %v6442_v36 = vld [vmem:[#allocation7 + $0x2e8] sm:$0xff] }
 0x338   : > { %3869 = vst [vmem:[%s6243_s27 + $0xc0] sm:$0xff] %v3613_v43  ;;  %v6450_v43 = vpop.permute.xlu0 %2534 }
 0x339   : > { %v3032_v38 = vpop.f32.mrf.mxu2  ;;  %7638 = vst [vmem:[#allocation23_spill] sm:$0xff] %v6450_v43 }
 0x33a   : > { %v3033_v14 = vadd.f32 %v3032_v38, %v6436_v47  ;;  %v7639_v47 = vld [vmem:[#allocation30_spill] sm:$0xff] }
 0x33b   : > { %v2843_v52 = vpop.f32.mrf.mxu0 }
 0x33c   : > { %v3741_v3 = vmax.f32 %v3033_v14, 0.0  ;;  %v2844_v27 = vadd.f32 %v2843_v52, %v7637_v18 }
 0x33e   : > { %3997 = vst [vmem:[%s6243_s27 + $0x4c0] sm:$0xff] %v3741_v3  ;;  %v3615_v21 = vmax.f32 %v2844_v27, 0.0  ;;  %3231 = vmatmul.f32.gmra.mxu1 %v6106_v56  ;;  %3423 = vmatmul.f32.gmra.mxu3 %v6108_v30  ;;  %v6454_v27 = vld [vmem:[#allocation7 + $0xf0] sm:$0xff] }
 0x33f   : > { %2890 = vmatmul.f32.gmra.mxu0 %v6440_v31  ;;  %3082 = vmatmul.f32.gmra.mxu2 %v6442_v36  ;;  %v6456_v56 = vld [vmem:[#allocation7 + $0x2f0] sm:$0xff] }
 0x340   : > { %3871 = vst [vmem:[%s6243_s27 + $0xd0] sm:$0xff] %v3615_v21  ;;  %v6464_v21 = vpop.permute.xlu1 %2539 }
 0x341   : > { %v3035_v38 = vpop.f32.mrf.mxu2  ;;  %7640 = vst [vmem:[#allocation48_spill] sm:$0xff] %v6464_v21 }
 0x342   : > { %v3036_v14 = vadd.f32 %v3035_v38, %v6450_v43  ;;  %v7641_v43 = vld [vmem:[#allocation32_spill] sm:$0xff] }
 0x343   : > { %v2846_v52 = vpop.f32.mrf.mxu0 }
 0x344   : > { %v3743_v18 = vmax.f32 %v3036_v14, 0.0  ;;  %v2847_v3 = vadd.f32 %v2846_v52, %v7639_v47 }
 0x346   : > { %3999 = vst [vmem:[%s6243_s27 + $0x4d0] sm:$0xff] %v3743_v18  ;;  %v3617_v30 = vmax.f32 %v2847_v3, 0.0  ;;  %3234 = vmatmul.f32.gmra.mxu1 %v6125_v23  ;;  %3426 = vmatmul.f32.gmra.mxu3 %v6127_v61  ;;  %v6468_v3 = vld [vmem:[#allocation7 + $0xf8] sm:$0xff] }
 0x347   : > { %2893 = vmatmul.f32.gmra.mxu0 %v6454_v27  ;;  %3085 = vmatmul.f32.gmra.mxu2 %v6456_v56  ;;  %v6470_v23 = vld [vmem:[#allocation7 + $0x2f8] sm:$0xff] }
 0x348   : > { %3873 = vst [vmem:[%s6243_s27 + $0xe0] sm:$0xff] %v3617_v30  ;;  %v6478_v30 = vpop.permute.xlu2 %2544 }
 0x349   : > { %v3038_v38 = vpop.f32.mrf.mxu2  ;;  %7642 = vst [vmem:[#allocation49_spill] sm:$0xff] %v6478_v30 }
 0x34a   : > { %v3039_v14 = vadd.f32 %v3038_v38, %v6464_v21  ;;  %v7643_v21 = vld [vmem:[#allocation31_spill] sm:$0xff] }
 0x34b   : > { %v2849_v52 = vpop.f32.mrf.mxu0 }
 0x34c   : > { %v3745_v47 = vmax.f32 %v3039_v14, 0.0  ;;  %v2850_v18 = vadd.f32 %v2849_v52, %v7641_v43 }
 0x34e   : > { %4001 = vst [vmem:[%s6243_s27 + $0x4e0] sm:$0xff] %v3745_v47  ;;  %v3619_v61 = vmax.f32 %v2850_v18, 0.0  ;;  %3237 = vmatmul.f32.gmra.mxu1 %v6144_v24  ;;  %3429 = vmatmul.f32.gmra.mxu3 %v6146_v63  ;;  %v6482_v18 = vld [vmem:[#allocation7 + $0x100] sm:$0xff] }
 0x34f   : > { %2896 = vmatmul.f32.gmra.mxu0 %v6468_v3  ;;  %3088 = vmatmul.f32.gmra.mxu2 %v6470_v23  ;;  %v6484_v24 = vld [vmem:[#allocation7 + $0x300] sm:$0xff] }
 0x350   : > { %3875 = vst [vmem:[%s6243_s27 + $0xf0] sm:$0xff] %v3619_v61  ;;  %v6492_v61 = vpop.permute.xlu0 %2549 }
 0x351   : > { %v3041_v38 = vpop.f32.mrf.mxu2  ;;  %7644 = vst [vmem:[#allocation22_spill] sm:$0xff] %v6492_v61 }
 0x352   : > { %v3042_v14 = vadd.f32 %v3041_v38, %v6478_v30  ;;  %v7645_v30 = vld [vmem:[#allocation33_spill] sm:$0xff] }
 0x353   : > { %v2852_v52 = vpop.f32.mrf.mxu0 }
 0x354   : > { %v3747_v43 = vmax.f32 %v3042_v14, 0.0  ;;  %v2853_v47 = vadd.f32 %v2852_v52, %v7643_v21 }
 0x356   : > { %4003 = vst [vmem:[%s6243_s27 + $0x4f0] sm:$0xff] %v3747_v43  ;;  %v3621_v63 = vmax.f32 %v2853_v47, 0.0  ;;  %3240 = vmatmul.f32.gmra.mxu1 %v6165_v8  ;;  %3432 = vmatmul.f32.gmra.mxu3 %v6167_v9  ;;  %v6496_v47 = vld [vmem:[#allocation7 + $0x108] sm:$0xff] }
 0x357   : > { %2899 = vmatmul.f32.gmra.mxu0 %v6482_v18  ;;  %3091 = vmatmul.f32.gmra.mxu2 %v6484_v24  ;;  %v6498_v8 = vld [vmem:[#allocation7 + $0x308] sm:$0xff] }
 0x358   : > { %3877 = vst [vmem:[%s6243_s27 + $0x100] sm:$0xff] %v3621_v63  ;;  %v6506_v63 = vpop.permute.xlu1 %2554 }
 0x359   : > { %v3044_v38 = vpop.f32.mrf.mxu2  ;;  %7646 = vst [vmem:[#allocation53_spill] sm:$0xff] %v6506_v63 }
 0x35a   : > { %v3045_v14 = vadd.f32 %v3044_v38, %v6492_v61  ;;  %v7647_v61 = vld [vmem:[#allocation35_spill] sm:$0xff] }
 0x35b   : > { %v2855_v52 = vpop.f32.mrf.mxu0 }
 0x35c   : > { %v3749_v21 = vmax.f32 %v3045_v14, 0.0  ;;  %v2856_v43 = vadd.f32 %v2855_v52, %v7645_v30 }
 0x35e   : > { %4005 = vst [vmem:[%s6243_s27 + $0x500] sm:$0xff] %v3749_v21  ;;  %v3623_v9 = vmax.f32 %v2856_v43, 0.0  ;;  %3243 = vmatmul.f32.gmra.mxu1 %v6186_v16  ;;  %3435 = vmatmul.f32.gmra.mxu3 %v6188_v48  ;;  %v6510_v43 = vld [vmem:[#allocation7 + $0x110] sm:$0xff] }
 0x35f   : > { %2902 = vmatmul.f32.gmra.mxu0 %v6496_v47  ;;  %3094 = vmatmul.f32.gmra.mxu2 %v6498_v8  ;;  %v6512_v16 = vld [vmem:[#allocation7 + $0x310] sm:$0xff] }
 0x360   : > { %3879 = vst [vmem:[%s6243_s27 + $0x110] sm:$0xff] %v3623_v9  ;;  %v6520_v9 = vpop.permute.xlu2 %2559 }
 0x361   : > { %v3047_v38 = vpop.f32.mrf.mxu2  ;;  %7648 = vst [vmem:[#allocation54_spill] sm:$0xff] %v6520_v9 }
 0x362   : > { %v3048_v14 = vadd.f32 %v3047_v38, %v6506_v63  ;;  %v7649_v63 = vld [vmem:[#allocation34_spill] sm:$0xff] }
 0x363   : > { %v2858_v52 = vpop.f32.mrf.mxu0 }
 0x364   : > { %v3751_v30 = vmax.f32 %v3048_v14, 0.0  ;;  %v2859_v21 = vadd.f32 %v2858_v52, %v7647_v61 }
 0x366   : > { %4007 = vst [vmem:[%s6243_s27 + $0x510] sm:$0xff] %v3751_v30  ;;  %v3625_v48 = vmax.f32 %v2859_v21, 0.0  ;;  %3246 = vmatmul.f32.gmra.mxu1 %v6205_v17  ;;  %3438 = vmatmul.f32.gmra.mxu3 %v6207_v53  ;;  %v6524_v21 = vld [vmem:[#allocation7 + $0x118] sm:$0xff] }
 0x367   : > { %2905 = vmatmul.f32.gmra.mxu0 %v6510_v43  ;;  %3097 = vmatmul.f32.gmra.mxu2 %v6512_v16  ;;  %7650 = vst [vmem:[#allocation57_spill] sm:$0xff] %v6524_v21  ;;  %v6526_v17 = vld [vmem:[#allocation7 + $0x318] sm:$0xff] }
 0x368   : > { %3881 = vst [vmem:[%s6243_s27 + $0x120] sm:$0xff] %v3625_v48  ;;  %v6534_v48 = vpop.permute.xlu0 %2564 }
 0x369   : > { %v3050_v38 = vpop.f32.mrf.mxu2  ;;  %7651 = vst [vmem:[#allocation58_spill] sm:$0xff] %v6526_v17 }
 0x36a   : > { %v3051_v14 = vadd.f32 %v3050_v38, %v6520_v9 }
 0x36b   : > { %v2861_v52 = vpop.f32.mrf.mxu0 }
 0x36c   : > { %v3753_v61 = vmax.f32 %v3051_v14, 0.0  ;;  %v2862_v30 = vadd.f32 %v2861_v52, %v7649_v63 }
 0x36e   : > { %4009 = vst [vmem:[%s6243_s27 + $0x520] sm:$0xff] %v3753_v61  ;;  %v3627_v53 = vmax.f32 %v2862_v30, 0.0  ;;  %3249 = vmatmul.f32.gmra.mxu1 %v6218_v37  ;;  %3441 = vmatmul.f32.gmra.mxu3 %v6220_v62  ;;  %v6538_v37 = vld [vmem:[#allocation7 + $0x120] sm:$0xff] }
 0x36f   : > { %2908 = vmatmul.f32.gmra.mxu0 %v6524_v21  ;;  %3100 = vmatmul.f32.gmra.mxu2 %v6526_v17  ;;  %7652 = vst [vmem:[#allocation63_spill] sm:$0xff] %v6538_v37  ;;  %v6540_v62 = vld [vmem:[#allocation7 + $0x320] sm:$0xff]  ;;  %v7654_v21 = vld [vmem:[#allocation36_spill] sm:$0xff] }
 0x370   : > { %3883 = vst [vmem:[%s6243_s27 + $0x130] sm:$0xff] %v3627_v53 }
 0x371   : > { %v3053_v38 = vpop.f32.mrf.mxu2  ;;  %7653 = vst [vmem:[#allocation64_spill] sm:$0xff] %v6540_v62 }
 0x372   : > { %v3054_v14 = vadd.f32 %v3053_v38, %v6534_v48  ;;  %v6550_v38 = vpop.permute.xlu1 %2569 }
 0x373   : > { %v3205_v52 = vpop.f32.mrf.mxu1 }
 0x374   : > { %v3755_v61 = vmax.f32 %v3054_v14, 0.0  ;;  %v3206_v30 = vadd.f32 %v3205_v52, %v5794_v57  ;;  %v2864_v63 = vpop.f32.mrf.mxu0 }
 0x375   : > { %v2865_v9 = vadd.f32 %v2864_v63, %v7654_v21 }
 0x376   : > { %4011 = vst [vmem:[%s6243_s27 + $0x530] sm:$0xff] %v3755_v61  ;;  %v3590_v53 = vmax.f32 %v3206_v30, 0.0  ;;  %3252 = vmatmul.f32.gmra.mxu1 %v6229_v50  ;;  %3444 = vmatmul.f32.gmra.mxu3 %v6231_v2  ;;  %v6555_v30 = vld [vmem:[#allocation7 + $0x128] sm:$0xff] }
 0x377   : > { %v3629_v17 = vmax.f32 %v2865_v9, 0.0  ;;  %2911 = vmatmul.f32.gmra.mxu0 %v6538_v37  ;;  %3103 = vmatmul.f32.gmra.mxu2 %v6540_v62  ;;  %v7655_v62 = vld [vmem:[#allocation38_spill] sm:$0xff] }
 0x378   : > { %3846 = vst [vmem:[%s6243_s27 + $0x8] sm:$0xff] %v3590_v53  ;;  %v6557_v53 = vld [vmem:[#allocation7 + $0x328] sm:$0xff] }
 0x379   : > { %3885 = vst [vmem:[%s6243_s27 + $0x140] sm:$0xff] %v3629_v17  ;;  %v3397_v57 = vpop.f32.mrf.mxu3 }
 0x37a   : > { %v3398_v63 = vadd.f32 %v3397_v57, %v6246_v26  ;;  %v3056_v14 = vpop.f32.mrf.mxu2  ;;  %v6568_v57 = vpop.permute.xlu2 %2574 }
 0x37b   : > { %v3057_v52 = vadd.f32 %v3056_v14, %v6550_v38  ;;  %v3208_v50 = vpop.f32.mrf.mxu1 }
 0x37c   : > { %v3718_v2 = vmax.f32 %v3398_v63, 0.0  ;;  %v3209_v9 = vadd.f32 %v3208_v50, %v7604_v19  ;;  %v2867_v61 = vpop.f32.mrf.mxu0 }
 0x37d   : > { %v3757_v17 = vmax.f32 %v3057_v52, 0.0  ;;  %v2868_v37 = vadd.f32 %v2867_v61, %v7655_v62  ;;  %v7656_v61 = vld [vmem:[#allocation37_spill] sm:$0xff] }
 0x37e   : > { %3974 = vst [vmem:[%s6243_s27 + $0x408] sm:$0xff] %v3718_v2  ;;  %v3592_v21 = vmax.f32 %v3209_v9, 0.0  ;;  %3255 = vmatmul.f32.gmra.mxu1 %v6249_v15  ;;  %3447 = vmatmul.f32.gmra.mxu3 %v6251_v10  ;;  %v6573_v2 = vld [vmem:[#allocation7 + $0x130] sm:$0xff] }
 0x37f   : > { %4013 = vst [vmem:[%s6243_s27 + $0x540] sm:$0xff] %v3757_v17  ;;  %v3631_v26 = vmax.f32 %v2868_v37, 0.0  ;;  %2914 = vmatmul.f32.gmra.mxu0 %v6555_v30  ;;  %3106 = vmatmul.f32.gmra.mxu2 %v6557_v53 }
 0x380   : > { %3848 = vst [vmem:[%s6243_s27 + $0x18] sm:$0xff] %v3592_v21  ;;  %v6575_v21 = vld [vmem:[#allocation7 + $0x330] sm:$0xff] }
 0x381   : > { %3887 = vst [vmem:[%s6243_s27 + $0x150] sm:$0xff] %v3631_v26  ;;  %v3400_v19 = vpop.f32.mrf.mxu3 }
 0x382   : > { %v3401_v63 = vadd.f32 %v3400_v19, %v6264_v13  ;;  %v3059_v14 = vpop.f32.mrf.mxu2  ;;  %v6586_v19 = vpop.permute.xlu0 %2579 }
 0x383   : > { %v3060_v15 = vadd.f32 %v3059_v14, %v6568_v57  ;;  %v3211_v52 = vpop.f32.mrf.mxu1 }
 0x384   : > { %v3720_v10 = vmax.f32 %v3401_v63, 0.0  ;;  %v3212_v37 = vadd.f32 %v3211_v52, %v7606_v33  ;;  %v2870_v50 = vpop.f32.mrf.mxu0 }
 0x385   : > { %v3759_v9 = vmax.f32 %v3060_v15, 0.0  ;;  %v2871_v17 = vadd.f32 %v2870_v50, %v7656_v61  ;;  %v6593_v50 = vld [vmem:[#allocation7 + $0x338] sm:$0xff] }
 0x386   : > { %3976 = vst [vmem:[%s6243_s27 + $0x418] sm:$0xff] %v3720_v10  ;;  %v3594_v26 = vmax.f32 %v3212_v37, 0.0  ;;  %3258 = vmatmul.f32.gmra.mxu1 %v6271_v54  ;;  %3450 = vmatmul.f32.gmra.mxu3 %v6273_v51  ;;  %v6591_v37 = vld [vmem:[#allocation7 + $0x138] sm:$0xff] }
 0x387   : > { %4015 = vst [vmem:[%s6243_s27 + $0x550] sm:$0xff] %v3759_v9  ;;  %v3633_v13 = vmax.f32 %v2871_v17, 0.0  ;;  %2917 = vmatmul.f32.gmra.mxu0 %v6573_v2  ;;  %3109 = vmatmul.f32.gmra.mxu2 %v6575_v21  ;;  %v7657_v17 = vld [vmem:[#allocation41_spill] sm:$0xff] }
 0x388   : > { %3850 = vst [vmem:[%s6243_s27 + $0x28] sm:$0xff] %v3594_v26 }
 0x389   : > { %3889 = vst [vmem:[%s6243_s27 + $0x160] sm:$0xff] %v3633_v13  ;;  %v3403_v33 = vpop.f32.mrf.mxu3 }
 0x38a   : > { %v3404_v63 = vadd.f32 %v3403_v33, %v6284_v25  ;;  %v3062_v14 = vpop.f32.mrf.mxu2  ;;  %v6604_v33 = vpop.permute.xlu1 %2584 }
 0x38b   : > { %v3063_v54 = vadd.f32 %v3062_v14, %v6586_v19  ;;  %v3214_v15 = vpop.f32.mrf.mxu1 }
 0x38c   : > { %v3722_v51 = vmax.f32 %v3404_v63, 0.0  ;;  %v3215_v52 = vadd.f32 %v3214_v15, %v7607_v49  ;;  %v2873_v10 = vpop.f32.mrf.mxu0 }
 0x38d   : > { %v3761_v9 = vmax.f32 %v3063_v54, 0.0  ;;  %v2874_v26 = vadd.f32 %v2873_v10, %v7657_v17  ;;  %v6611_v10 = vld [vmem:[#allocation7 + $0x340] sm:$0xff] }
 0x38e   : > { %3978 = vst [vmem:[%s6243_s27 + $0x428] sm:$0xff] %v3722_v51  ;;  %v3596_v13 = vmax.f32 %v3215_v52, 0.0  ;;  %3261 = vmatmul.f32.gmra.mxu1 %v6291_v11  ;;  %3453 = vmatmul.f32.gmra.mxu3 %v6293_v29  ;;  %v6609_v52 = vld [vmem:[#allocation7 + $0x140] sm:$0xff] }
 0x38f   : > { %4017 = vst [vmem:[%s6243_s27 + $0x560] sm:$0xff] %v3761_v9  ;;  %v3635_v25 = vmax.f32 %v2874_v26, 0.0  ;;  %2920 = vmatmul.f32.gmra.mxu0 %v6591_v37  ;;  %3112 = vmatmul.f32.gmra.mxu2 %v6593_v50  ;;  %v7658_v26 = vld [vmem:[#allocation45_spill] sm:$0xff] }
 0x390   : > { %3852 = vst [vmem:[%s6243_s27 + $0x38] sm:$0xff] %v3596_v13 }
 0x391   : > { %3891 = vst [vmem:[%s6243_s27 + $0x170] sm:$0xff] %v3635_v25  ;;  %v3406_v49 = vpop.f32.mrf.mxu3 }
 0x392   : > { %v3407_v63 = vadd.f32 %v3406_v49, %v6304_v34  ;;  %v3065_v14 = vpop.f32.mrf.mxu2  ;;  %v6622_v49 = vpop.permute.xlu2 %2589 }
 0x393   : > { %v3066_v11 = vadd.f32 %v3065_v14, %v6604_v33  ;;  %v3217_v54 = vpop.f32.mrf.mxu1 }
 0x394   : > { %v3724_v29 = vmax.f32 %v3407_v63, 0.0  ;;  %v3218_v15 = vadd.f32 %v3217_v54, %v7608_v1  ;;  %v2876_v51 = vpop.f32.mrf.mxu0 }
 0x395   : > { %v3763_v9 = vmax.f32 %v3066_v11, 0.0  ;;  %v2877_v13 = vadd.f32 %v2876_v51, %v7658_v26  ;;  %v6629_v51 = vld [vmem:[#allocation7 + $0x348] sm:$0xff] }
 0x396   : > { %3980 = vst [vmem:[%s6243_s27 + $0x438] sm:$0xff] %v3724_v29  ;;  %v3598_v25 = vmax.f32 %v3218_v15, 0.0  ;;  %3264 = vmatmul.f32.gmra.mxu1 %v6312_v4  ;;  %3456 = vmatmul.f32.gmra.mxu3 %v6314_v22  ;;  %v6627_v15 = vld [vmem:[#allocation7 + $0x148] sm:$0xff] }
 0x397   : > { %4019 = vst [vmem:[%s6243_s27 + $0x570] sm:$0xff] %v3763_v9  ;;  %v3637_v34 = vmax.f32 %v2877_v13, 0.0  ;;  %2923 = vmatmul.f32.gmra.mxu0 %v6609_v52  ;;  %3115 = vmatmul.f32.gmra.mxu2 %v6611_v10  ;;  %v7659_v13 = vld [vmem:[#allocation42_spill] sm:$0xff] }
 0x398   : > { %3854 = vst [vmem:[%s6243_s27 + $0x48] sm:$0xff] %v3598_v25 }
 0x399   : > { %3893 = vst [vmem:[%s6243_s27 + $0x180] sm:$0xff] %v3637_v34  ;;  %v3409_v1 = vpop.f32.mrf.mxu3 }
 0x39a   : > { %v3410_v63 = vadd.f32 %v3409_v1, %v6324_v45  ;;  %v3068_v14 = vpop.f32.mrf.mxu2  ;;  %v6640_v1 = vpop.permute.xlu0 %2594 }
 0x39b   : > { %v3069_v4 = vadd.f32 %v3068_v14, %v6622_v49  ;;  %v3220_v11 = vpop.f32.mrf.mxu1 }
 0x39c   : > { %v3726_v22 = vmax.f32 %v3410_v63, 0.0  ;;  %v3221_v54 = vadd.f32 %v3220_v11, %v7611_v35  ;;  %v2879_v29 = vpop.f32.mrf.mxu0 }
 0x39d   : > { %v3765_v9 = vmax.f32 %v3069_v4, 0.0  ;;  %v2880_v25 = vadd.f32 %v2879_v29, %v7659_v13  ;;  %v6647_v29 = vld [vmem:[#allocation7 + $0x350] sm:$0xff] }
 0x39e   : > { %3982 = vst [vmem:[%s6243_s27 + $0x448] sm:$0xff] %v3726_v22  ;;  %v3600_v34 = vmax.f32 %v3221_v54, 0.0  ;;  %3267 = vmatmul.f32.gmra.mxu1 %v6328_v44  ;;  %3459 = vmatmul.f32.gmra.mxu3 %v6330_v7  ;;  %v6645_v54 = vld [vmem:[#allocation7 + $0x150] sm:$0xff] }
 0x39f   : > { %4021 = vst [vmem:[%s6243_s27 + $0x580] sm:$0xff] %v3765_v9  ;;  %v3639_v45 = vmax.f32 %v2880_v25, 0.0  ;;  %2926 = vmatmul.f32.gmra.mxu0 %v6627_v15  ;;  %3118 = vmatmul.f32.gmra.mxu2 %v6629_v51  ;;  %v7660_v25 = vld [vmem:[#allocation46_spill] sm:$0xff] }
 0x3a0   : > { %3856 = vst [vmem:[%s6243_s27 + $0x58] sm:$0xff] %v3600_v34 }
 0x3a1   : > { %3895 = vst [vmem:[%s6243_s27 + $0x190] sm:$0xff] %v3639_v45  ;;  %v3412_v35 = vpop.f32.mrf.mxu3 }
 0x3a2   : > { %v3413_v63 = vadd.f32 %v3412_v35, %v6338_v20  ;;  %v3071_v14 = vpop.f32.mrf.mxu2  ;;  %v6658_v35 = vpop.permute.xlu1 %2599 }
 0x3a3   : > { %v3072_v44 = vadd.f32 %v3071_v14, %v6640_v1  ;;  %v3223_v4 = vpop.f32.mrf.mxu1 }
 0x3a4   : > { %v3728_v7 = vmax.f32 %v3413_v63, 0.0  ;;  %v3224_v11 = vadd.f32 %v3223_v4, %v7614_v58  ;;  %v2882_v22 = vpop.f32.mrf.mxu0 }
 0x3a5   : > { %v3767_v9 = vmax.f32 %v3072_v44, 0.0  ;;  %v2883_v34 = vadd.f32 %v2882_v22, %v7660_v25  ;;  %v6665_v22 = vld [vmem:[#allocation7 + $0x358] sm:$0xff] }
 0x3a6   : > { %3984 = vst [vmem:[%s6243_s27 + $0x458] sm:$0xff] %v3728_v7  ;;  %v3602_v45 = vmax.f32 %v3224_v11, 0.0  ;;  %3270 = vmatmul.f32.gmra.mxu1 %v6342_v39  ;;  %3462 = vmatmul.f32.gmra.mxu3 %v6344_v42  ;;  %v6663_v11 = vld [vmem:[#allocation7 + $0x158] sm:$0xff] }
 0x3a7   : > { %4023 = vst [vmem:[%s6243_s27 + $0x590] sm:$0xff] %v3767_v9  ;;  %v3641_v20 = vmax.f32 %v2883_v34, 0.0  ;;  %2929 = vmatmul.f32.gmra.mxu0 %v6645_v54  ;;  %3121 = vmatmul.f32.gmra.mxu2 %v6647_v29  ;;  %v7663_v34 = vld [vmem:[#allocation50_spill] sm:$0xff] }
 0x3a8   : > { %3858 = vst [vmem:[%s6243_s27 + $0x68] sm:$0xff] %v3602_v45 }
 0x3a9   : > { %3897 = vst [vmem:[%s6243_s27 + $0x1a0] sm:$0xff] %v3641_v20  ;;  %v3415_v58 = vpop.f32.mrf.mxu3 }
 0x3aa   : > { %v3416_v63 = vadd.f32 %v3415_v58, %v6352_v59  ;;  %v3074_v14 = vpop.f32.mrf.mxu2  ;;  %7661 = vst [vmem:[#allocation38_spill] sm:$0xff] %v6663_v11  ;;  %v6676_v58 = vpop.permute.xlu2 %2604 }
 0x3ab   : > { %v3075_v39 = vadd.f32 %v3074_v14, %v6658_v35  ;;  %v3226_v44 = vpop.f32.mrf.mxu1  ;;  %7662 = vst [vmem:[#allocation37_spill] sm:$0xff] %v6665_v22 }
 0x3ac   : > { %v3730_v42 = vmax.f32 %v3416_v63, 0.0  ;;  %v3227_v4 = vadd.f32 %v3226_v44, %v7617_v32  ;;  %v2885_v7 = vpop.f32.mrf.mxu0  ;;  %v7664_v63 = vld [vmem:[#allocation18_spill] sm:$0xff] }
 0x3ad   : > { %v3769_v9 = vmax.f32 %v3075_v39, 0.0  ;;  %v2886_v45 = vadd.f32 %v2885_v7, %v7663_v34 }
 0x3ae   : > { %3986 = vst [vmem:[%s6243_s27 + $0x468] sm:$0xff] %v3730_v42  ;;  %v3604_v20 = vmax.f32 %v3227_v4, 0.0  ;;  %3273 = vmatmul.f32.gmra.mxu1 %v6356_v5  ;;  %3465 = vmatmul.f32.gmra.mxu3 %v6358_v28  ;;  %v7665_v42 = vld [vmem:[#allocation24_spill] sm:$0xff] }
 0x3af   : > { %4025 = vst [vmem:[%s6243_s27 + $0x5a0] sm:$0xff] %v3769_v9  ;;  %v3643_v59 = vmax.f32 %v2886_v45, 0.0  ;;  %2932 = vmatmul.f32.gmra.mxu0 %v6663_v11  ;;  %3124 = vmatmul.f32.gmra.mxu2 %v6665_v22  ;;  %v6681_v9 = vld [vmem:[#allocation7 + $0x160] sm:$0xff] }
 0x3b0   : > { %3860 = vst [vmem:[%s6243_s27 + $0x78] sm:$0xff] %v3604_v20  ;;  %v6683_v45 = vld [vmem:[#allocation7 + $0x360] sm:$0xff] }
 0x3b1   : > { %3899 = vst [vmem:[%s6243_s27 + $0x1b0] sm:$0xff] %v3643_v59  ;;  %v3418_v32 = vpop.f32.mrf.mxu3  ;;  %v7668_v59 = vld [vmem:[#allocation47_spill] sm:$0xff] }
 0x3b2   : > { %v3419_v14 = vadd.f32 %v3418_v32, %v7664_v63  ;;  %v3077_v39 = vpop.f32.mrf.mxu2  ;;  %7666 = vst [vmem:[#allocation41_spill] sm:$0xff] %v6681_v9 }
 0x3b3   : > { %v3078_v5 = vadd.f32 %v3077_v39, %v6676_v58  ;;  %v3229_v44 = vpop.f32.mrf.mxu1  ;;  %7667 = vst [vmem:[#allocation45_spill] sm:$0xff] %v6683_v45  ;;  %v7670_v39 = vld [vmem:[#allocation20_spill] sm:$0xff] }
 0x3b4   : > { %v3732_v28 = vmax.f32 %v3419_v14, 0.0  ;;  %v3230_v4 = vadd.f32 %v3229_v44, %v7665_v42  ;;  %v2888_v7 = vpop.f32.mrf.mxu0  ;;  %v6694_v14 = vpop.permute.xlu0 %2609 }
 0x3b5   : > { %v3771_v20 = vmax.f32 %v3078_v5, 0.0  ;;  %v2889_v22 = vadd.f32 %v2888_v7, %v7668_v59  ;;  %7669 = vst [vmem:[#allocation42_spill] sm:$0xff] %v6694_v14  ;;  %v6699_v7 = vld [vmem:[#allocation7 + $0x168] sm:$0xff] }
 0x3b6   : > { %3988 = vst [vmem:[%s6243_s27 + $0x478] sm:$0xff] %v3732_v28  ;;  %v3606_v11 = vmax.f32 %v3230_v4, 0.0  ;;  %3276 = vmatmul.f32.gmra.mxu1 %v6370_v6  ;;  %3468 = vmatmul.f32.gmra.mxu3 %v6372_v12 }
 0x3b7   : > { %4027 = vst [vmem:[%s6243_s27 + $0x5b0] sm:$0xff] %v3771_v20  ;;  %v3645_v32 = vmax.f32 %v2889_v22, 0.0  ;;  %2935 = vmatmul.f32.gmra.mxu0 %v6681_v9  ;;  %3127 = vmatmul.f32.gmra.mxu2 %v6683_v45  ;;  %v7671_v22 = vld [vmem:[#allocation26_spill] sm:$0xff] }
 0x3b8   : > { %3862 = vst [vmem:[%s6243_s27 + $0x88] sm:$0xff] %v3606_v11  ;;  %v6701_v11 = vld [vmem:[#allocation7 + $0x368] sm:$0xff] }
 0x3b9   : > { %3901 = vst [vmem:[%s6243_s27 + $0x1c0] sm:$0xff] %v3645_v32  ;;  %v3421_v63 = vpop.f32.mrf.mxu3  ;;  %v7674_v32 = vld [vmem:[#allocation51_spill] sm:$0xff] }
 0x3ba   : > { %v3422_v5 = vadd.f32 %v3421_v63, %v7670_v39  ;;  %v3080_v44 = vpop.f32.mrf.mxu2  ;;  %7672 = vst [vmem:[#allocation46_spill] sm:$0xff] %v6699_v7  ;;  %v7675_v63 = vld [vmem:[#allocation19_spill] sm:$0xff] }
 0x3bb   : > { %v3081_v6 = vadd.f32 %v3080_v44, %v6694_v14  ;;  %v3232_v28 = vpop.f32.mrf.mxu1  ;;  %7673 = vst [vmem:[#allocation50_spill] sm:$0xff] %v6701_v11  ;;  %v7676_v39 = vld [vmem:[#allocation39_spill] sm:$0xff] }
 0x3bc   : > { %v3734_v12 = vmax.f32 %v3422_v5, 0.0  ;;  %v3233_v42 = vadd.f32 %v3232_v28, %v7671_v22  ;;  %v2891_v4 = vpop.f32.mrf.mxu0  ;;  %v6712_v28 = vpop.permute.xlu1 %2614 }
 0x3bd   : > { %v3773_v20 = vmax.f32 %v3081_v6, 0.0  ;;  %v2892_v45 = vadd.f32 %v2891_v4, %v7674_v32  ;;  %v7677_v6 = vld [vmem:[#allocation40_spill] sm:$0xff] }
 0x3be   : > { %3990 = vst [vmem:[%s6243_s27 + $0x488] sm:$0xff] %v3734_v12  ;;  %v3608_v9 = vmax.f32 %v3233_v42, 0.0  ;;  %3279 = vmatmul.f32.gmra.mxu1 %v7675_v63  ;;  %3471 = vmatmul.f32.gmra.mxu3 %v7676_v39 }
 0x3bf   : > { %4029 = vst [vmem:[%s6243_s27 + $0x5c0] sm:$0xff] %v3773_v20  ;;  %v3647_v44 = vmax.f32 %v2892_v45, 0.0  ;;  %2938 = vmatmul.f32.gmra.mxu0 %v6699_v7  ;;  %3130 = vmatmul.f32.gmra.mxu2 %v6701_v11  ;;  %v7678_v45 = vld [vmem:[#allocation25_spill] sm:$0xff]  ;;  %v6717_v11 = vld [vmem:[#allocation7 + $0x170] sm:$0xff] }
 0x3c0   : > { %3864 = vst [vmem:[%s6243_s27 + $0x98] sm:$0xff] %v3608_v9  ;;  %v6719_v9 = vld [vmem:[#allocation7 + $0x370] sm:$0xff] }
 0x3c1   : > { %3903 = vst [vmem:[%s6243_s27 + $0x1d0] sm:$0xff] %v3647_v44  ;;  %v3424_v5 = vpop.f32.mrf.mxu3  ;;  %v7681_v7 = vld [vmem:[#allocation55_spill] sm:$0xff] }
 0x3c2   : > { %v3425_v12 = vadd.f32 %v3424_v5, %v7677_v6  ;;  %v3083_v22 = vpop.f32.mrf.mxu2  ;;  %7679 = vst [vmem:[#allocation18_spill] sm:$0xff] %v6717_v11 }
 0x3c3   : > { %v3084_v42 = vadd.f32 %v3083_v22, %v6712_v28  ;;  %v3235_v4 = vpop.f32.mrf.mxu1  ;;  %7680 = vst [vmem:[#allocation24_spill] sm:$0xff] %v6719_v9  ;;  %v7682_v22 = vld [vmem:[#allocation21_spill] sm:$0xff] }
 0x3c4   : > { %v3736_v20 = vmax.f32 %v3425_v12, 0.0  ;;  %v3236_v63 = vadd.f32 %v3235_v4, %v7678_v45  ;;  %v2894_v39 = vpop.f32.mrf.mxu0  ;;  %v6730_v12 = vpop.permute.xlu2 %2619 }
 0x3c5   : > { %v3775_v44 = vmax.f32 %v3084_v42, 0.0  ;;  %v2895_v32 = vadd.f32 %v2894_v39, %v7681_v7  ;;  %v6735_v39 = vld [vmem:[#allocation7 + $0x178] sm:$0xff] }
 0x3c6   : > { %3992 = vst [vmem:[%s6243_s27 + $0x498] sm:$0xff] %v3736_v20  ;;  %v3610_v14 = vmax.f32 %v3236_v63, 0.0  ;;  %3282 = vmatmul.f32.gmra.mxu1 %v6398_v60  ;;  %3474 = vmatmul.f32.gmra.mxu3 %v6400_v46 }
 0x3c7   : > { %4031 = vst [vmem:[%s6243_s27 + $0x5d0] sm:$0xff] %v3775_v44  ;;  %v3649_v5 = vmax.f32 %v2895_v32, 0.0  ;;  %2941 = vmatmul.f32.gmra.mxu0 %v6717_v11  ;;  %3133 = vmatmul.f32.gmra.mxu2 %v6719_v9  ;;  %v7683_v32 = vld [vmem:[#allocation27_spill] sm:$0xff] }
 0x3c8   : > { %3866 = vst [vmem:[%s6243_s27 + $0xa8] sm:$0xff] %v3610_v14  ;;  %v6737_v14 = vld [vmem:[#allocation7 + $0x378] sm:$0xff] }
 0x3c9   : > { %3905 = vst [vmem:[%s6243_s27 + $0x1e0] sm:$0xff] %v3649_v5  ;;  %v3427_v6 = vpop.f32.mrf.mxu3  ;;  %v7686_v5 = vld [vmem:[#allocation52_spill] sm:$0xff] }
 0x3ca   : > { %v3428_v42 = vadd.f32 %v3427_v6, %v7682_v22  ;;  %v3086_v4 = vpop.f32.mrf.mxu2  ;;  %7684 = vst [vmem:[#allocation47_spill] sm:$0xff] %v6735_v39 }
 0x3cb   : > { %v3087_v60 = vadd.f32 %v3086_v4, %v6730_v12  ;;  %v3238_v20 = vpop.f32.mrf.mxu1  ;;  %7685 = vst [vmem:[#allocation20_spill] sm:$0xff] %v6737_v14  ;;  %v7687_v4 = vld [vmem:[#allocation43_spill] sm:$0xff] }
 0x3cc   : > { %v3738_v46 = vmax.f32 %v3428_v42, 0.0  ;;  %v3239_v45 = vadd.f32 %v3238_v20, %v7683_v32  ;;  %v2897_v63 = vpop.f32.mrf.mxu0  ;;  %v6748_v42 = vpop.permute.xlu0 %2624 }
 0x3cd   : > { %v3777_v44 = vmax.f32 %v3087_v60, 0.0  ;;  %v2898_v9 = vadd.f32 %v2897_v63, %v7686_v5  ;;  %v6753_v63 = vld [vmem:[#allocation7 + $0x180] sm:$0xff] }
 0x3ce   : > { %3994 = vst [vmem:[%s6243_s27 + $0x4a8] sm:$0xff] %v3738_v46  ;;  %v3612_v11 = vmax.f32 %v3239_v45, 0.0  ;;  %3285 = vmatmul.f32.gmra.mxu1 %v6412_v0  ;;  %3477 = vmatmul.f32.gmra.mxu3 %v6414_v41 }
 0x3cf   : > { %4033 = vst [vmem:[%s6243_s27 + $0x5e0] sm:$0xff] %v3777_v44  ;;  %v3651_v6 = vmax.f32 %v2898_v9, 0.0  ;;  %2944 = vmatmul.f32.gmra.mxu0 %v6735_v39  ;;  %3136 = vmatmul.f32.gmra.mxu2 %v6737_v14  ;;  %v7688_v9 = vld [vmem:[#allocation29_spill] sm:$0xff] }
 0x3d0   : > { %3868 = vst [vmem:[%s6243_s27 + $0xb8] sm:$0xff] %v3612_v11  ;;  %v6755_v11 = vld [vmem:[#allocation7 + $0x380] sm:$0xff] }
 0x3d1   : > { %3907 = vst [vmem:[%s6243_s27 + $0x1f0] sm:$0xff] %v3651_v6  ;;  %v3430_v22 = vpop.f32.mrf.mxu3  ;;  %v7691_v6 = vld [vmem:[#allocation56_spill] sm:$0xff] }
 0x3d2   : > { %v3431_v60 = vadd.f32 %v3430_v22, %v7687_v4  ;;  %v3089_v20 = vpop.f32.mrf.mxu2  ;;  %7689 = vst [vmem:[#allocation26_spill] sm:$0xff] %v6753_v63 }
 0x3d3   : > { %v3090_v0 = vadd.f32 %v3089_v20, %v6748_v42  ;;  %v3241_v46 = vpop.f32.mrf.mxu1  ;;  %7690 = vst [vmem:[#allocation19_spill] sm:$0xff] %v6755_v11  ;;  %v7692_v20 = vld [vmem:[#allocation44_spill] sm:$0xff] }
 0x3d4   : > { %v3740_v41 = vmax.f32 %v3431_v60, 0.0  ;;  %v3242_v32 = vadd.f32 %v3241_v46, %v7688_v9  ;;  %v2900_v45 = vpop.f32.mrf.mxu0  ;;  %v6766_v60 = vpop.permute.xlu1 %2629 }
 0x3d5   : > { %v3779_v44 = vmax.f32 %v3090_v0, 0.0  ;;  %v2901_v14 = vadd.f32 %v2900_v45, %v7691_v6  ;;  %v6771_v45 = vld [vmem:[#allocation7 + $0x188] sm:$0xff] }
 0x3d6   : > { %3996 = vst [vmem:[%s6243_s27 + $0x4b8] sm:$0xff] %v3740_v41  ;;  %v3614_v39 = vmax.f32 %v3242_v32, 0.0  ;;  %3288 = vmatmul.f32.gmra.mxu1 %v6426_v40  ;;  %3480 = vmatmul.f32.gmra.mxu3 %v6428_v55 }
 0x3d7   : > { %4035 = vst [vmem:[%s6243_s27 + $0x5f0] sm:$0xff] %v3779_v44  ;;  %v3653_v22 = vmax.f32 %v2901_v14, 0.0  ;;  %2947 = vmatmul.f32.gmra.mxu0 %v6753_v63  ;;  %3139 = vmatmul.f32.gmra.mxu2 %v6755_v11  ;;  %v7693_v14 = vld [vmem:[#allocation28_spill] sm:$0xff] }
 0x3d8   : > { %3870 = vst [vmem:[%s6243_s27 + $0xc8] sm:$0xff] %v3614_v39  ;;  %v6773_v39 = vld [vmem:[#allocation7 + $0x388] sm:$0xff] }
 0x3d9   : > { %3909 = vst [vmem:[%s6243_s27 + $0x200] sm:$0xff] %v3653_v22  ;;  %v3433_v4 = vpop.f32.mrf.mxu3  ;;  %v7696_v22 = vld [vmem:[#allocation60_spill] sm:$0xff] }
 0x3da   : > { %v3434_v0 = vadd.f32 %v3433_v4, %v7692_v20  ;;  %v3092_v46 = vpop.f32.mrf.mxu2  ;;  %7694 = vst [vmem:[#allocation39_spill] sm:$0xff] %v6771_v45 }
 0x3db   : > { %v3093_v40 = vadd.f32 %v3092_v46, %v6766_v60  ;;  %v3244_v41 = vpop.f32.mrf.mxu1  ;;  %7695 = vst [vmem:[#allocation40_spill] sm:$0xff] %v6773_v39  ;;  %v7697_v46 = vld [vmem:[#allocation23_spill] sm:$0xff] }
 0x3dc   : > { %v3742_v55 = vmax.f32 %v3434_v0, 0.0  ;;  %v3245_v9 = vadd.f32 %v3244_v41, %v7693_v14  ;;  %v2903_v32 = vpop.f32.mrf.mxu0  ;;  %v6784_v0 = vpop.permute.xlu2 %2634 }
 0x3dd   : > { %v3781_v44 = vmax.f32 %v3093_v40, 0.0  ;;  %v2904_v11 = vadd.f32 %v2903_v32, %v7696_v22  ;;  %v6789_v32 = vld [vmem:[#allocation7 + $0x190] sm:$0xff] }
 0x3de   : > { %3998 = vst [vmem:[%s6243_s27 + $0x4c8] sm:$0xff] %v3742_v55  ;;  %v3616_v63 = vmax.f32 %v3245_v9, 0.0  ;;  %3291 = vmatmul.f32.gmra.mxu1 %v6440_v31  ;;  %3483 = vmatmul.f32.gmra.mxu3 %v6442_v36 }
 0x3df   : > { %4037 = vst [vmem:[%s6243_s27 + $0x600] sm:$0xff] %v3781_v44  ;;  %v3655_v4 = vmax.f32 %v2904_v11, 0.0  ;;  %2950 = vmatmul.f32.gmra.mxu0 %v6771_v45  ;;  %3142 = vmatmul.f32.gmra.mxu2 %v6773_v39  ;;  %v7698_v11 = vld [vmem:[#allocation30_spill] sm:$0xff] }
 0x3e0   : > { %3872 = vst [vmem:[%s6243_s27 + $0xd8] sm:$0xff] %v3616_v63  ;;  %v6791_v63 = vld [vmem:[#allocation7 + $0x390] sm:$0xff] }
 0x3e1   : > { %3911 = vst [vmem:[%s6243_s27 + $0x210] sm:$0xff] %v3655_v4  ;;  %v3436_v20 = vpop.f32.mrf.mxu3  ;;  %v7701_v4 = vld [vmem:[#allocation59_spill] sm:$0xff] }
 0x3e2   : > { %v3437_v40 = vadd.f32 %v3436_v20, %v7697_v46  ;;  %v3095_v41 = vpop.f32.mrf.mxu2  ;;  %7699 = vst [vmem:[#allocation25_spill] sm:$0xff] %v6789_v32 }
 0x3e3   : > { %v3096_v31 = vadd.f32 %v3095_v41, %v6784_v0  ;;  %v3247_v55 = vpop.f32.mrf.mxu1  ;;  %7700 = vst [vmem:[#allocation55_spill] sm:$0xff] %v6791_v63  ;;  %v7702_v41 = vld [vmem:[#allocation48_spill] sm:$0xff] }
 0x3e4   : > { %v3744_v36 = vmax.f32 %v3437_v40, 0.0  ;;  %v3248_v14 = vadd.f32 %v3247_v55, %v7698_v11  ;;  %v2906_v9 = vpop.f32.mrf.mxu0  ;;  %v6802_v40 = vpop.permute.xlu0 %2639 }
 0x3e5   : > { %v3783_v44 = vmax.f32 %v3096_v31, 0.0  ;;  %v2907_v39 = vadd.f32 %v2906_v9, %v7701_v4  ;;  %v6807_v9 = vld [vmem:[#allocation7 + $0x198] sm:$0xff] }
 0x3e6   : > { %4000 = vst [vmem:[%s6243_s27 + $0x4d8] sm:$0xff] %v3744_v36  ;;  %v3618_v45 = vmax.f32 %v3248_v14, 0.0  ;;  %3294 = vmatmul.f32.gmra.mxu1 %v6454_v27  ;;  %3486 = vmatmul.f32.gmra.mxu3 %v6456_v56 }
 0x3e7   : > { %4039 = vst [vmem:[%s6243_s27 + $0x610] sm:$0xff] %v3783_v44  ;;  %v3657_v20 = vmax.f32 %v2907_v39, 0.0  ;;  %2953 = vmatmul.f32.gmra.mxu0 %v6789_v32  ;;  %3145 = vmatmul.f32.gmra.mxu2 %v6791_v63  ;;  %v7703_v39 = vld [vmem:[#allocation32_spill] sm:$0xff] }
 0x3e8   : > { %3874 = vst [vmem:[%s6243_s27 + $0xe8] sm:$0xff] %v3618_v45  ;;  %v6809_v45 = vld [vmem:[#allocation7 + $0x398] sm:$0xff] }
 0x3e9   : > { %3913 = vst [vmem:[%s6243_s27 + $0x220] sm:$0xff] %v3657_v20  ;;  %v3439_v46 = vpop.f32.mrf.mxu3  ;;  %v7706_v20 = vld [vmem:[#allocation61_spill] sm:$0xff] }
 0x3ea   : > { %v3440_v31 = vadd.f32 %v3439_v46, %v7702_v41  ;;  %v3098_v55 = vpop.f32.mrf.mxu2  ;;  %7704 = vst [vmem:[#allocation21_spill] sm:$0xff] %v6807_v9 }
 0x3eb   : > { %v3099_v27 = vadd.f32 %v3098_v55, %v6802_v40  ;;  %v3250_v36 = vpop.f32.mrf.mxu1  ;;  %7705 = vst [vmem:[#allocation27_spill] sm:$0xff] %v6809_v45  ;;  %v7707_v55 = vld [vmem:[#allocation49_spill] sm:$0xff] }
 0x3ec   : > { %v3746_v56 = vmax.f32 %v3440_v31, 0.0  ;;  %v3251_v11 = vadd.f32 %v3250_v36, %v7703_v39  ;;  %v2909_v14 = vpop.f32.mrf.mxu0  ;;  %v6820_v31 = vpop.permute.xlu1 %2644 }
 0x3ed   : > { %v3785_v44 = vmax.f32 %v3099_v27, 0.0  ;;  %v2910_v63 = vadd.f32 %v2909_v14, %v7706_v20  ;;  %v6825_v14 = vld [vmem:[#allocation7 + $0x1a0] sm:$0xff] }
 0x3ee   : > { %4002 = vst [vmem:[%s6243_s27 + $0x4e8] sm:$0xff] %v3746_v56  ;;  %v3620_v32 = vmax.f32 %v3251_v11, 0.0  ;;  %3297 = vmatmul.f32.gmra.mxu1 %v6468_v3  ;;  %3489 = vmatmul.f32.gmra.mxu3 %v6470_v23 }
 0x3ef   : > { %4041 = vst [vmem:[%s6243_s27 + $0x620] sm:$0xff] %v3785_v44  ;;  %v3659_v46 = vmax.f32 %v2910_v63, 0.0  ;;  %2956 = vmatmul.f32.gmra.mxu0 %v6807_v9  ;;  %3148 = vmatmul.f32.gmra.mxu2 %v6809_v45  ;;  %v7708_v63 = vld [vmem:[#allocation31_spill] sm:$0xff] }
 0x3f0   : > { %3876 = vst [vmem:[%s6243_s27 + $0xf8] sm:$0xff] %v3620_v32  ;;  %v6827_v32 = vld [vmem:[#allocation7 + $0x3a0] sm:$0xff] }
 0x3f1   : > { %3915 = vst [vmem:[%s6243_s27 + $0x230] sm:$0xff] %v3659_v46  ;;  %v3442_v41 = vpop.f32.mrf.mxu3  ;;  %v7711_v46 = vld [vmem:[#allocation65_spill] sm:$0xff] }
 0x3f2   : > { %v3443_v27 = vadd.f32 %v3442_v41, %v7707_v55  ;;  %v3101_v36 = vpop.f32.mrf.mxu2  ;;  %7709 = vst [vmem:[#allocation52_spill] sm:$0xff] %v6825_v14 }
 0x3f3   : > { %v3102_v3 = vadd.f32 %v3101_v36, %v6820_v31  ;;  %v3253_v56 = vpop.f32.mrf.mxu1  ;;  %7710 = vst [vmem:[#allocation43_spill] sm:$0xff] %v6827_v32  ;;  %v7712_v36 = vld [vmem:[#allocation22_spill] sm:$0xff] }
 0x3f4   : > { %v3748_v23 = vmax.f32 %v3443_v27, 0.0  ;;  %v3254_v39 = vadd.f32 %v3253_v56, %v7708_v63  ;;  %v2912_v11 = vpop.f32.mrf.mxu0  ;;  %v6838_v27 = vpop.permute.xlu2 %2649 }
 0x3f5   : > { %v3787_v44 = vmax.f32 %v3102_v3, 0.0  ;;  %v2913_v45 = vadd.f32 %v2912_v11, %v7711_v46  ;;  %v6843_v11 = vld [vmem:[#allocation7 + $0x1a8] sm:$0xff] }
 0x3f6   : > { %4004 = vst [vmem:[%s6243_s27 + $0x4f8] sm:$0xff] %v3748_v23  ;;  %v3622_v9 = vmax.f32 %v3254_v39, 0.0  ;;  %3300 = vmatmul.f32.gmra.mxu1 %v6482_v18  ;;  %3492 = vmatmul.f32.gmra.mxu3 %v6484_v24 }
 0x3f7   : > { %4043 = vst [vmem:[%s6243_s27 + $0x630] sm:$0xff] %v3787_v44  ;;  %v3661_v41 = vmax.f32 %v2913_v45, 0.0  ;;  %2959 = vmatmul.f32.gmra.mxu0 %v6825_v14  ;;  %3151 = vmatmul.f32.gmra.mxu2 %v6827_v32  ;;  %v7713_v45 = vld [vmem:[#allocation33_spill] sm:$0xff] }
 0x3f8   : > { %3878 = vst [vmem:[%s6243_s27 + $0x108] sm:$0xff] %v3622_v9  ;;  %v6845_v9 = vld [vmem:[#allocation7 + $0x3a8] sm:$0xff] }
 0x3f9   : > { %3917 = vst [vmem:[%s6243_s27 + $0x240] sm:$0xff] %v3661_v41  ;;  %v3445_v55 = vpop.f32.mrf.mxu3  ;;  %v7716_v41 = vld [vmem:[#allocation62_spill] sm:$0xff] }
 0x3fa   : > { %v3446_v3 = vadd.f32 %v3445_v55, %v7712_v36  ;;  %v3104_v56 = vpop.f32.mrf.mxu2  ;;  %7714 = vst [vmem:[#allocation29_spill] sm:$0xff] %v6843_v11 }
 0x3fb   : > { %v3105_v18 = vadd.f32 %v3104_v56, %v6838_v27  ;;  %v3256_v23 = vpop.f32.mrf.mxu1  ;;  %7715 = vst [vmem:[#allocation56_spill] sm:$0xff] %v6845_v9  ;;  %v7717_v56 = vld [vmem:[#allocation53_spill] sm:$0xff] }
 0x3fc   : > { %v3750_v24 = vmax.f32 %v3446_v3, 0.0  ;;  %v3257_v63 = vadd.f32 %v3256_v23, %v7713_v45  ;;  %v2915_v39 = vpop.f32.mrf.mxu0  ;;  %v6856_v3 = vpop.permute.xlu0 %2654 }
 0x3fd   : > { %v3789_v44 = vmax.f32 %v3105_v18, 0.0  ;;  %v2916_v32 = vadd.f32 %v2915_v39, %v7716_v41  ;;  %v6861_v39 = vld [vmem:[#allocation7 + $0x1b0] sm:$0xff] }
 0x3fe   : > { %4006 = vst [vmem:[%s6243_s27 + $0x508] sm:$0xff] %v3750_v24  ;;  %v3624_v14 = vmax.f32 %v3257_v63, 0.0  ;;  %3303 = vmatmul.f32.gmra.mxu1 %v6496_v47  ;;  %3495 = vmatmul.f32.gmra.mxu3 %v6498_v8 }
 0x3ff   : > { %4045 = vst [vmem:[%s6243_s27 + $0x640] sm:$0xff] %v3789_v44  ;;  %v3663_v55 = vmax.f32 %v2916_v32, 0.0  ;;  %2962 = vmatmul.f32.gmra.mxu0 %v6843_v11  ;;  %3154 = vmatmul.f32.gmra.mxu2 %v6845_v9  ;;  %v7718_v32 = vld [vmem:[#allocation35_spill] sm:$0xff] }
 0x400   : > { %3880 = vst [vmem:[%s6243_s27 + $0x118] sm:$0xff] %v3624_v14  ;;  %v6863_v14 = vld [vmem:[#allocation7 + $0x3b0] sm:$0xff] }
 0x401   : > { %3919 = vst [vmem:[%s6243_s27 + $0x250] sm:$0xff] %v3663_v55  ;;  %v3448_v36 = vpop.f32.mrf.mxu3  ;;  %v7721_v55 = vld [vmem:[#allocation66_spill] sm:$0xff] }
 0x402   : > { %v3449_v18 = vadd.f32 %v3448_v36, %v7717_v56  ;;  %v3107_v23 = vpop.f32.mrf.mxu2  ;;  %7719 = vst [vmem:[#allocation44_spill] sm:$0xff] %v6861_v39 }
 0x403   : > { %v3108_v47 = vadd.f32 %v3107_v23, %v6856_v3  ;;  %v3259_v24 = vpop.f32.mrf.mxu1  ;;  %7720 = vst [vmem:[#allocation28_spill] sm:$0xff] %v6863_v14  ;;  %v7722_v23 = vld [vmem:[#allocation54_spill] sm:$0xff] }
 0x404   : > { %v3752_v8 = vmax.f32 %v3449_v18, 0.0  ;;  %v3260_v45 = vadd.f32 %v3259_v24, %v7718_v32  ;;  %v2918_v63 = vpop.f32.mrf.mxu0  ;;  %v6874_v18 = vpop.permute.xlu1 %2659 }
 0x405   : > { %v3791_v44 = vmax.f32 %v3108_v47, 0.0  ;;  %v2919_v9 = vadd.f32 %v2918_v63, %v7721_v55  ;;  %v6879_v63 = vld [vmem:[#allocation7 + $0x1b8] sm:$0xff] }
 0x406   : > { %4008 = vst [vmem:[%s6243_s27 + $0x518] sm:$0xff] %v3752_v8  ;;  %v3626_v11 = vmax.f32 %v3260_v45, 0.0  ;;  %3306 = vmatmul.f32.gmra.mxu1 %v6510_v43  ;;  %3498 = vmatmul.f32.gmra.mxu3 %v6512_v16 }
 0x407   : > { %4047 = vst [vmem:[%s6243_s27 + $0x650] sm:$0xff] %v3791_v44  ;;  %v3665_v36 = vmax.f32 %v2919_v9, 0.0  ;;  %2965 = vmatmul.f32.gmra.mxu0 %v6861_v39  ;;  %3157 = vmatmul.f32.gmra.mxu2 %v6863_v14  ;;  %v7723_v9 = vld [vmem:[#allocation34_spill] sm:$0xff] }
 0x408   : > { %3882 = vst [vmem:[%s6243_s27 + $0x128] sm:$0xff] %v3626_v11  ;;  %v6881_v11 = vld [vmem:[#allocation7 + $0x3b8] sm:$0xff] }
 0x409   : > { %3921 = vst [vmem:[%s6243_s27 + $0x260] sm:$0xff] %v3665_v36  ;;  %v3451_v56 = vpop.f32.mrf.mxu3  ;;  %v7726_v36 = vld [vmem:[#allocation68_spill] sm:$0xff] }
 0x40a   : > { %v3452_v47 = vadd.f32 %v3451_v56, %v7722_v23  ;;  %v3110_v24 = vpop.f32.mrf.mxu2  ;;  %7724 = vst [vmem:[#allocation60_spill] sm:$0xff] %v6879_v63  ;;  %v7727_v56 = vld [vmem:[#allocation57_spill] sm:$0xff]  ;;  %v7728_v23 = vld [vmem:[#allocation58_spill] sm:$0xff] }
 0x40b   : > { %v3111_v43 = vadd.f32 %v3110_v24, %v6874_v18  ;;  %v3262_v8 = vpop.f32.mrf.mxu1  ;;  %7725 = vst [vmem:[#allocation23_spill] sm:$0xff] %v6881_v11 }
 0x40c   : > { %v3754_v16 = vmax.f32 %v3452_v47, 0.0  ;;  %v3263_v32 = vadd.f32 %v3262_v8, %v7723_v9  ;;  %v2921_v45 = vpop.f32.mrf.mxu0  ;;  %v6892_v8 = vpop.permute.xlu2 %2664 }
 0x40d   : > { %v3793_v44 = vmax.f32 %v3111_v43, 0.0  ;;  %v2922_v14 = vadd.f32 %v2921_v45, %v7726_v36 }
 0x40e   : > { %4010 = vst [vmem:[%s6243_s27 + $0x528] sm:$0xff] %v3754_v16  ;;  %v3628_v39 = vmax.f32 %v3263_v32, 0.0  ;;  %3309 = vmatmul.f32.gmra.mxu1 %v7727_v56  ;;  %3501 = vmatmul.f32.gmra.mxu3 %v7728_v23  ;;  %v6897_v23 = vld [vmem:[#allocation7 + $0x1c0] sm:$0xff] }
 0x40f   : > { %4049 = vst [vmem:[%s6243_s27 + $0x660] sm:$0xff] %v3793_v44  ;;  %v3667_v24 = vmax.f32 %v2922_v14, 0.0  ;;  %2968 = vmatmul.f32.gmra.mxu0 %v6879_v63  ;;  %3160 = vmatmul.f32.gmra.mxu2 %v6881_v11  ;;  %v7729_v14 = vld [vmem:[#allocation36_spill] sm:$0xff]  ;;  %v7732_v11 = vld [vmem:[#allocation67_spill] sm:$0xff] }
 0x410   : > { %3884 = vst [vmem:[%s6243_s27 + $0x138] sm:$0xff] %v3628_v39  ;;  %v6899_v39 = vld [vmem:[#allocation7 + $0x3c0] sm:$0xff] }
 0x411   : > { %3923 = vst [vmem:[%s6243_s27 + $0x270] sm:$0xff] %v3667_v24  ;;  %v3454_v47 = vpop.f32.mrf.mxu3 }
 0x412   : > { %v3455_v43 = vadd.f32 %v3454_v47, %v6534_v48  ;;  %v3113_v16 = vpop.f32.mrf.mxu2  ;;  %7730 = vst [vmem:[#allocation30_spill] sm:$0xff] %v6897_v23  ;;  %v7733_v48 = vld [vmem:[#allocation63_spill] sm:$0xff]  ;;  %v7734_v47 = vld [vmem:[#allocation64_spill] sm:$0xff] }
 0x413   : > { %v3114_v9 = vadd.f32 %v3113_v16, %v6892_v8  ;;  %v3265_v32 = vpop.f32.mrf.mxu1  ;;  %7731 = vst [vmem:[#allocation59_spill] sm:$0xff] %v6899_v39 }
 0x414   : > { %v3756_v45 = vmax.f32 %v3455_v43, 0.0  ;;  %v3266_v44 = vadd.f32 %v3265_v32, %v7729_v14  ;;  %v2924_v56 = vpop.f32.mrf.mxu0  ;;  %v6910_v32 = vpop.permute.xlu0 %2669 }
 0x415   : > { %v3795_v24 = vmax.f32 %v3114_v9, 0.0  ;;  %v2925_v63 = vadd.f32 %v2924_v56, %v7732_v11 }
 0x416   : > { %4012 = vst [vmem:[%s6243_s27 + $0x538] sm:$0xff] %v3756_v45  ;;  %v3630_v36 = vmax.f32 %v3266_v44, 0.0  ;;  %3312 = vmatmul.f32.gmra.mxu1 %v7733_v48  ;;  %3504 = vmatmul.f32.gmra.mxu3 %v7734_v47  ;;  %v6915_v48 = vld [vmem:[#allocation7 + $0x1c8] sm:$0xff] }
 0x417   : > { %4051 = vst [vmem:[%s6243_s27 + $0x670] sm:$0xff] %v3795_v24  ;;  %v3669_v16 = vmax.f32 %v2925_v63, 0.0  ;;  %2971 = vmatmul.f32.gmra.mxu0 %v6897_v23  ;;  %3163 = vmatmul.f32.gmra.mxu2 %v6899_v39 }
 0x418   : > { %3886 = vst [vmem:[%s6243_s27 + $0x148] sm:$0xff] %v3630_v36  ;;  %v6917_v36 = vld [vmem:[#allocation7 + $0x3c8] sm:$0xff] }
 0x419   : > { %3925 = vst [vmem:[%s6243_s27 + $0x280] sm:$0xff] %v3669_v16  ;;  %v3457_v43 = vpop.f32.mrf.mxu3  ;;  %v7735_v16 = vld [vmem:[#allocation69_spill] sm:$0xff] }
 0x41a   : > { %v3458_v9 = vadd.f32 %v3457_v43, %v6550_v38  ;;  %v3116_v45 = vpop.f32.mrf.mxu2  ;;  %v6928_v43 = vpop.permute.xlu1 %2674 }
 0x41b   : > { %v3117_v14 = vadd.f32 %v3116_v45, %v6910_v32  ;;  %v3268_v44 = vpop.f32.mrf.mxu1 }
 0x41c   : > { %v3758_v56 = vmax.f32 %v3458_v9, 0.0  ;;  %v3269_v63 = vadd.f32 %v3268_v44, %v7655_v62  ;;  %v2927_v24 = vpop.f32.mrf.mxu0 }
 0x41d   : > { %v3797_v47 = vmax.f32 %v3117_v14, 0.0  ;;  %v2928_v39 = vadd.f32 %v2927_v24, %v7735_v16  ;;  %v7736_v24 = vld [vmem:[#allocation71_spill] sm:$0xff] }
 0x41e   : > { %4014 = vst [vmem:[%s6243_s27 + $0x548] sm:$0xff] %v3758_v56  ;;  %v3632_v23 = vmax.f32 %v3269_v63, 0.0  ;;  %3315 = vmatmul.f32.gmra.mxu1 %v6555_v30  ;;  %3507 = vmatmul.f32.gmra.mxu3 %v6557_v53  ;;  %v6933_v56 = vld [vmem:[#allocation7 + $0x1d0] sm:$0xff] }
 0x41f   : > { %4053 = vst [vmem:[%s6243_s27 + $0x680] sm:$0xff] %v3797_v47  ;;  %v3671_v38 = vmax.f32 %v2928_v39, 0.0  ;;  %2974 = vmatmul.f32.gmra.mxu0 %v6915_v48  ;;  %3166 = vmatmul.f32.gmra.mxu2 %v6917_v36 }
 0x420   : > { %3888 = vst [vmem:[%s6243_s27 + $0x158] sm:$0xff] %v3632_v23  ;;  %v6935_v23 = vld [vmem:[#allocation7 + $0x3d0] sm:$0xff] }
 0x421   : > { %3927 = vst [vmem:[%s6243_s27 + $0x290] sm:$0xff] %v3671_v38  ;;  %v3460_v62 = vpop.f32.mrf.mxu3 }
 0x422   : > { %v3461_v9 = vadd.f32 %v3460_v62, %v6568_v57  ;;  %v3119_v45 = vpop.f32.mrf.mxu2  ;;  %v6946_v62 = vpop.permute.xlu2 %2679 }
 0x423   : > { %v3120_v30 = vadd.f32 %v3119_v45, %v6928_v43  ;;  %v3271_v14 = vpop.f32.mrf.mxu1 }
 0x424   : > { %v3760_v53 = vmax.f32 %v3461_v9, 0.0  ;;  %v3272_v39 = vadd.f32 %v3271_v14, %v7656_v61  ;;  %v2930_v44 = vpop.f32.mrf.mxu0 }
 0x425   : > { %v3799_v63 = vmax.f32 %v3120_v30, 0.0  ;;  %v2931_v47 = vadd.f32 %v2930_v44, %v7736_v24  ;;  %v6953_v44 = vld [vmem:[#allocation7 + $0x3d8] sm:$0xff] }
 0x426   : > { %4016 = vst [vmem:[%s6243_s27 + $0x558] sm:$0xff] %v3760_v53  ;;  %v3634_v38 = vmax.f32 %v3272_v39, 0.0  ;;  %3318 = vmatmul.f32.gmra.mxu1 %v6573_v2  ;;  %3510 = vmatmul.f32.gmra.mxu3 %v6575_v21  ;;  %v6951_v39 = vld [vmem:[#allocation7 + $0x1d8] sm:$0xff] }
 0x427   : > { %4055 = vst [vmem:[%s6243_s27 + $0x690] sm:$0xff] %v3799_v63  ;;  %v3673_v57 = vmax.f32 %v2931_v47, 0.0  ;;  %2977 = vmatmul.f32.gmra.mxu0 %v6933_v56  ;;  %3169 = vmatmul.f32.gmra.mxu2 %v6935_v23  ;;  %v7737_v47 = vld [vmem:[#allocation70_spill] sm:$0xff] }
 0x428   : > { %3890 = vst [vmem:[%s6243_s27 + $0x168] sm:$0xff] %v3634_v38 }
 0x429   : > { %3929 = vst [vmem:[%s6243_s27 + $0x2a0] sm:$0xff] %v3673_v57  ;;  %v3463_v61 = vpop.f32.mrf.mxu3 }
 0x42a   : > { %v3464_v9 = vadd.f32 %v3463_v61, %v6586_v19  ;;  %v3122_v45 = vpop.f32.mrf.mxu2  ;;  %v6964_v61 = vpop.permute.xlu0 %2684 }
 0x42b   : > { %v3123_v2 = vadd.f32 %v3122_v45, %v6946_v62  ;;  %v3274_v30 = vpop.f32.mrf.mxu1 }
 0x42c   : > { %v3762_v21 = vmax.f32 %v3464_v9, 0.0  ;;  %v3275_v14 = vadd.f32 %v3274_v30, %v7657_v17  ;;  %v2933_v53 = vpop.f32.mrf.mxu0 }
 0x42d   : > { %v3801_v63 = vmax.f32 %v3123_v2, 0.0  ;;  %v2934_v38 = vadd.f32 %v2933_v53, %v7737_v47  ;;  %v6971_v53 = vld [vmem:[#allocation7 + $0x3e0] sm:$0xff] }
 0x42e   : > { %4018 = vst [vmem:[%s6243_s27 + $0x568] sm:$0xff] %v3762_v21  ;;  %v3636_v57 = vmax.f32 %v3275_v14, 0.0  ;;  %3321 = vmatmul.f32.gmra.mxu1 %v6591_v37  ;;  %3513 = vmatmul.f32.gmra.mxu3 %v6593_v50  ;;  %v6969_v14 = vld [vmem:[#allocation7 + $0x1e0] sm:$0xff] }
 0x42f   : > { %4057 = vst [vmem:[%s6243_s27 + $0x6a0] sm:$0xff] %v3801_v63  ;;  %v3675_v19 = vmax.f32 %v2934_v38, 0.0  ;;  %2980 = vmatmul.f32.gmra.mxu0 %v6951_v39  ;;  %3172 = vmatmul.f32.gmra.mxu2 %v6953_v44  ;;  %v7738_v38 = vld [vmem:[#allocation72_spill] sm:$0xff] }
 0x430   : > { %3892 = vst [vmem:[%s6243_s27 + $0x178] sm:$0xff] %v3636_v57 }
 0x431   : > { %3931 = vst [vmem:[%s6243_s27 + $0x2b0] sm:$0xff] %v3675_v19  ;;  %v3466_v17 = vpop.f32.mrf.mxu3 }
 0x432   : > { %v3467_v9 = vadd.f32 %v3466_v17, %v6604_v33  ;;  %v3125_v45 = vpop.f32.mrf.mxu2  ;;  %v6982_v17 = vpop.permute.xlu1 %2689 }
 0x433   : > { %v3126_v37 = vadd.f32 %v3125_v45, %v6964_v61  ;;  %v3277_v2 = vpop.f32.mrf.mxu1 }
 0x434   : > { %v3764_v50 = vmax.f32 %v3467_v9, 0.0  ;;  %v3278_v30 = vadd.f32 %v3277_v2, %v7658_v26  ;;  %v2936_v21 = vpop.f32.mrf.mxu0 }
 0x435   : > { %v3803_v63 = vmax.f32 %v3126_v37, 0.0  ;;  %v2937_v57 = vadd.f32 %v2936_v21, %v7738_v38  ;;  %v6989_v21 = vld [vmem:[#allocation7 + $0x3e8] sm:$0xff] }
 0x436   : > { %4020 = vst [vmem:[%s6243_s27 + $0x578] sm:$0xff] %v3764_v50  ;;  %v3638_v19 = vmax.f32 %v3278_v30, 0.0  ;;  %3324 = vmatmul.f32.gmra.mxu1 %v6609_v52  ;;  %3516 = vmatmul.f32.gmra.mxu3 %v6611_v10  ;;  %v6987_v30 = vld [vmem:[#allocation7 + $0x1e8] sm:$0xff] }
 0x437   : > { %4059 = vst [vmem:[%s6243_s27 + $0x6b0] sm:$0xff] %v3803_v63  ;;  %v3677_v33 = vmax.f32 %v2937_v57, 0.0  ;;  %2983 = vmatmul.f32.gmra.mxu0 %v6969_v14  ;;  %3175 = vmatmul.f32.gmra.mxu2 %v6971_v53  ;;  %v7739_v57 = vld [vmem:[#allocation74_spill] sm:$0xff] }
 0x438   : > { %3894 = vst [vmem:[%s6243_s27 + $0x188] sm:$0xff] %v3638_v19 }
 0x439   : > { %3933 = vst [vmem:[%s6243_s27 + $0x2c0] sm:$0xff] %v3677_v33  ;;  %v3469_v26 = vpop.f32.mrf.mxu3 }
 0x43a   : > { %v3470_v9 = vadd.f32 %v3469_v26, %v6622_v49  ;;  %v3128_v45 = vpop.f32.mrf.mxu2  ;;  %v7000_v26 = vpop.permute.xlu2 %2694 }
 0x43b   : > { %v3129_v52 = vadd.f32 %v3128_v45, %v6982_v17  ;;  %v3280_v37 = vpop.f32.mrf.mxu1 }
 0x43c   : > { %v3766_v10 = vmax.f32 %v3470_v9, 0.0  ;;  %v3281_v2 = vadd.f32 %v3280_v37, %v7659_v13  ;;  %v2939_v50 = vpop.f32.mrf.mxu0 }
 0x43d   : > { %v3805_v63 = vmax.f32 %v3129_v52, 0.0  ;;  %v2940_v19 = vadd.f32 %v2939_v50, %v7739_v57  ;;  %v7007_v50 = vld [vmem:[#allocation7 + $0x3f0] sm:$0xff] }
 0x43e   : > { %4022 = vst [vmem:[%s6243_s27 + $0x588] sm:$0xff] %v3766_v10  ;;  %v3640_v33 = vmax.f32 %v3281_v2, 0.0  ;;  %3327 = vmatmul.f32.gmra.mxu1 %v6627_v15  ;;  %3519 = vmatmul.f32.gmra.mxu3 %v6629_v51  ;;  %v7005_v2 = vld [vmem:[#allocation7 + $0x1f0] sm:$0xff] }
 0x43f   : > { %4061 = vst [vmem:[%s6243_s27 + $0x6c0] sm:$0xff] %v3805_v63  ;;  %v3679_v49 = vmax.f32 %v2940_v19, 0.0  ;;  %2986 = vmatmul.f32.gmra.mxu0 %v6987_v30  ;;  %3178 = vmatmul.f32.gmra.mxu2 %v6989_v21  ;;  %v7740_v19 = vld [vmem:[#allocation73_spill] sm:$0xff] }
 0x440   : > { %3896 = vst [vmem:[%s6243_s27 + $0x198] sm:$0xff] %v3640_v33 }
 0x441   : > { %3935 = vst [vmem:[%s6243_s27 + $0x2d0] sm:$0xff] %v3679_v49  ;;  %v3472_v13 = vpop.f32.mrf.mxu3 }
 0x442   : > { %v3473_v9 = vadd.f32 %v3472_v13, %v6640_v1  ;;  %v3131_v45 = vpop.f32.mrf.mxu2  ;;  %v7018_v13 = vpop.permute.xlu0 %2699 }
 0x443   : > { %v3132_v15 = vadd.f32 %v3131_v45, %v7000_v26  ;;  %v3283_v52 = vpop.f32.mrf.mxu1 }
 0x444   : > { %v3768_v51 = vmax.f32 %v3473_v9, 0.0  ;;  %v3284_v37 = vadd.f32 %v3283_v52, %v7660_v25  ;;  %v2942_v10 = vpop.f32.mrf.mxu0 }
 0x445   : > { %v3807_v63 = vmax.f32 %v3132_v15, 0.0  ;;  %v2943_v33 = vadd.f32 %v2942_v10, %v7740_v19  ;;  %v7025_v10 = vld [vmem:[#allocation7 + $0x3f8] sm:$0xff] }
 0x446   : > { %4024 = vst [vmem:[%s6243_s27 + $0x598] sm:$0xff] %v3768_v51  ;;  %v3642_v49 = vmax.f32 %v3284_v37, 0.0  ;;  %3330 = vmatmul.f32.gmra.mxu1 %v6645_v54  ;;  %3522 = vmatmul.f32.gmra.mxu3 %v6647_v29  ;;  %v7023_v37 = vld [vmem:[#allocation7 + $0x1f8] sm:$0xff] }
 0x447   : > { %4063 = vst [vmem:[%s6243_s27 + $0x6d0] sm:$0xff] %v3807_v63  ;;  %v3681_v1 = vmax.f32 %v2943_v33, 0.0  ;;  %2989 = vmatmul.f32.gmra.mxu0 %v7005_v2  ;;  %3181 = vmatmul.f32.gmra.mxu2 %v7007_v50  ;;  %v7743_v33 = vld [vmem:[#allocation75_spill] sm:$0xff] }
 0x448   : > { %3898 = vst [vmem:[%s6243_s27 + $0x1a8] sm:$0xff] %v3642_v49 }
 0x449   : > { %3937 = vst [vmem:[%s6243_s27 + $0x2e0] sm:$0xff] %v3681_v1  ;;  %v3475_v25 = vpop.f32.mrf.mxu3 }
 0x44a   : > { %v3476_v9 = vadd.f32 %v3475_v25, %v6658_v35  ;;  %v3134_v45 = vpop.f32.mrf.mxu2  ;;  %7741 = vst [vmem:[#allocation48_spill] sm:$0xff] %v7023_v37  ;;  %v7744_v35 = vld [vmem:[#allocation38_spill] sm:$0xff]  ;;  %v7745_v25 = vld [vmem:[#allocation37_spill] sm:$0xff] }
 0x44b   : > { %v3135_v54 = vadd.f32 %v3134_v45, %v7018_v13  ;;  %v3286_v15 = vpop.f32.mrf.mxu1  ;;  %7742 = vst [vmem:[#allocation32_spill] sm:$0xff] %v7025_v10 }
 0x44c   : > { %v3770_v29 = vmax.f32 %v3476_v9, 0.0  ;;  %v3287_v52 = vadd.f32 %v3286_v15, %v7663_v34  ;;  %v2945_v51 = vpop.f32.mrf.mxu0  ;;  %v7036_v9 = vpop.permute.xlu1 %2704 }
 0x44d   : > { %v3809_v63 = vmax.f32 %v3135_v54, 0.0  ;;  %v2946_v49 = vadd.f32 %v2945_v51, %v7743_v33  ;;  %7746 = vst [vmem:[#allocation61_spill] sm:$0xff] %v7036_v9 }
 0x44e   : > { %4026 = vst [vmem:[%s6243_s27 + $0x5a8] sm:$0xff] %v3770_v29  ;;  %v3644_v1 = vmax.f32 %v3287_v52, 0.0  ;;  %3333 = vmatmul.f32.gmra.mxu1 %v7744_v35  ;;  %3525 = vmatmul.f32.gmra.mxu3 %v7745_v25  ;;  %v7747_v25 = vld [vmem:[#allocation77_spill] sm:$0xff] }
 0x44f   : > { %4065 = vst [vmem:[%s6243_s27 + $0x6e0] sm:$0xff] %v3809_v63  ;;  %v3683_v45 = vmax.f32 %v2946_v49, 0.0  ;;  %2992 = vmatmul.f32.gmra.mxu0 %v7023_v37  ;;  %3184 = vmatmul.f32.gmra.mxu2 %v7025_v10  ;;  %v7748_v10 = vld [vmem:[#allocation41_spill] sm:$0xff] }
 0x450   : > { %3900 = vst [vmem:[%s6243_s27 + $0x1b8] sm:$0xff] %v3644_v1  ;;  %v7749_v37 = vld [vmem:[#allocation45_spill] sm:$0xff] }
 0x451   : > { %3939 = vst [vmem:[%s6243_s27 + $0x2f0] sm:$0xff] %v3683_v45  ;;  %v3478_v34 = vpop.f32.mrf.mxu3 }
 0x452   : > { %v3479_v54 = vadd.f32 %v3478_v34, %v6676_v58  ;;  %v3137_v15 = vpop.f32.mrf.mxu2 }
 0x453   : > { %v3138_v29 = vadd.f32 %v3137_v15, %v7036_v9  ;;  %v3289_v52 = vpop.f32.mrf.mxu1  ;;  %v7754_v9 = vld [vmem:[#allocation50_spill] sm:$0xff] }
 0x454   : > { %v3772_v51 = vmax.f32 %v3479_v54, 0.0  ;;  %v3290_v63 = vadd.f32 %v3289_v52, %v7668_v59  ;;  %v2948_v49 = vpop.f32.mrf.mxu0  ;;  %v7048_v54 = vpop.permute.xlu2 %2709  ;;  %v7750_v59 = vld [vmem:[#allocation42_spill] sm:$0xff] }
 0x455   : > { %v3811_v35 = vmax.f32 %v3138_v29, 0.0  ;;  %v2949_v1 = vadd.f32 %v2948_v49, %v7747_v25  ;;  %v7753_v25 = vld [vmem:[#allocation46_spill] sm:$0xff] }
 0x456   : > { %4028 = vst [vmem:[%s6243_s27 + $0x5b8] sm:$0xff] %v3772_v51  ;;  %v3646_v45 = vmax.f32 %v3290_v63, 0.0  ;;  %3336 = vmatmul.f32.gmra.mxu1 %v7748_v10  ;;  %3528 = vmatmul.f32.gmra.mxu3 %v7749_v37  ;;  %v7751_v63 = vld [vmem:[#allocation51_spill] sm:$0xff] }
 0x457   : > { %4067 = vst [vmem:[%s6243_s27 + $0x6f0] sm:$0xff] %v3811_v35  ;;  %v3685_v58 = vmax.f32 %v2949_v1, 0.0  ;;  %v7752_v1 = vld [vmem:[#allocation76_spill] sm:$0xff] }
 0x458   : > { %3902 = vst [vmem:[%s6243_s27 + $0x1c8] sm:$0xff] %v3646_v45 }
 0x459   : > { %3941 = vst [vmem:[%s6243_s27 + $0x300] sm:$0xff] %v3685_v58  ;;  %v3481_v34 = vpop.f32.mrf.mxu3 }
 0x45a   : > { %v3482_v15 = vadd.f32 %v3481_v34, %v7750_v59  ;;  %v3140_v29 = vpop.f32.mrf.mxu2 }
 0x45b   : > { %v3141_v52 = vadd.f32 %v3140_v29, %v7048_v54  ;;  %v3292_v51 = vpop.f32.mrf.mxu1 }
 0x45c   : > { %v3774_v10 = vmax.f32 %v3482_v15, 0.0  ;;  %v3293_v37 = vadd.f32 %v3292_v51, %v7751_v63  ;;  %v2951_v49 = vpop.f32.mrf.mxu0  ;;  %v7060_v15 = vpop.permute.xlu0 %2714 }
 0x45d   : > { %v3813_v35 = vmax.f32 %v3141_v52, 0.0  ;;  %v2952_v45 = vadd.f32 %v2951_v49, %v7752_v1  ;;  %v7755_v49 = vld [vmem:[#allocation78_spill] sm:$0xff] }
 0x45e   : > { %4030 = vst [vmem:[%s6243_s27 + $0x5c8] sm:$0xff] %v3774_v10  ;;  %v3648_v58 = vmax.f32 %v3293_v37, 0.0  ;;  %3339 = vmatmul.f32.gmra.mxu1 %v7753_v25  ;;  %3531 = vmatmul.f32.gmra.mxu3 %v7754_v9 }
 0x45f   : > { %4069 = vst [vmem:[%s6243_s27 + $0x700] sm:$0xff] %v3813_v35  ;;  %v3687_v34 = vmax.f32 %v2952_v45, 0.0 }
 0x460   : > { %3904 = vst [vmem:[%s6243_s27 + $0x1d8] sm:$0xff] %v3648_v58  ;;  %v7756_v58 = vld [vmem:[#allocation18_spill] sm:$0xff] }
 0x461   : > { %3943 = vst [vmem:[%s6243_s27 + $0x310] sm:$0xff] %v3687_v34  ;;  %v3484_v59 = vpop.f32.mrf.mxu3  ;;  %v7757_v34 = vld [vmem:[#allocation24_spill] sm:$0xff] }
 0x462   : > { %v3485_v29 = vadd.f32 %v3484_v59, %v6712_v28  ;;  %v3143_v52 = vpop.f32.mrf.mxu2 }
 0x463   : > { %v3144_v51 = vadd.f32 %v3143_v52, %v7060_v15  ;;  %v3295_v10 = vpop.f32.mrf.mxu1 }
 0x464   : > { %v3776_v25 = vmax.f32 %v3485_v29, 0.0  ;;  %v3296_v9 = vadd.f32 %v3295_v10, %v7681_v7  ;;  %v2954_v63 = vpop.f32.mrf.mxu0  ;;  %v7072_v29 = vpop.permute.xlu1 %2719 }
 0x465   : > { %v3815_v37 = vmax.f32 %v3144_v51, 0.0  ;;  %v2955_v35 = vadd.f32 %v2954_v63, %v7755_v49 }
 0x466   : > { %4032 = vst [vmem:[%s6243_s27 + $0x5d8] sm:$0xff] %v3776_v25  ;;  %v3650_v45 = vmax.f32 %v3296_v9, 0.0  ;;  %3342 = vmatmul.f32.gmra.mxu1 %v7756_v58  ;;  %3534 = vmatmul.f32.gmra.mxu3 %v7757_v34  ;;  %v7759_v34 = vld [vmem:[#allocation47_spill] sm:$0xff] }
 0x467   : > { %4071 = vst [vmem:[%s6243_s27 + $0x710] sm:$0xff] %v3815_v37  ;;  %v3689_v28 = vmax.f32 %v2955_v35, 0.0  ;;  %v7758_v35 = vld [vmem:[#allocation80_spill] sm:$0xff] }
 0x468   : > { %3906 = vst [vmem:[%s6243_s27 + $0x1e8] sm:$0xff] %v3650_v45 }
 0x469   : > { %3945 = vst [vmem:[%s6243_s27 + $0x320] sm:$0xff] %v3689_v28  ;;  %v3487_v59 = vpop.f32.mrf.mxu3  ;;  %v7760_v28 = vld [vmem:[#allocation20_spill] sm:$0xff] }
 0x46a   : > { %v3488_v7 = vadd.f32 %v3487_v59, %v6730_v12  ;;  %v3146_v52 = vpop.f32.mrf.mxu2 }
 0x46b   : > { %v3147_v51 = vadd.f32 %v3146_v52, %v7072_v29  ;;  %v3298_v10 = vpop.f32.mrf.mxu1 }
 0x46c   : > { %v3778_v25 = vmax.f32 %v3488_v7, 0.0  ;;  %v3299_v9 = vadd.f32 %v3298_v10, %v7686_v5  ;;  %v2957_v63 = vpop.f32.mrf.mxu0  ;;  %v7084_v7 = vpop.permute.xlu2 %2724 }
 0x46d   : > { %v3817_v37 = vmax.f32 %v3147_v51, 0.0  ;;  %v2958_v45 = vadd.f32 %v2957_v63, %v7758_v35 }
 0x46e   : > { %4034 = vst [vmem:[%s6243_s27 + $0x5e8] sm:$0xff] %v3778_v25  ;;  %v3652_v58 = vmax.f32 %v3299_v9, 0.0  ;;  %3345 = vmatmul.f32.gmra.mxu1 %v7759_v34  ;;  %3537 = vmatmul.f32.gmra.mxu3 %v7760_v28  ;;  %v7762_v28 = vld [vmem:[#allocation26_spill] sm:$0xff] }
 0x46f   : > { %4073 = vst [vmem:[%s6243_s27 + $0x720] sm:$0xff] %v3817_v37  ;;  %v3691_v12 = vmax.f32 %v2958_v45, 0.0  ;;  %v7761_v45 = vld [vmem:[#allocation79_spill] sm:$0xff] }
 0x470   : > { %3908 = vst [vmem:[%s6243_s27 + $0x1f8] sm:$0xff] %v3652_v58 }
 0x471   : > { %3947 = vst [vmem:[%s6243_s27 + $0x330] sm:$0xff] %v3691_v12  ;;  %v3490_v59 = vpop.f32.mrf.mxu3  ;;  %v7763_v12 = vld [vmem:[#allocation19_spill] sm:$0xff] }
 0x472   : > { %v3491_v5 = vadd.f32 %v3490_v59, %v6748_v42  ;;  %v3149_v52 = vpop.f32.mrf.mxu2 }
 0x473   : > { %v3150_v51 = vadd.f32 %v3149_v52, %v7084_v7  ;;  %v3301_v10 = vpop.f32.mrf.mxu1 }
 0x474   : > { %v3780_v25 = vmax.f32 %v3491_v5, 0.0  ;;  %v3302_v9 = vadd.f32 %v3301_v10, %v7691_v6  ;;  %v2960_v63 = vpop.f32.mrf.mxu0  ;;  %v7096_v5 = vpop.permute.xlu0 %2729 }
 0x475   : > { %v3819_v37 = vmax.f32 %v3150_v51, 0.0  ;;  %v2961_v58 = vadd.f32 %v2960_v63, %v7761_v45 }
 0x476   : > { %4036 = vst [vmem:[%s6243_s27 + $0x5f8] sm:$0xff] %v3780_v25  ;;  %v3654_v34 = vmax.f32 %v3302_v9, 0.0  ;;  %3348 = vmatmul.f32.gmra.mxu1 %v7762_v28  ;;  %3540 = vmatmul.f32.gmra.mxu3 %v7763_v12  ;;  %v7765_v12 = vld [vmem:[#allocation39_spill] sm:$0xff] }
 0x477   : > { %4075 = vst [vmem:[%s6243_s27 + $0x730] sm:$0xff] %v3819_v37  ;;  %v3693_v42 = vmax.f32 %v2961_v58, 0.0  ;;  %v7764_v58 = vld [vmem:[#allocation81_spill] sm:$0xff] }
 0x478   : > { %3910 = vst [vmem:[%s6243_s27 + $0x208] sm:$0xff] %v3654_v34 }
 0x479   : > { %3949 = vst [vmem:[%s6243_s27 + $0x340] sm:$0xff] %v3693_v42  ;;  %v3493_v59 = vpop.f32.mrf.mxu3  ;;  %v7766_v42 = vld [vmem:[#allocation40_spill] sm:$0xff] }
 0x47a   : > { %v3494_v6 = vadd.f32 %v3493_v59, %v6766_v60  ;;  %v3152_v52 = vpop.f32.mrf.mxu2 }
 0x47b   : > { %v3153_v51 = vadd.f32 %v3152_v52, %v7096_v5  ;;  %v3304_v10 = vpop.f32.mrf.mxu1 }
 0x47c   : > { %v3782_v25 = vmax.f32 %v3494_v6, 0.0  ;;  %v3305_v9 = vadd.f32 %v3304_v10, %v7696_v22  ;;  %v2963_v63 = vpop.f32.mrf.mxu0  ;;  %v7108_v6 = vpop.permute.xlu1 %2734 }
 0x47d   : > { %v3821_v37 = vmax.f32 %v3153_v51, 0.0  ;;  %v2964_v34 = vadd.f32 %v2963_v63, %v7764_v58 }
 0x47e   : > { %4038 = vst [vmem:[%s6243_s27 + $0x608] sm:$0xff] %v3782_v25  ;;  %v3656_v28 = vmax.f32 %v3305_v9, 0.0  ;;  %3351 = vmatmul.f32.gmra.mxu1 %v7765_v12  ;;  %3543 = vmatmul.f32.gmra.mxu3 %v7766_v42  ;;  %v7768_v42 = vld [vmem:[#allocation25_spill] sm:$0xff] }
 0x47f   : > { %4077 = vst [vmem:[%s6243_s27 + $0x740] sm:$0xff] %v3821_v37  ;;  %v3695_v60 = vmax.f32 %v2964_v34, 0.0  ;;  %v7767_v34 = vld [vmem:[#allocation83_spill] sm:$0xff] }
 0x480   : > { %3912 = vst [vmem:[%s6243_s27 + $0x218] sm:$0xff] %v3656_v28 }
 0x481   : > { %3951 = vst [vmem:[%s6243_s27 + $0x350] sm:$0xff] %v3695_v60  ;;  %v3496_v59 = vpop.f32.mrf.mxu3  ;;  %v7769_v60 = vld [vmem:[#allocation55_spill] sm:$0xff] }
 0x482   : > { %v3497_v22 = vadd.f32 %v3496_v59, %v6784_v0  ;;  %v3155_v52 = vpop.f32.mrf.mxu2 }
 0x483   : > { %v3156_v51 = vadd.f32 %v3155_v52, %v7108_v6  ;;  %v3307_v10 = vpop.f32.mrf.mxu1 }
 0x484   : > { %v3784_v25 = vmax.f32 %v3497_v22, 0.0  ;;  %v3308_v9 = vadd.f32 %v3307_v10, %v7701_v4  ;;  %v2966_v63 = vpop.f32.mrf.mxu0  ;;  %v7120_v22 = vpop.permute.xlu2 %2739 }
 0x485   : > { %v3823_v37 = vmax.f32 %v3156_v51, 0.0  ;;  %v2967_v28 = vadd.f32 %v2966_v63, %v7767_v34 }
 0x486   : > { %4040 = vst [vmem:[%s6243_s27 + $0x618] sm:$0xff] %v3784_v25  ;;  %v3658_v12 = vmax.f32 %v3308_v9, 0.0  ;;  %3354 = vmatmul.f32.gmra.mxu1 %v7768_v42  ;;  %3546 = vmatmul.f32.gmra.mxu3 %v7769_v60  ;;  %v7771_v60 = vld [vmem:[#allocation21_spill] sm:$0xff] }
 0x487   : > { %4079 = vst [vmem:[%s6243_s27 + $0x750] sm:$0xff] %v3823_v37  ;;  %v3697_v0 = vmax.f32 %v2967_v28, 0.0  ;;  %v7770_v28 = vld [vmem:[#allocation82_spill] sm:$0xff] }
 0x488   : > { %3914 = vst [vmem:[%s6243_s27 + $0x228] sm:$0xff] %v3658_v12 }
 0x489   : > { %3953 = vst [vmem:[%s6243_s27 + $0x360] sm:$0xff] %v3697_v0  ;;  %v3499_v59 = vpop.f32.mrf.mxu3  ;;  %v7772_v0 = vld [vmem:[#allocation27_spill] sm:$0xff] }
 0x48a   : > { %v3500_v4 = vadd.f32 %v3499_v59, %v6802_v40  ;;  %v3158_v52 = vpop.f32.mrf.mxu2 }
 0x48b   : > { %v3159_v51 = vadd.f32 %v3158_v52, %v7120_v22  ;;  %v3310_v10 = vpop.f32.mrf.mxu1 }
 0x48c   : > { %v3786_v25 = vmax.f32 %v3500_v4, 0.0  ;;  %v3311_v9 = vadd.f32 %v3310_v10, %v7706_v20  ;;  %v2969_v63 = vpop.f32.mrf.mxu0  ;;  %v7132_v4 = vpop.permute.xlu0 %2744 }
 0x48d   : > { %v3825_v37 = vmax.f32 %v3159_v51, 0.0  ;;  %v2970_v12 = vadd.f32 %v2969_v63, %v7770_v28 }
 0x48e   : > { %4042 = vst [vmem:[%s6243_s27 + $0x628] sm:$0xff] %v3786_v25  ;;  %v3660_v42 = vmax.f32 %v3311_v9, 0.0  ;;  %3357 = vmatmul.f32.gmra.mxu1 %v7771_v60  ;;  %3549 = vmatmul.f32.gmra.mxu3 %v7772_v0  ;;  %v7774_v0 = vld [vmem:[#allocation52_spill] sm:$0xff] }
 0x48f   : > { %4081 = vst [vmem:[%s6243_s27 + $0x760] sm:$0xff] %v3825_v37  ;;  %v3699_v40 = vmax.f32 %v2970_v12, 0.0  ;;  %v7773_v12 = vld [vmem:[#allocation84_spill] sm:$0xff] }
 0x490   : > { %3916 = vst [vmem:[%s6243_s27 + $0x238] sm:$0xff] %v3660_v42 }
 0x491   : > { %3955 = vst [vmem:[%s6243_s27 + $0x370] sm:$0xff] %v3699_v40  ;;  %v3502_v59 = vpop.f32.mrf.mxu3  ;;  %v7775_v40 = vld [vmem:[#allocation43_spill] sm:$0xff] }
 0x492   : > { %v3503_v20 = vadd.f32 %v3502_v59, %v6820_v31  ;;  %v3161_v52 = vpop.f32.mrf.mxu2 }
 0x493   : > { %v3162_v51 = vadd.f32 %v3161_v52, %v7132_v4  ;;  %v3313_v10 = vpop.f32.mrf.mxu1 }
 0x494   : > { %v3788_v25 = vmax.f32 %v3503_v20, 0.0  ;;  %v3314_v9 = vadd.f32 %v3313_v10, %v7711_v46  ;;  %v2972_v63 = vpop.f32.mrf.mxu0  ;;  %v7144_v20 = vpop.permute.xlu1 %2749 }
 0x495   : > { %v3827_v37 = vmax.f32 %v3162_v51, 0.0  ;;  %v2973_v42 = vadd.f32 %v2972_v63, %v7773_v12 }
 0x496   : > { %4044 = vst [vmem:[%s6243_s27 + $0x638] sm:$0xff] %v3788_v25  ;;  %v3662_v60 = vmax.f32 %v3314_v9, 0.0  ;;  %3360 = vmatmul.f32.gmra.mxu1 %v7774_v0  ;;  %3552 = vmatmul.f32.gmra.mxu3 %v7775_v40  ;;  %v7777_v40 = vld [vmem:[#allocation29_spill] sm:$0xff] }
 0x497   : > { %4083 = vst [vmem:[%s6243_s27 + $0x770] sm:$0xff] %v3827_v37  ;;  %v3701_v31 = vmax.f32 %v2973_v42, 0.0  ;;  %v7776_v42 = vld [vmem:[#allocation86_spill] sm:$0xff] }
 0x498   : > { %3918 = vst [vmem:[%s6243_s27 + $0x248] sm:$0xff] %v3662_v60 }
 0x499   : > { %3957 = vst [vmem:[%s6243_s27 + $0x380] sm:$0xff] %v3701_v31  ;;  %v3505_v59 = vpop.f32.mrf.mxu3  ;;  %v7778_v31 = vld [vmem:[#allocation56_spill] sm:$0xff] }
 0x49a   : > { %v3506_v46 = vadd.f32 %v3505_v59, %v6838_v27  ;;  %v3164_v52 = vpop.f32.mrf.mxu2 }
 0x49b   : > { %v3165_v51 = vadd.f32 %v3164_v52, %v7144_v20  ;;  %v3316_v10 = vpop.f32.mrf.mxu1 }
 0x49c   : > { %v3790_v25 = vmax.f32 %v3506_v46, 0.0  ;;  %v3317_v9 = vadd.f32 %v3316_v10, %v7716_v41  ;;  %v2975_v63 = vpop.f32.mrf.mxu0  ;;  %v7156_v46 = vpop.permute.xlu2 %2754 }
 0x49d   : > { %v3829_v37 = vmax.f32 %v3165_v51, 0.0  ;;  %v2976_v60 = vadd.f32 %v2975_v63, %v7776_v42 }
 0x49e   : > { %4046 = vst [vmem:[%s6243_s27 + $0x648] sm:$0xff] %v3790_v25  ;;  %v3664_v0 = vmax.f32 %v3317_v9, 0.0  ;;  %3363 = vmatmul.f32.gmra.mxu1 %v7777_v40  ;;  %3555 = vmatmul.f32.gmra.mxu3 %v7778_v31  ;;  %v7780_v31 = vld [vmem:[#allocation44_spill] sm:$0xff] }
 0x49f   : > { %4085 = vst [vmem:[%s6243_s27 + $0x780] sm:$0xff] %v3829_v37  ;;  %v3703_v27 = vmax.f32 %v2976_v60, 0.0  ;;  %v7779_v60 = vld [vmem:[#allocation85_spill] sm:$0xff] }
 0x4a0   : > { %3920 = vst [vmem:[%s6243_s27 + $0x258] sm:$0xff] %v3664_v0 }
 0x4a1   : > { %3959 = vst [vmem:[%s6243_s27 + $0x390] sm:$0xff] %v3703_v27  ;;  %v3508_v59 = vpop.f32.mrf.mxu3  ;;  %v7781_v27 = vld [vmem:[#allocation28_spill] sm:$0xff] }
 0x4a2   : > { %v3509_v41 = vadd.f32 %v3508_v59, %v6856_v3  ;;  %v3167_v52 = vpop.f32.mrf.mxu2 }
 0x4a3   : > { %v3168_v51 = vadd.f32 %v3167_v52, %v7156_v46  ;;  %v3319_v10 = vpop.f32.mrf.mxu1 }
 0x4a4   : > { %v3792_v25 = vmax.f32 %v3509_v41, 0.0  ;;  %v3320_v9 = vadd.f32 %v3319_v10, %v7721_v55  ;;  %v2978_v63 = vpop.f32.mrf.mxu0  ;;  %v7168_v41 = vpop.permute.xlu0 %2759 }
 0x4a5   : > { %v3831_v37 = vmax.f32 %v3168_v51, 0.0  ;;  %v2979_v0 = vadd.f32 %v2978_v63, %v7779_v60  ;;  %v7785_v60 = vld [vmem:[#allocation23_spill] sm:$0xff] }
 0x4a6   : > { %4048 = vst [vmem:[%s6243_s27 + $0x658] sm:$0xff] %v3792_v25  ;;  %v3666_v40 = vmax.f32 %v3320_v9, 0.0  ;;  %3366 = vmatmul.f32.gmra.mxu1 %v7780_v31  ;;  %3558 = vmatmul.f32.gmra.mxu3 %v7781_v27  ;;  %v7782_v9 = vld [vmem:[#allocation68_spill] sm:$0xff] }
 0x4a7   : > { %4087 = vst [vmem:[%s6243_s27 + $0x790] sm:$0xff] %v3831_v37  ;;  %v3705_v3 = vmax.f32 %v2979_v0, 0.0  ;;  %v7783_v0 = vld [vmem:[#allocation87_spill] sm:$0xff] }
 0x4a8   : > { %3922 = vst [vmem:[%s6243_s27 + $0x268] sm:$0xff] %v3666_v40 }
 0x4a9   : > { %3961 = vst [vmem:[%s6243_s27 + $0x3a0] sm:$0xff] %v3705_v3  ;;  %v3511_v59 = vpop.f32.mrf.mxu3  ;;  %v7784_v3 = vld [vmem:[#allocation60_spill] sm:$0xff] }
 0x4aa   : > { %v3512_v55 = vadd.f32 %v3511_v59, %v6874_v18  ;;  %v3170_v52 = vpop.f32.mrf.mxu2 }
 0x4ab   : > { %v3171_v51 = vadd.f32 %v3170_v52, %v7168_v41  ;;  %v3322_v10 = vpop.f32.mrf.mxu1 }
 0x4ac   : > { %v3794_v25 = vmax.f32 %v3512_v55, 0.0  ;;  %v3323_v63 = vadd.f32 %v3322_v10, %v7782_v9  ;;  %v2981_v31 = vpop.f32.mrf.mxu0  ;;  %v7180_v55 = vpop.permute.xlu1 %2764 }
 0x4ad   : > { %v3833_v37 = vmax.f32 %v3171_v51, 0.0  ;;  %v2982_v40 = vadd.f32 %v2981_v31, %v7783_v0 }
 0x4ae   : > { %4050 = vst [vmem:[%s6243_s27 + $0x668] sm:$0xff] %v3794_v25  ;;  %v3668_v27 = vmax.f32 %v3323_v63, 0.0  ;;  %3369 = vmatmul.f32.gmra.mxu1 %v7784_v3  ;;  %3561 = vmatmul.f32.gmra.mxu3 %v7785_v60  ;;  %v7787_v3 = vld [vmem:[#allocation30_spill] sm:$0xff] }
 0x4af   : > { %4089 = vst [vmem:[%s6243_s27 + $0x7a0] sm:$0xff] %v3833_v37  ;;  %v3707_v18 = vmax.f32 %v2982_v40, 0.0  ;;  %v7786_v37 = vld [vmem:[#allocation89_spill] sm:$0xff] }
 0x4b0   : > { %3924 = vst [vmem:[%s6243_s27 + $0x278] sm:$0xff] %v3668_v27 }
 0x4b1   : > { %3963 = vst [vmem:[%s6243_s27 + $0x3b0] sm:$0xff] %v3707_v18  ;;  %v3514_v59 = vpop.f32.mrf.mxu3  ;;  %v7788_v18 = vld [vmem:[#allocation59_spill] sm:$0xff] }
 0x4b2   : > { %v3515_v52 = vadd.f32 %v3514_v59, %v6892_v8  ;;  %v3173_v51 = vpop.f32.mrf.mxu2 }
 0x4b3   : > { %v3174_v10 = vadd.f32 %v3173_v51, %v7180_v55  ;;  %v3325_v25 = vpop.f32.mrf.mxu1 }
 0x4b4   : > { %v3796_v9 = vmax.f32 %v3515_v52, 0.0  ;;  %v3326_v60 = vadd.f32 %v3325_v25, %v7732_v11  ;;  %v2984_v63 = vpop.f32.mrf.mxu0  ;;  %v7192_v52 = vpop.permute.xlu2 %2769 }
 0x4b5   : > { %v3835_v31 = vmax.f32 %v3174_v10, 0.0  ;;  %v2985_v40 = vadd.f32 %v2984_v63, %v7786_v37 }
 0x4b6   : > { %4052 = vst [vmem:[%s6243_s27 + $0x678] sm:$0xff] %v3796_v9  ;;  %v3670_v27 = vmax.f32 %v3326_v60, 0.0  ;;  %3372 = vmatmul.f32.gmra.mxu1 %v7787_v3  ;;  %3564 = vmatmul.f32.gmra.mxu3 %v7788_v18 }
 0x4b7   : > { %4091 = vst [vmem:[%s6243_s27 + $0x7b0] sm:$0xff] %v3835_v31  ;;  %v3709_v8 = vmax.f32 %v2985_v40, 0.0  ;;  %v7789_v40 = vld [vmem:[#allocation88_spill] sm:$0xff] }
 0x4b8   : > { %3926 = vst [vmem:[%s6243_s27 + $0x288] sm:$0xff] %v3670_v27 }
 0x4b9   : > { %3965 = vst [vmem:[%s6243_s27 + $0x3c0] sm:$0xff] %v3709_v8  ;;  %v3517_v59 = vpop.f32.mrf.mxu3  ;;  %v7204_v8 = vpop.permute.xlu0 %2774 }
 0x4ba   : > { %v3518_v11 = vadd.f32 %v3517_v59, %v6910_v32  ;;  %v3176_v51 = vpop.f32.mrf.mxu2 }
 0x4bb   : > { %v3177_v10 = vadd.f32 %v3176_v51, %v7192_v52  ;;  %v3328_v25 = vpop.f32.mrf.mxu1 }
 0x4bc   : > { %v3798_v9 = vmax.f32 %v3518_v11, 0.0  ;;  %v3329_v60 = vadd.f32 %v3328_v25, %v7735_v16  ;;  %v2987_v63 = vpop.f32.mrf.mxu0 }
 0x4bd   : > { %v3837_v31 = vmax.f32 %v3177_v10, 0.0  ;;  %v2988_v27 = vadd.f32 %v2987_v63, %v7789_v40 }
 0x4be   : > { %4054 = vst [vmem:[%s6243_s27 + $0x688] sm:$0xff] %v3798_v9  ;;  %v3672_v3 = vmax.f32 %v3329_v60, 0.0  ;;  %3375 = vmatmul.f32.gmra.mxu1 %v6915_v48  ;;  %3567 = vmatmul.f32.gmra.mxu3 %v6917_v36  ;;  %v7790_v9 = vld [vmem:[#allocation90_spill] sm:$0xff] }
 0x4bf   : > { %4093 = vst [vmem:[%s6243_s27 + $0x7c0] sm:$0xff] %v3837_v31  ;;  %v3711_v32 = vmax.f32 %v2988_v27, 0.0  ;;  %v7216_v27 = vpop.permute.xlu1 %2779 }
 0x4c0   : > { %3928 = vst [vmem:[%s6243_s27 + $0x298] sm:$0xff] %v3672_v3 }
 0x4c1   : > { %3967 = vst [vmem:[%s6243_s27 + $0x3d0] sm:$0xff] %v3711_v32  ;;  %v3520_v18 = vpop.f32.mrf.mxu3 }
 0x4c2   : > { %v3521_v16 = vadd.f32 %v3520_v18, %v6928_v43  ;;  %v3179_v59 = vpop.f32.mrf.mxu2 }
 0x4c3   : > { %v3180_v11 = vadd.f32 %v3179_v59, %v7204_v8  ;;  %v3331_v51 = vpop.f32.mrf.mxu1 }
 0x4c4   : > { %v3800_v48 = vmax.f32 %v3521_v16, 0.0  ;;  %v3332_v36 = vadd.f32 %v3331_v51, %v7736_v24  ;;  %v2990_v10 = vpop.f32.mrf.mxu0 }
 0x4c5   : > { %v3839_v25 = vmax.f32 %v3180_v11, 0.0  ;;  %v2991_v60 = vadd.f32 %v2990_v10, %v7790_v9  ;;  %v7791_v11 = vld [vmem:[#allocation17_spill] sm:$0xff]  ;;  %v7228_v10 = vpop.permute.xlu2 %2784 }
 0x4c6   : > { %4056 = vst [vmem:[%s6243_s27 + $0x698] sm:$0xff] %v3800_v48  ;;  %v3674_v63 = vmax.f32 %v3332_v36, 0.0  ;;  %3378 = vmatmul.f32.gmra.mxu1 %v6933_v56  ;;  %3570 = vmatmul.f32.gmra.mxu3 %v6935_v23 }
 0x4c7   : > { %4095 = vst [vmem:[%s6243_s27 + $0x7d0] sm:$0xff] %v3839_v25  ;;  %v3713_v43 = vmax.f32 %v2991_v60, 0.0 }
 0x4c8   : > { %3930 = vst [vmem:[%s6243_s27 + $0x2a8] sm:$0xff] %v3674_v63 }
 0x4c9   : > { %3969 = vst [vmem:[%s6243_s27 + $0x3e0] sm:$0xff] %v3713_v43  ;;  %v3523_v31 = vpop.f32.mrf.mxu3 }
 0x4ca   : > { %v3524_v24 = vadd.f32 %v3523_v31, %v6946_v62  ;;  %v3182_v3 = vpop.f32.mrf.mxu2 }
 0x4cb   : > { %v3183_v32 = vadd.f32 %v3182_v3, %v7216_v27  ;;  %v3334_v18 = vpop.f32.mrf.mxu1 }
 0x4cc   : > { %v3802_v56 = vmax.f32 %v3524_v24, 0.0  ;;  %v3335_v23 = vadd.f32 %v3334_v18, %v7737_v47  ;;  %v2993_v16 = vpop.f32.mrf.mxu0 }
 0x4cd   : > { %v3841_v59 = vmax.f32 %v3183_v32, 0.0  ;;  %v2994_v51 = vadd.f32 %v2993_v16, %v7791_v11 }
 0x4ce   : > { %4058 = vst [vmem:[%s6243_s27 + $0x6a8] sm:$0xff] %v3802_v56  ;;  %v3676_v48 = vmax.f32 %v3335_v23, 0.0  ;;  %3381 = vmatmul.f32.gmra.mxu1 %v6951_v39  ;;  %3573 = vmatmul.f32.gmra.mxu3 %v6953_v44 }
 0x4cf   : > { %4097 = vst [vmem:[%s6243_s27 + $0x7e0] sm:$0xff] %v3841_v59  ;;  %v3715_v62 = vmax.f32 %v2994_v51, 0.0  ;;  %v7792_v51 = vld [vmem:[#allocation48_spill] sm:$0xff] }
 0x4d0   : > { %3932 = vst [vmem:[%s6243_s27 + $0x2b8] sm:$0xff] %v3676_v48  ;;  %v7793_v48 = vld [vmem:[#allocation32_spill] sm:$0xff] }
 0x4d1   : > { %3971 = vst [vmem:[%s6243_s27 + $0x3f0] sm:$0xff] %v3715_v62  ;;  %v3526_v36 = vpop.f32.mrf.mxu3 }
 0x4d2   : > { %v3527_v47 = vadd.f32 %v3526_v36, %v6964_v61  ;;  %v3185_v25 = vpop.f32.mrf.mxu2 }
 0x4d3   : > { %v3186_v60 = vadd.f32 %v3185_v25, %v7228_v10  ;;  %v3337_v63 = vpop.f32.mrf.mxu1 }
 0x4d4   : > { %v3804_v43 = vmax.f32 %v3527_v47, 0.0  ;;  %v3338_v39 = vadd.f32 %v3337_v63, %v7738_v38 }
 0x4d5   : > { %v3843_v44 = vmax.f32 %v3186_v60, 0.0 }
 0x4d6   : > { %4060 = vst [vmem:[%s6243_s27 + $0x6b8] sm:$0xff] %v3804_v43  ;;  %v3678_v31 = vmax.f32 %v3338_v39, 0.0  ;;  %3384 = vmatmul.f32.gmra.mxu1 %v6969_v14  ;;  %3576 = vmatmul.f32.gmra.mxu3 %v6971_v53 }
 0x4d7   : > { %4099 = vst [vmem:[%s6243_s27 + $0x7f0] sm:$0xff] %v3843_v44 }
 0x4d8   : > { %3934 = vst [vmem:[%s6243_s27 + $0x2c8] sm:$0xff] %v3678_v31 }
 0x4d9   : > { %v3529_v61 = vpop.f32.mrf.mxu3 }
 0x4da   : > { %v3530_v24 = vadd.f32 %v3529_v61, %v6982_v17 }
 0x4db   : > { %v3340_v3 = vpop.f32.mrf.mxu1 }
 0x4dc   : > { %v3806_v32 = vmax.f32 %v3530_v24, 0.0  ;;  %v3341_v18 = vadd.f32 %v3340_v3, %v7739_v57 }
 0x4de   : > { %4062 = vst [vmem:[%s6243_s27 + $0x6c8] sm:$0xff] %v3806_v32  ;;  %v3680_v38 = vmax.f32 %v3341_v18, 0.0  ;;  %3387 = vmatmul.f32.gmra.mxu1 %v6987_v30  ;;  %3579 = vmatmul.f32.gmra.mxu3 %v6989_v21 }
 0x4e0   : > { %3936 = vst [vmem:[%s6243_s27 + $0x2d8] sm:$0xff] %v3680_v38 }
 0x4e1   : > { %v3532_v14 = vpop.f32.mrf.mxu3 }
 0x4e2   : > { %v3533_v53 = vadd.f32 %v3532_v14, %v7000_v26 }
 0x4e3   : > { %v3343_v56 = vpop.f32.mrf.mxu1 }
 0x4e4   : > { %v3808_v23 = vmax.f32 %v3533_v53, 0.0  ;;  %v3344_v17 = vadd.f32 %v3343_v56, %v7740_v19 }
 0x4e6   : > { %4064 = vst [vmem:[%s6243_s27 + $0x6d8] sm:$0xff] %v3808_v23  ;;  %v3682_v16 = vmax.f32 %v3344_v17, 0.0  ;;  %3390 = vmatmul.f32.gmra.mxu1 %v7005_v2  ;;  %3582 = vmatmul.f32.gmra.mxu3 %v7007_v50  ;;  %v7794_v50 = vld [vmem:[#allocation61_spill] sm:$0xff] }
 0x4e8   : > { %3938 = vst [vmem:[%s6243_s27 + $0x2e8] sm:$0xff] %v3682_v16 }
 0x4e9   : > { %v3535_v30 = vpop.f32.mrf.mxu3 }
 0x4ea   : > { %v3536_v21 = vadd.f32 %v3535_v30, %v7018_v13  ;;  %v7795_v13 = vld [vmem:[#allocation77_spill] sm:$0xff] }
 0x4eb   : > { %v3346_v57 = vpop.f32.mrf.mxu1 }
 0x4ec   : > { %v3810_v59 = vmax.f32 %v3536_v21, 0.0  ;;  %v3347_v26 = vadd.f32 %v3346_v57, %v7743_v33 }
 0x4ee   : > { %4066 = vst [vmem:[%s6243_s27 + $0x6e8] sm:$0xff] %v3810_v59  ;;  %v3684_v19 = vmax.f32 %v3347_v26, 0.0  ;;  %3393 = vmatmul.f32.gmra.mxu1 %v7792_v51  ;;  %3585 = vmatmul.f32.gmra.mxu3 %v7793_v48 }
 0x4f0   : > { %3940 = vst [vmem:[%s6243_s27 + $0x2f8] sm:$0xff] %v3684_v19 }
 0x4f1   : > { %v3538_v2 = vpop.f32.mrf.mxu3 }
 0x4f2   : > { %v3539_v62 = vadd.f32 %v3538_v2, %v7794_v50 }
 0x4f3   : > { %v3349_v36 = vpop.f32.mrf.mxu1 }
 0x4f4   : > { %v3812_v47 = vmax.f32 %v3539_v62, 0.0  ;;  %v3350_v25 = vadd.f32 %v3349_v36, %v7795_v13 }
 0x4f6   : > { %4068 = vst [vmem:[%s6243_s27 + $0x6f8] sm:$0xff] %v3812_v47  ;;  %v3686_v33 = vmax.f32 %v3350_v25, 0.0 }
 0x4f8   : > { %3942 = vst [vmem:[%s6243_s27 + $0x308] sm:$0xff] %v3686_v33 }
 0x4f9   : > { %v3541_v60 = vpop.f32.mrf.mxu3 }
 0x4fa   : > { %v3542_v63 = vadd.f32 %v3541_v60, %v7048_v54 }
 0x4fb   : > { %4689 = shalt.err (!%p4686_p0)
}
 0x4fc   : > { %s4791_s18 = smov 256   ;;  %s4792_s11 = smov 16   ;;  %v3352_v54 = vpop.f32.mrf.mxu1  ;;  %v3814_v43 = vmax.f32 %v3542_v63, 0.0 }
 0x4fd   : > { %4353 = dma.vmem_to_hbm [thread:$0]  (%p4911_p7), %s4122_s15, 4096, %s4124_s3, %s4102_s29, %s4791_s18, %s4791_s18, %s4792_s11   ;;  %v3353_v39 = vadd.f32 %v3352_v54, %v7752_v1 }
 0x4fe   : > { %4070 = vst [vmem:[%s6243_s27 + $0x708] sm:$0xff] %v3814_v43  ;;  %s4310_s1 = sshll.u32 %s4772_s24, 11  ;;  %s4140_s15 = sshll.u32 %s6243_s27, 4  ;;  %s4141_s15 = int_to_ptr.vmem [resolvable:$true] %s4140_s15 }
 0x4ff   : > { %v3688_v44 = vmax.f32 %v3353_v39, 0.0  ;;  %s4139_s30 = scalar_lea.hbm %s7389_s6, %s4310_s1  ;;  %s4107_s24 = scalar_lea.sflag [#allocation10], %s4932_s13 }
 0x500   : > { %s4142_s3 = sshll.u32 %s4139_s30, 4  ;;  %s4710_s10 = scalar_lea.hbm %s7389_s6, 4096  ;;  %s4143_s3 = int_to_ptr.hbm [resolvable:$true] %s4142_s3 }
 0x501   : > { %3944 = vst [vmem:[%s6243_s27 + $0x318] sm:$0xff] %v3688_v44  ;;  %v3544_v31 = vpop.f32.mrf.mxu3  ;;  %s4704_s29 = sshra.s32 %s4143_s3, 4  ;;  %s4705_s29 = int_to_ptr.hbm [resolvable:$true] %s4704_s29 }
 0x502   : > { %v3545_v61 = vadd.f32 %v3544_v31, %v7060_v15  ;;  %s4706_s7 = scalar_lea.hbm %s4705_s29, 2048  ;;  %p4711_p2 = scmp.lt.s32.totalorder %s4705_s29, %s7389_s6 }
 0x503   : > { %p4707_p3 = scmp.ne.s32.totalorder %s4705_s29, %s4706_s7  ;;  %p4712_p1 = scmp.lt.s32.totalorder %s4710_s10, %s4706_s7 }
 0x504   : > { %v3355_v24 = vpop.f32.mrf.mxu1  ;;  %v3816_v3 = vmax.f32 %v3545_v61, 0.0 }
 0x505   : > { %v3356_v32 = vadd.f32 %v3355_v24, %v7755_v49  ;;  %v7796_v24 = vld [vmem:[#allocation85_spill] sm:$0xff]  ;;  %p4708_p5 = pnand %p4707_p3, %p4911_p7  ;;  %p4713_p4 = por %p4712_p1, %p4711_p2 }
 0x506   : > { %4072 = vst [vmem:[%s6243_s27 + $0x718] sm:$0xff] %v3816_v3 }
 0x507   : > { %v3690_v18 = vmax.f32 %v3356_v32, 0.0  ;;  %p4709_p9 = pneg %p4708_p5 }
 0x509   : > { %3946 = vst [vmem:[%s6243_s27 + $0x328] sm:$0xff] %v3690_v18  ;;  %v3547_v38 = vpop.f32.mrf.mxu3  ;;  %p4714_p8 = pnand %p4713_p4, %p4709_p9 }
 0x50a   : > { %v3548_v1 = vadd.f32 %v3547_v38, %v7072_v29 }
 0x50c   : > { %v3358_v14 = vpop.f32.mrf.mxu1  ;;  %v3818_v53 = vmax.f32 %v3548_v1, 0.0 }
 0x50d   : > { %v3359_v56 = vadd.f32 %v3358_v14, %v7758_v35 }
 0x50e   : > { %4074 = vst [vmem:[%s6243_s27 + $0x728] sm:$0xff] %v3818_v53 }
 0x50f   : > { %v3692_v23 = vmax.f32 %v3359_v56, 0.0 }
 0x511   : > { %3948 = vst [vmem:[%s6243_s27 + $0x338] sm:$0xff] %v3692_v23  ;;  %v3550_v15 = vpop.f32.mrf.mxu3 }
 0x512   : > { %v3551_v49 = vadd.f32 %v3550_v15, %v7084_v7 }
 0x514   : > { %v3361_v17 = vpop.f32.mrf.mxu1  ;;  %v3820_v16 = vmax.f32 %v3551_v49, 0.0 }
 0x515   : > { %v3362_v30 = vadd.f32 %v3361_v17, %v7761_v45 }
 0x516   : > { %4076 = vst [vmem:[%s6243_s27 + $0x738] sm:$0xff] %v3820_v16 }
 0x517   : > { %v3694_v21 = vmax.f32 %v3362_v30, 0.0 }
 0x519   : > { %3950 = vst [vmem:[%s6243_s27 + $0x348] sm:$0xff] %v3694_v21  ;;  %v3553_v29 = vpop.f32.mrf.mxu3 }
 0x51a   : > { %v3554_v35 = vadd.f32 %v3553_v29, %v7096_v5 }
 0x51c   : > { %v3364_v57 = vpop.f32.mrf.mxu1  ;;  %v3822_v59 = vmax.f32 %v3554_v35, 0.0 }
 0x51d   : > { %v3365_v26 = vadd.f32 %v3364_v57, %v7764_v58 }
 0x51e   : > { %4078 = vst [vmem:[%s6243_s27 + $0x748] sm:$0xff] %v3822_v59 }
 0x51f   : > { %v3696_v19 = vmax.f32 %v3365_v26, 0.0 }
 0x521   : > { %3952 = vst [vmem:[%s6243_s27 + $0x358] sm:$0xff] %v3696_v19  ;;  %v3556_v7 = vpop.f32.mrf.mxu3 }
 0x522   : > { %v3557_v45 = vadd.f32 %v3556_v7, %v7108_v6 }
 0x524   : > { %v3367_v51 = vpop.f32.mrf.mxu1  ;;  %v3824_v48 = vmax.f32 %v3557_v45, 0.0 }
 0x525   : > { %v3368_v2 = vadd.f32 %v3367_v51, %v7767_v34 }
 0x526   : > { %4080 = vst [vmem:[%s6243_s27 + $0x758] sm:$0xff] %v3824_v48 }
 0x527   : > { %v3698_v50 = vmax.f32 %v3368_v2, 0.0 }
 0x529   : > { %3954 = vst [vmem:[%s6243_s27 + $0x368] sm:$0xff] %v3698_v50  ;;  %v3559_v5 = vpop.f32.mrf.mxu3 }
 0x52a   : > { %v3560_v58 = vadd.f32 %v3559_v5, %v7120_v22 }
 0x52c   : > { %v3370_v62 = vpop.f32.mrf.mxu1  ;;  %v3826_v36 = vmax.f32 %v3560_v58, 0.0 }
 0x52d   : > { %v3371_v47 = vadd.f32 %v3370_v62, %v7770_v28 }
 0x52e   : > { %4082 = vst [vmem:[%s6243_s27 + $0x768] sm:$0xff] %v3826_v36 }
 0x52f   : > { %v3700_v13 = vmax.f32 %v3371_v47, 0.0 }
 0x531   : > { %3956 = vst [vmem:[%s6243_s27 + $0x378] sm:$0xff] %v3700_v13  ;;  %v3562_v6 = vpop.f32.mrf.mxu3 }
 0x532   : > { %v3563_v34 = vadd.f32 %v3562_v6, %v7132_v4 }
 0x534   : > { %v3373_v25 = vpop.f32.mrf.mxu1  ;;  %v3828_v33 = vmax.f32 %v3563_v34, 0.0 }
 0x535   : > { %v3374_v60 = vadd.f32 %v3373_v25, %v7773_v12 }
 0x536   : > { %4084 = vst [vmem:[%s6243_s27 + $0x778] sm:$0xff] %v3828_v33 }
 0x537   : > { %v3702_v63 = vmax.f32 %v3374_v60, 0.0 }
 0x539   : > { %3958 = vst [vmem:[%s6243_s27 + $0x388] sm:$0xff] %v3702_v63  ;;  %v3565_v22 = vpop.f32.mrf.mxu3 }
 0x53a   : > { %v3566_v28 = vadd.f32 %v3565_v22, %v7144_v20 }
 0x53c   : > { %v3376_v54 = vpop.f32.mrf.mxu1  ;;  %v3830_v43 = vmax.f32 %v3566_v28, 0.0 }
 0x53d   : > { %v3377_v39 = vadd.f32 %v3376_v54, %v7776_v42 }
 0x53e   : > { %4086 = vst [vmem:[%s6243_s27 + $0x788] sm:$0xff] %v3830_v43 }
 0x53f   : > { %v3704_v44 = vmax.f32 %v3377_v39, 0.0 }
 0x541   : > { %3960 = vst [vmem:[%s6243_s27 + $0x398] sm:$0xff] %v3704_v44  ;;  %v3568_v4 = vpop.f32.mrf.mxu3 }
 0x542   : > { %v3569_v12 = vadd.f32 %v3568_v4, %v7156_v46 }
 0x544   : > { %v3379_v31 = vpop.f32.mrf.mxu1  ;;  %v3832_v61 = vmax.f32 %v3569_v12, 0.0 }
 0x545   : > { %v3380_v3 = vadd.f32 %v3379_v31, %v7796_v24 }
 0x546   : > { %4088 = vst [vmem:[%s6243_s27 + $0x798] sm:$0xff] %v3832_v61 }
 0x547   : > { %v3706_v32 = vmax.f32 %v3380_v3, 0.0 }
 0x549   : > { %3962 = vst [vmem:[%s6243_s27 + $0x3a8] sm:$0xff] %v3706_v32  ;;  %v3571_v20 = vpop.f32.mrf.mxu3 }
 0x54a   : > { %v3572_v42 = vadd.f32 %v3571_v20, %v7168_v41 }
 0x54c   : > { %v3382_v18 = vpop.f32.mrf.mxu1  ;;  %v3834_v38 = vmax.f32 %v3572_v42, 0.0 }
 0x54d   : > { %v3383_v1 = vadd.f32 %v3382_v18, %v7783_v0 }
 0x54e   : > { %4090 = vst [vmem:[%s6243_s27 + $0x7a8] sm:$0xff] %v3834_v38 }
 0x54f   : > { %v3708_v14 = vmax.f32 %v3383_v1, 0.0 }
 0x551   : > { %3964 = vst [vmem:[%s6243_s27 + $0x3b8] sm:$0xff] %v3708_v14  ;;  %v3574_v46 = vpop.f32.mrf.mxu3 }
 0x552   : > { %v3575_v53 = vadd.f32 %v3574_v46, %v7180_v55 }
 0x554   : > { %v3385_v56 = vpop.f32.mrf.mxu1  ;;  %v3836_v23 = vmax.f32 %v3575_v53, 0.0 }
 0x555   : > { %v3386_v15 = vadd.f32 %v3385_v56, %v7786_v37 }
 0x556   : > { %4092 = vst [vmem:[%s6243_s27 + $0x7b8] sm:$0xff] %v3836_v23 }
 0x557   : > { %v3710_v49 = vmax.f32 %v3386_v15, 0.0 }
 0x559   : > { %3966 = vst [vmem:[%s6243_s27 + $0x3c8] sm:$0xff] %v3710_v49  ;;  %v3577_v41 = vpop.f32.mrf.mxu3 }
 0x55a   : > { %v3578_v0 = vadd.f32 %v3577_v41, %v7192_v52 }
 0x55c   : > { %v3388_v17 = vpop.f32.mrf.mxu1  ;;  %v3838_v16 = vmax.f32 %v3578_v0, 0.0 }
 0x55d   : > { %v3389_v30 = vadd.f32 %v3388_v17, %v7789_v40 }
 0x55e   : > { %4094 = vst [vmem:[%s6243_s27 + $0x7c8] sm:$0xff] %v3838_v16 }
 0x55f   : > { %v3712_v21 = vmax.f32 %v3389_v30, 0.0 }
 0x561   : > { %3968 = vst [vmem:[%s6243_s27 + $0x3d8] sm:$0xff] %v3712_v21  ;;  %v3580_v55 = vpop.f32.mrf.mxu3 }
 0x562   : > { %v3581_v37 = vadd.f32 %v3580_v55, %v7204_v8 }
 0x564   : > { %v3391_v29 = vpop.f32.mrf.mxu1  ;;  %v3840_v35 = vmax.f32 %v3581_v37, 0.0 }
 0x565   : > { %v3392_v57 = vadd.f32 %v3391_v29, %v7790_v9 }
 0x566   : > { %4096 = vst [vmem:[%s6243_s27 + $0x7d8] sm:$0xff] %v3840_v35 }
 0x567   : > { %v3714_v52 = vmax.f32 %v3392_v57, 0.0 }
 0x569   : > { %3970 = vst [vmem:[%s6243_s27 + $0x3e8] sm:$0xff] %v3714_v52  ;;  %v3583_v59 = vpop.f32.mrf.mxu3 }
 0x56a   : > { %v3584_v26 = vadd.f32 %v3583_v59, %v7216_v27 }
 0x56c   : > { %v3394_v40 = vpop.f32.mrf.mxu1  ;;  %v3842_v19 = vmax.f32 %v3584_v26, 0.0 }
 0x56d   : > { %v3395_v7 = vadd.f32 %v3394_v40, %v7791_v11 }
 0x56e   : > { %4098 = vst [vmem:[%s6243_s27 + $0x7e8] sm:$0xff] %v3842_v19 }
 0x56f   : > { %v3716_v8 = vmax.f32 %v3395_v7, 0.0 }
 0x571   : > { %3972 = vst [vmem:[%s6243_s27 + $0x3f8] sm:$0xff] %v3716_v8  ;;  %v3586_v9 = vpop.f32.mrf.mxu3 }
 0x572   : > { %v3587_v27 = vadd.f32 %v3586_v9, %v7228_v10 }
 0x574   : > { %v3844_v45 = vmax.f32 %v3587_v27, 0.0 }
 0x576   : > { %4100 = vst [vmem:[%s6243_s27 + $0x7f8] sm:$0xff] %v3844_v45 }
 0x577   : > { %4717 = shalt.err (!%p4714_p8)
}
 0x578   : > { %4354 = dma.vmem_to_hbm [thread:$0]  (%p4911_p7), %s4141_s15, 32768, %s4143_s3, %s4107_s24, %s4791_s18, %s4791_s18, %s4792_s11  }
 0x579 PF: > { %s4157_s27 = sand.u32 1, %s4760_s21   ;;  %p4369_p10 = pnand %p4290_p11, %p4877_p6 }
 0x57a   : > { %s4158_s17 = scalar_lea.sflag [#allocation4], %s4157_s27 }
 0x57b   : > { %p4370_p12 = pneg %p4369_p10 }
 0x57d   : > { %4751 = dma.done.wait (%p4370_p12), %s4158_s17, 4096  }
 0x57e   : > { %4753 = vsyncadd (%p4370_p12), %s4158_s17, 4294963200  ;;  %s4168_s1 = scalar_lea.sflag [#allocation10], %s4157_s27 }
 0x57f   : > { %4755 = dma.done.wait (%p4370_p12), %s4168_s1, 32768  }
 0x580   : > { %4757 = vsyncadd (%p4370_p12), %s4168_s1, 4294934528  ;;  %s27_s26 = sadd.s32 1, %s4780_s26   ;;  %s7798_s14 = sld [smem:[#allocation16_spill]] }
 0x581   : > { %p24_p13 = scmp.ge.s32.totalorder %s27_s26, 4   ;;  %s7799_s21 = smov %s4764_s22 }
 0x582   : > { %s7800_s22 = smov %s4768_s23  ;;  %s7801_s23 = smov %s4920_s19 }
 0x583   : > { %s7802_s24 = smov %s4776_s25  ;;  %26 = sbr.rel (!%p24_p13) target bundleno = 12 (0xc), region = 110 }
 0x586   : > { %s7803_s25 = smov %s7798_s14 }
 0x588   :  { %4174 = vsyncpa [#allocation3], 1 }
 0x589   :  { %4176 = vsyncpa [#allocation3 + $0x1], 1 }
 0x58a   :  { %4177 = vsyncpa [#allocation6], 1 }
 0x58b   :  { %4178 = vsyncpa [#allocation4], 1 }
 0x58c   :  { %4180 = vsyncpa [#allocation4 + $0x1], 1 }
 0x58d   :  { %4181 = vsyncpa [#allocation10], 1 }
 0x58e   :  { %4183 = vsyncpa [#allocation10 + $0x1], 1 }

</bundles_post_ra>
